<compile_context>
chip_gen: v6e
topology: v6e:2x2x1
jax: 0.10.0
libtpu: 0.0.40
codegen_flags: <defaults>
</compile_context>

<pallas_src>
import jax
import jax.numpy as jnp
from jax.experimental import pallas as pl
from jax.experimental.pallas import tpu as pltpu

LATENT_DIM = 100
LATENT_PAD = 128          # 100 -> 128 lanes (lane-dense, unmasked loads)
HIDDEN = (256, 512, 1024)
OUT_DIM = 784             # 1 * 28 * 28
OUT_PAD = 896             # 784 -> 7 * 128 lanes (lane-dense, unmasked stores)


def _round_up(x, m):
    return ((x + m - 1) // m) * m


def _device_kind():
    try:
        return jax.devices()[0].device_kind.lower()
    except Exception:
        return ""


def _activation_dtype():
    # v5e has no bf16 VPU/EUP -> keep the elementwise chain in f32 there;
    # v6e / v7x VALUs are bf16-native, so bf16 halves the VALU passes.
    return jnp.float32 if "v5" in _device_kind() else jnp.bfloat16


def _leaky_relu(x, slope=0.2):
    # max(x, slope*x) == LeakyReLU(slope) for slope in (0, 1);
    # one fewer VALU pass than compare + select.
    return jnp.maximum(x, slope * x)


# ----------------------------- kernel ---------------------------------------

def generator_kernel(z_ref,
                     w1_ref, b1_ref,
                     w2_ref, b2_ref,
                     w3_ref, b3_ref,
                     w4_ref, b4_ref,
                     o_ref):
    # Hidden layers: bf16 x bf16 MXU matmul with f32 accumulation, then
    # bias + LeakyReLU in the bias dtype (bf16 on v6e/v7x, f32 on v5e).
    h = jnp.dot(z_ref[...], w1_ref[...], preferred_element_type=jnp.float32)
    h = _leaky_relu(h.astype(b1_ref.dtype) + b1_ref[...])

    h = jnp.dot(h.astype(w2_ref.dtype), w2_ref[...],
                preferred_element_type=jnp.float32)
    h = _leaky_relu(h.astype(b2_ref.dtype) + b2_ref[...])

    h = jnp.dot(h.astype(w3_ref.dtype), w3_ref[...],
                preferred_element_type=jnp.float32)
    h = _leaky_relu(h.astype(b3_ref.dtype) + b3_ref[...])

    # Output layer: f32 bias add + tanh (EUP) for best output accuracy.
    h = jnp.dot(h.astype(w4_ref.dtype), w4_ref[...],
                preferred_element_type=jnp.float32)
    o_ref[...] = jnp.tanh(h + b4_ref[...]).astype(o_ref.dtype)


# ---------------------- one-time parameter preparation ----------------------

def prepare_params(params, compute_dtype=jnp.bfloat16, act_dtype=None):
    """One-time layout/dtype prep. Call once and reuse across forwards so the
    kernel call only reads ~3 MiB of bf16 weights from HBM."""
    if act_dtype is None:
        act_dtype = _activation_dtype()
    (w1, b1), (w2, b2), (w3, b3), (w4, b4) = params

    # Zero-padding latent / output feature dims does not change the math.
    w1p = jnp.zeros((LATENT_PAD, HIDDEN[0]), compute_dtype).at[:LATENT_DIM, :].set(
        w1.astype(compute_dtype))
    w2p = w2.astype(compute_dtype)
    w3p = w3.astype(compute_dtype)
    w4p = jnp.zeros((HIDDEN[2], OUT_PAD), compute_dtype).at[:, :OUT_DIM].set(
        w4.astype(compute_dtype))

    b1p = b1.reshape(1, -1).astype(act_dtype)
    b2p = b2.reshape(1, -1).astype(act_dtype)
    b3p = b3.reshape(1, -1).astype(act_dtype)
    b4p = jnp.zeros((1, OUT_PAD), jnp.float32).at[:, :OUT_DIM].set(
        b4.reshape(1, -1).astype(jnp.float32))

    return (w1p, b1p, w2p, b2p, w3p, b3p, w4p, b4p)


# ------------------------------ tiling ---------------------------------------

def _pick_tiling(batch):
    """Pick (tm, b_pad). Tiles are multiples of 16 rows (bf16 sublane pack);
    TM up to 512 to amortize per-grid-step overhead; on v7x keep >= 2 tiles
    so the parallel batch axis lands one tile on each TensorCore."""
    b16 = _round_up(max(batch, 1), 16)
    tm_max = 512
    kind = _device_kind()
    if ("v7" in kind or "7x" in kind) and b16 >= 32:
        tm = min(tm_max, _round_up(b16 // 2, 16))
    else:
        tm = min(tm_max, b16)
    b_pad = _round_up(b16, tm)
    return tm, b_pad


# ------------------------------ forward --------------------------------------

def generator_forward(z, prepared):
    """z: (B, LATENT_DIM) f32, prepared: output of prepare_params()
    -> img: (B, 1, 28, 28) f32."""
    B = z.shape[0]
    w1p, b1p, w2p, b2p, w3p, b3p, w4p, b4p = prepared

    tm, b_pad = _pick_tiling(B)
    grid = (b_pad // tm,)

    zp = jnp.zeros((b_pad, LATENT_PAD), w1p.dtype).at[:B, :LATENT_DIM].set(
        z.astype(w1p.dtype))

    def resident(arr):
        # Constant index_map: block never changes -> stays VMEM-resident,
        # DMA'd once instead of per grid step.
        return pl.BlockSpec(arr.shape, lambda i: (0, 0))

    flat = pl.pallas_call(
        generator_kernel,
        out_shape=jax.ShapeDtypeStruct((b_pad, OUT_PAD), jnp.float32),
        grid=grid,
        in_specs=[
            pl.BlockSpec((tm, LATENT_PAD), lambda i: (i, 0)),
            resident(w1p), resident(b1p),
            resident(w2p), resident(b2p),
            resident(w3p), resident(b3p),
            resident(w4p), resident(b4p),
        ],
        out_specs=pl.BlockSpec((tm, OUT_PAD), lambda i: (i, 0)),
        compiler_params=pltpu.CompilerParams(
            dimension_semantics=("parallel",),   # v7x: batch tiles over 2 TCs
            vmem_limit_bytes=32 << 20,           # ~<20 MiB used at TM=512
        ),
    )(zp, w1p, b1p, w2p, b2p, w3p, b3p, w4p, b4p)

    # Glue: drop padding; NCHW view matching PyTorch img.view(B, 1, 28, 28).
    # Padded rows (B..b_pad) hold junk and are discarded here by design.
    return flat[:B, :OUT_DIM].reshape(B, 1, 28, 28)


# ------------------------------ reference ------------------------------------

def init_params(key):
    """Deterministic parameter init. Weights stored as (in, out) f32."""
    dims = (LATENT_DIM,) + HIDDEN + (OUT_DIM,)
    params = []
    for i in range(len(dims) - 1):
        fan_in, fan_out = dims[i], dims[i + 1]
        key, kw, kb = jax.random.split(key, 3)
        bound = 1.0 / jnp.sqrt(fan_in)
        w = jax.random.uniform(kw, (fan_in, fan_out), jnp.float32, -bound, bound)
        b = jax.random.uniform(kb, (fan_out,), jnp.float32, -bound, bound)
        params.append((w, b))
    return params


def reference_forward(z, params, compute_dtype=jnp.bfloat16, act_dtype=None):
    """Pure-JAX reference mirroring the kernel's mixed precision:
    bf16 matmul inputs, f32 accumulation, hidden bias/LeakyReLU in act_dtype,
    final bias + tanh in f32."""
    if act_dtype is None:
        act_dtype = _activation_dtype()
    h = z
    n = len(params)
    for i, (w, b) in enumerate(params):
        acc = jnp.dot(h.astype(compute_dtype), w.astype(compute_dtype),
                      preferred_element_type=jnp.float32)
        if i < n - 1:
            a = acc.astype(act_dtype) + b.reshape(1, -1).astype(act_dtype)
            h = jnp.maximum(a, 0.2 * a)
        else:
            h = jnp.tanh(acc + b.reshape(1, -1).astype(jnp.float32))
    return h.reshape(z.shape[0], 1, 28, 28)


# -------------------------------- main ---------------------------------------

if __name__ == "__main__":
    key = jax.random.PRNGKey(0)
    key_z, key_p = jax.random.split(key)

    B = 2
    z = jax.random.normal(key_z, (B, LATENT_DIM), dtype=jnp.float32)
    params = init_params(key_p)

    # One-time prep (padding + bf16 cast); reused across forward calls.
    prepared = prepare_params(params)

    fwd = jax.jit(generator_forward)
    img = jax.block_until_ready(fwd(z, prepared))

    assert img.shape == (B, 1, 28, 28), img.shape
    assert img.dtype == jnp.float32, img.dtype

    ref = reference_forward(z, params)
    err = float(jnp.max(jnp.abs(img - ref)))
    assert jnp.allclose(img, ref, atol=2e-3, rtol=2e-3), \
        f"mismatch vs reference, max|diff|={err}"

    print("KERNEL_OK")
</pallas_src>

<mosaic_0001>
module attributes {stable_mosaic.version = 11 : i64} {
  func.func @generator_kernel(%arg0: i32, %arg1: memref<16x128xbf16, #tpu.memory_space<vmem>>, %arg2: memref<128x256xbf16, #tpu.memory_space<vmem>>, %arg3: memref<1x256xbf16, #tpu.memory_space<vmem>>, %arg4: memref<256x512xbf16, #tpu.memory_space<vmem>>, %arg5: memref<1x512xbf16, #tpu.memory_space<vmem>>, %arg6: memref<512x1024xbf16, #tpu.memory_space<vmem>>, %arg7: memref<1x1024xbf16, #tpu.memory_space<vmem>>, %arg8: memref<1024x896xbf16, #tpu.memory_space<vmem>>, %arg9: memref<1x896xf32, #tpu.memory_space<vmem>>, %arg10: memref<16x896xf32, #tpu.memory_space<vmem>>) attributes {dimension_semantics = [#tpu.dimension_semantics<parallel>], iteration_bounds = array<i64: 1>, scalar_prefetch = 0 : i64, scratch_operands = 0 : i64, tpu.core_type = #tpu.core_type<tc>, window_params = [{transform_indices = @transform_0, window_bounds = array<i64: 16, 128>}, {pipeline_mode = #tpu.pipeline_mode<synchronous>, transform_indices = @transform_1, window_bounds = array<i64: 128, 256>}, {pipeline_mode = #tpu.pipeline_mode<synchronous>, transform_indices = @transform_2, window_bounds = array<i64: 1, 256>}, {pipeline_mode = #tpu.pipeline_mode<synchronous>, transform_indices = @transform_3, window_bounds = array<i64: 256, 512>}, {pipeline_mode = #tpu.pipeline_mode<synchronous>, transform_indices = @transform_4, window_bounds = array<i64: 1, 512>}, {pipeline_mode = #tpu.pipeline_mode<synchronous>, transform_indices = @transform_5, window_bounds = array<i64: 512, 1024>}, {pipeline_mode = #tpu.pipeline_mode<synchronous>, transform_indices = @transform_6, window_bounds = array<i64: 1, 1024>}, {pipeline_mode = #tpu.pipeline_mode<synchronous>, transform_indices = @transform_7, window_bounds = array<i64: 1024, 896>}, {pipeline_mode = #tpu.pipeline_mode<synchronous>, transform_indices = @transform_8, window_bounds = array<i64: 1, 896>}, {transform_indices = @transform_9, window_bounds = array<i64: 16, 896>}]} {
    %c0 = arith.constant 0 : index
    %c0_0 = arith.constant 0 : index
    %0 = vector.load %arg1[%c0, %c0_0] : memref<16x128xbf16, #tpu.memory_space<vmem>>, vector<16x128xbf16>
    %c0_1 = arith.constant 0 : index
    %c0_2 = arith.constant 0 : index
    %1 = vector.load %arg2[%c0_1, %c0_2] : memref<128x256xbf16, #tpu.memory_space<vmem>>, vector<128x256xbf16>
    %cst = arith.constant dense<0.000000e+00> : vector<16x256xf32>
    %2 = tpu.matmul %0, %1, %cst {dimension_numbers = #tpu.dot_dimension_numbers<[1], [0], [0], [1], [0, 0, 1, 1], [], []>} : vector<16x128xbf16>, vector<128x256xbf16>, vector<16x256xf32> -> vector<16x256xf32>
    %3 = arith.truncf %2 : vector<16x256xf32> to vector<16x256xbf16>
    %c0_3 = arith.constant 0 : index
    %c0_4 = arith.constant 0 : index
    %4 = vector.load %arg3[%c0_3, %c0_4] : memref<1x256xbf16, #tpu.memory_space<vmem>>, vector<1x256xbf16>
    %5 = vector.broadcast %4 : vector<1x256xbf16> to vector<16x256xbf16>
    %6 = arith.addf %3, %5 : vector<16x256xbf16>
    %cst_5 = arith.constant 2.001950e-01 : bf16
    %7 = vector.broadcast %cst_5 : bf16 to vector<16x256xbf16>
    %8 = arith.mulf %7, %6 : vector<16x256xbf16>
    %9 = arith.maximumf %6, %8 : vector<16x256xbf16>
    %c0_6 = arith.constant 0 : index
    %c0_7 = arith.constant 0 : index
    %10 = vector.load %arg4[%c0_6, %c0_7] : memref<256x512xbf16, #tpu.memory_space<vmem>>, vector<256x512xbf16>
    %cst_8 = arith.constant dense<0.000000e+00> : vector<16x512xf32>
    %11 = tpu.matmul %9, %10, %cst_8 {dimension_numbers = #tpu.dot_dimension_numbers<[1], [0], [0], [1], [0, 0, 1, 1], [], []>} : vector<16x256xbf16>, vector<256x512xbf16>, vector<16x512xf32> -> vector<16x512xf32>
    %12 = arith.truncf %11 : vector<16x512xf32> to vector<16x512xbf16>
    %c0_9 = arith.constant 0 : index
    %c0_10 = arith.constant 0 : index
    %13 = vector.load %arg5[%c0_9, %c0_10] : memref<1x512xbf16, #tpu.memory_space<vmem>>, vector<1x512xbf16>
    %14 = vector.broadcast %13 : vector<1x512xbf16> to vector<16x512xbf16>
    %15 = arith.addf %12, %14 : vector<16x512xbf16>
    %cst_11 = arith.constant 2.001950e-01 : bf16
    %16 = vector.broadcast %cst_11 : bf16 to vector<16x512xbf16>
    %17 = arith.mulf %16, %15 : vector<16x512xbf16>
    %18 = arith.maximumf %15, %17 : vector<16x512xbf16>
    %c0_12 = arith.constant 0 : index
    %c0_13 = arith.constant 0 : index
    %19 = vector.load %arg6[%c0_12, %c0_13] : memref<512x1024xbf16, #tpu.memory_space<vmem>>, vector<512x1024xbf16>
    %cst_14 = arith.constant dense<0.000000e+00> : vector<16x1024xf32>
    %20 = tpu.matmul %18, %19, %cst_14 {dimension_numbers = #tpu.dot_dimension_numbers<[1], [0], [0], [1], [0, 0, 1, 1], [], []>} : vector<16x512xbf16>, vector<512x1024xbf16>, vector<16x1024xf32> -> vector<16x1024xf32>
    %21 = arith.truncf %20 : vector<16x1024xf32> to vector<16x1024xbf16>
    %c0_15 = arith.constant 0 : index
    %c0_16 = arith.constant 0 : index
    %22 = vector.load %arg7[%c0_15, %c0_16] : memref<1x1024xbf16, #tpu.memory_space<vmem>>, vector<1x1024xbf16>
    %23 = vector.broadcast %22 : vector<1x1024xbf16> to vector<16x1024xbf16>
    %24 = arith.addf %21, %23 : vector<16x1024xbf16>
    %cst_17 = arith.constant 2.001950e-01 : bf16
    %25 = vector.broadcast %cst_17 : bf16 to vector<16x1024xbf16>
    %26 = arith.mulf %25, %24 : vector<16x1024xbf16>
    %27 = arith.maximumf %24, %26 : vector<16x1024xbf16>
    %c0_18 = arith.constant 0 : index
    %c0_19 = arith.constant 0 : index
    %28 = vector.load %arg8[%c0_18, %c0_19] : memref<1024x896xbf16, #tpu.memory_space<vmem>>, vector<1024x896xbf16>
    %cst_20 = arith.constant dense<0.000000e+00> : vector<16x896xf32>
    %29 = tpu.matmul %27, %28, %cst_20 {dimension_numbers = #tpu.dot_dimension_numbers<[1], [0], [0], [1], [0, 0, 1, 1], [], []>} : vector<16x1024xbf16>, vector<1024x896xbf16>, vector<16x896xf32> -> vector<16x896xf32>
    %c0_21 = arith.constant 0 : index
    %c0_22 = arith.constant 0 : index
    %30 = vector.load %arg9[%c0_21, %c0_22] : memref<1x896xf32, #tpu.memory_space<vmem>>, vector<1x896xf32>
    %31 = vector.broadcast %30 : vector<1x896xf32> to vector<16x896xf32>
    %32 = arith.addf %29, %31 : vector<16x896xf32>
    %33 = math.tanh %32 : vector<16x896xf32>
    %c0_23 = arith.constant 0 : index
    %c0_24 = arith.constant 0 : index
    %34 = vector.load %arg10[%c0_23, %c0_24] : memref<16x896xf32, #tpu.memory_space<vmem>>, vector<16x896xf32>
    tpu.vector_store %arg10[%c0_23, %c0_24], %33 {strides = array<i32>} : memref<16x896xf32, #tpu.memory_space<vmem>>, vector<16x896xf32>,
    return
  }
  func.func @transform_0(%arg0: i32) -> (i32, i32) {
    %c0_i32 = arith.constant 0 : i32
    %c0_i32_0 = arith.constant 0 : i32
    return %arg0, %c0_i32 : i32, i32
  }
  func.func @transform_1(%arg0: i32) -> (i32, i32) {
    %c0_i32 = arith.constant 0 : i32
    %c0_i32_0 = arith.constant 0 : i32
    %c0_i32_1 = arith.constant 0 : i32
    return %c0_i32, %c0_i32_0 : i32, i32
  }
  func.func @transform_2(%arg0: i32) -> (i32, i32) {
    %c0_i32 = arith.constant 0 : i32
    %c0_i32_0 = arith.constant 0 : i32
    %c0_i32_1 = arith.constant 0 : i32
    return %c0_i32, %c0_i32_0 : i32, i32
  }
  func.func @transform_3(%arg0: i32) -> (i32, i32) {
    %c0_i32 = arith.constant 0 : i32
    %c0_i32_0 = arith.constant 0 : i32
    %c0_i32_1 = arith.constant 0 : i32
    return %c0_i32, %c0_i32_0 : i32, i32
  }
  func.func @transform_4(%arg0: i32) -> (i32, i32) {
    %c0_i32 = arith.constant 0 : i32
    %c0_i32_0 = arith.constant 0 : i32
    %c0_i32_1 = arith.constant 0 : i32
    return %c0_i32, %c0_i32_0 : i32, i32
  }
  func.func @transform_5(%arg0: i32) -> (i32, i32) {
    %c0_i32 = arith.constant 0 : i32
    %c0_i32_0 = arith.constant 0 : i32
    %c0_i32_1 = arith.constant 0 : i32
    return %c0_i32, %c0_i32_0 : i32, i32
  }
  func.func @transform_6(%arg0: i32) -> (i32, i32) {
    %c0_i32 = arith.constant 0 : i32
    %c0_i32_0 = arith.constant 0 : i32
    %c0_i32_1 = arith.constant 0 : i32
    return %c0_i32, %c0_i32_0 : i32, i32
  }
  func.func @transform_7(%arg0: i32) -> (i32, i32) {
    %c0_i32 = arith.constant 0 : i32
    %c0_i32_0 = arith.constant 0 : i32
    %c0_i32_1 = arith.constant 0 : i32
    return %c0_i32, %c0_i32_0 : i32, i32
  }
  func.func @transform_8(%arg0: i32) -> (i32, i32) {
    %c0_i32 = arith.constant 0 : i32
    %c0_i32_0 = arith.constant 0 : i32
    %c0_i32_1 = arith.constant 0 : i32
    return %c0_i32, %c0_i32_0 : i32, i32
  }
  func.func @transform_9(%arg0: i32) -> (i32, i32) {
    %c0_i32 = arith.constant 0 : i32
    %c0_i32_0 = arith.constant 0 : i32
    return %arg0, %c0_i32 : i32, i32
  }
}

</mosaic_0001>

<bundles_post_ra>
// kernel: generator_forward.1
= control target key start
LH: loop header
LB: loop body
LE: loop exit
PB: predicated region body
PF: predicated region fallthrough
CT: control target
= control target key end

     0   :  { %14 = vsyncpa [#allocation3], 0  ;;  %s8619_s0 = inlined_call_operand.vmem [shape: bf16[16,128], index: 0, kind: input, shape index: {}]   ;;  %s8620_s1 = inlined_call_operand.hbm [shape: bf16[128,256], index: 1, kind: input, shape index: {}]   ;;  %s8621_s2 = inlined_call_operand.hbm [shape: bf16[1,256], index: 2, kind: input, shape index: {}]   ;;  %s8622_s3 = inlined_call_operand.hbm [shape: bf16[256,512], index: 3, kind: input, shape index: {}]   ;;  %s8623_s4 = inlined_call_operand.hbm [shape: bf16[1,512], index: 4, kind: input, shape index: {}]   ;;  %s8624_s5 = inlined_call_operand.hbm [shape: bf16[512,1024], index: 5, kind: input, shape index: {}]   ;;  %s8625_s6 = inlined_call_operand.hbm [shape: bf16[1,1024], index: 6, kind: input, shape index: {}]   ;;  %s8626_s7 = inlined_call_operand.hbm [shape: bf16[1024,896], index: 7, kind: input, shape index: {}]   ;;  %s8627_s8 = inlined_call_operand.hbm [shape: f32[1,896], index: 8, kind: input, shape index: {}]   ;;  %s8628_s9 = inlined_call_operand.vmem [shape: f32[16,896], index: 9, kind: output, shape index: {}]  }
   0x1   :  { %15 = vsyncpa [#allocation5], 0 }
   0x2   :  { %16 = vsyncpa [#allocation8], 0 }
   0x3   :  { %17 = vsyncpa [#allocation11], 0 }
   0x4   :  { %18 = vsyncpa [#allocation14], 0  ;;  %s8310_s30 = smov [#allocation4]   ;;  %s8311_s11 = smov [#allocation7]  }
   0x5   :  { %s39_s10 = sshll.u32 %s8310_s30, 4  ;;  %s61_s12 = sshll.u32 %s8311_s11, 4  ;;  %s40_s10 = int_to_ptr.vmem [resolvable:$true] %s39_s10  ;;  %s62_s12 = int_to_ptr.vmem [resolvable:$true] %s61_s12 }
   0x6   :  { %s8148_s13 = scalar_lea.vmem %s40_s10, 32  ;;  %p8153_p1 = scmp.lt.s32.totalorder %s40_s10, %s40_s10 }
   0x7   :  { %p8149_p0 = scmp.ne.s32.totalorder %s40_s10, %s8148_s13  ;;  %p8154_p2 = scmp.lt.s32.totalorder %s8148_s13, %s8148_s13 }
   0x9   :  { %p8155_p3 = por %p8154_p2, %p8153_p1 }
   0xb   :  { %p8156_p4 = pnand %p8155_p3, %p8149_p0 }
   0xd   :  { %8159 = shalt.err (!%p8156_p4)
}
   0xe   :  { %42 = dma.hbm_to_vmem [thread:$0]  %s8621_s2, 32, %s40_s10, [#allocation5]  }
   0xf   :  { %s8168_s16 = scalar_lea.vmem %s62_s12, 64  ;;  %p8173_p6 = scmp.lt.s32.totalorder %s62_s12, %s62_s12 }
  0x10   :  { %p8169_p5 = scmp.ne.s32.totalorder %s62_s12, %s8168_s16  ;;  %p8174_p7 = scmp.lt.s32.totalorder %s8168_s16, %s8168_s16 }
  0x12   :  { %p8175_p8 = por %p8174_p7, %p8173_p6 }
  0x14   :  { %p8176_p9 = pnand %p8175_p8, %p8169_p5 }
  0x16   :  { %8179 = shalt.err (!%p8176_p9)
}
  0x17   :  { %64 = dma.hbm_to_vmem [thread:$0]  %s8623_s4, 64, %s62_s12, [#allocation8]  }
  0x18   :  { %s8312_s19 = smov [#allocation10]   ;;  %s8313_s21 = smov [#allocation2]  }
  0x19   :  { %s83_s20 = sshll.u32 %s8312_s19, 4  ;;  %s26_s22 = sshll.u32 %s8313_s21, 4  ;;  %s84_s20 = int_to_ptr.vmem [resolvable:$true] %s83_s20  ;;  %s27_s22 = int_to_ptr.vmem [resolvable:$true] %s26_s22 }
  0x1a   :  { %s8188_s23 = scalar_lea.vmem %s84_s20, 128  ;;  %p8193_p11 = scmp.lt.s32.totalorder %s84_s20, %s84_s20 }
  0x1b   :  { %p8189_p10 = scmp.ne.s32.totalorder %s84_s20, %s8188_s23  ;;  %p8194_p12 = scmp.lt.s32.totalorder %s8188_s23, %s8188_s23 }
  0x1d   :  { %p8195_p13 = por %p8194_p12, %p8193_p11 }
  0x1f   :  { %p8196_p0 = pnand %p8195_p13, %p8189_p10 }
  0x21   :  { %8199 = shalt.err (!%p8196_p0)
}
  0x22   :  { %86 = dma.hbm_to_vmem [thread:$0]  %s8625_s6, 128, %s84_s20, [#allocation11]  }
  0x23   :  { %s8208_s25 = scalar_lea.vmem %s27_s22, 2048  ;;  %p8213_p2 = scmp.lt.s32.totalorder %s27_s22, %s27_s22 }
  0x24   :  { %p8209_p1 = scmp.ne.s32.totalorder %s27_s22, %s8208_s25  ;;  %p8214_p3 = scmp.lt.s32.totalorder %s8208_s25, %s8208_s25 }
  0x26   :  { %p8215_p4 = por %p8214_p3, %p8213_p2 }
  0x28   :  { %p8216_p5 = pnand %p8215_p4, %p8209_p1 }
  0x2a   :  { %8219 = shalt.err (!%p8216_p5)
}
  0x2b   :  { %s8314_s4 = smov 128   ;;  %s8315_s26 = smov 8  }
  0x2c   :  { %32 = dma.hbm_to_vmem [thread:$0]  %s8620_s1, 2048, %s27_s22, [#allocation3], %s8314_s4, %s8314_s4, %s8315_s26  }
  0x2d   :  { %s8316_s29 = smov [#allocation6]  }
  0x2e   :  { %s48_s30 = sshll.u32 %s8316_s29, 4  ;;  %s49_s30 = int_to_ptr.vmem [resolvable:$true] %s48_s30 }
  0x2f   :  { %s8228_s10 = scalar_lea.vmem %s49_s30, 8192  ;;  %p8233_p7 = scmp.lt.s32.totalorder %s49_s30, %s49_s30 }
  0x30   :  { %p8229_p6 = scmp.ne.s32.totalorder %s49_s30, %s8228_s10  ;;  %p8234_p8 = scmp.lt.s32.totalorder %s8228_s10, %s8228_s10 }
  0x32   :  { %p8235_p9 = por %p8234_p8, %p8233_p7 }
  0x34   :  { %p8236_p10 = pnand %p8235_p9, %p8229_p6 }
  0x36   :  { %8239 = shalt.err (!%p8236_p10)
}
  0x37   :  { %s8317_s6 = smov 256   ;;  %s8318_s11 = smov 16  }
  0x38   :  { %54 = dma.hbm_to_vmem [thread:$0]  %s8622_s3, 8192, %s49_s30, [#allocation5], %s8317_s6, %s8317_s6, %s8318_s11  }
  0x39   :  { %s8319_s14 = smov [#allocation9]  }
  0x3a   :  { %s70_s15 = sshll.u32 %s8319_s14, 4  ;;  %s71_s15 = int_to_ptr.vmem [resolvable:$true] %s70_s15 }
  0x3b   :  { %s8248_s1 = scalar_lea.vmem %s71_s15, 32768  ;;  %p8253_p12 = scmp.lt.s32.totalorder %s71_s15, %s71_s15 }
  0x3c   :  { %p8249_p11 = scmp.ne.s32.totalorder %s71_s15, %s8248_s1  ;;  %p8254_p13 = scmp.lt.s32.totalorder %s8248_s1, %s8248_s1 }
  0x3e   :  { %p8255_p0 = por %p8254_p13, %p8253_p12 }
  0x40   :  { %p8256_p1 = pnand %p8255_p0, %p8249_p11 }
  0x42   :  { %8259 = shalt.err (!%p8256_p1)
}
  0x43   :  { %s8320_s16 = smov 512   ;;  %s8321_s17 = smov 32  }
  0x44   :  { %76 = dma.hbm_to_vmem [thread:$0]  %s8624_s5, 32768, %s71_s15, [#allocation8], %s8320_s16, %s8320_s16, %s8321_s17  }
  0x45   :  { %s8322_s20 = smov [#allocation12]  }
  0x46   :  { %s92_s21 = sshll.u32 %s8322_s20, 4  ;;  %s93_s21 = int_to_ptr.vmem [resolvable:$true] %s92_s21 }
  0x47   :  { %s8268_s3 = scalar_lea.vmem %s93_s21, 57344  ;;  %p8273_p3 = scmp.lt.s32.totalorder %s93_s21, %s93_s21 }
  0x48   :  { %p8269_p2 = scmp.ne.s32.totalorder %s93_s21, %s8268_s3  ;;  %p8274_p4 = scmp.lt.s32.totalorder %s8268_s3, %s8268_s3 }
  0x4a   :  { %p8275_p5 = por %p8274_p4, %p8273_p3 }
  0x4c   :  { %p8276_p6 = pnand %p8275_p5, %p8269_p2 }
  0x4e   :  { %8279 = shalt.err (!%p8276_p6)
}
  0x4f   :  { %s8323_s22 = smov 448   ;;  %s8324_s23 = smov 28  }
  0x50   :  { %98 = dma.hbm_to_vmem [thread:$0]  %s8626_s7, 57344, %s93_s21, [#allocation11], %s8323_s22, %s8323_s22, %s8324_s23  }
  0x51   :  { %s8325_s25 = smov [#allocation13]  }
  0x52   :  { %s105_s4 = sshll.u32 %s8325_s25, 4  ;;  %s106_s4 = int_to_ptr.vmem [resolvable:$true] %s105_s4 }
  0x53   :  { %s8288_s5 = scalar_lea.vmem %s106_s4, 112  ;;  %s8292_s26 = scalar_lea.vmem %s106_s4, 128 }
  0x54   :  { %p8289_p7 = scmp.ne.s32.totalorder %s106_s4, %s8288_s5  ;;  %p8293_p8 = scmp.lt.s32.totalorder %s106_s4, %s106_s4 }
  0x55   :  { %p8294_p9 = scmp.lt.s32.totalorder %s8292_s26, %s8288_s5 }
  0x57   :  { %p8295_p10 = por %p8294_p9, %p8293_p8 }
  0x59   :  { %p8296_p11 = pnand %p8295_p10, %p8289_p7 }
  0x5b   :  { %8299 = shalt.err (!%p8296_p11)
}
  0x5c   :  { %108 = dma.hbm_to_vmem [thread:$0]  %s8627_s8, 112, %s106_s4, [#allocation14]  }
  0x5d   :  { %8300 = dma.done.wait [#allocation3], 2048  }
  0x5e   :  { %8301 = vsyncadd [#allocation3], 4294965248 }
  0x5f   :  { %8302 = dma.done.wait [#allocation5], 8224  }
  0x60   :  { %8303 = vsyncadd [#allocation5], 4294959072 }
  0x61   :  { %8304 = dma.done.wait [#allocation8], 32832  }
  0x62   :  { %8305 = vsyncadd [#allocation8], 4294934464 }
  0x63   :  { %8306 = dma.done.wait [#allocation11], 57472  }
  0x64   :  { %8307 = vsyncadd [#allocation11], 4294909824 }
  0x65   :  { %8308 = dma.done.wait [#allocation14], 112  }
  0x66   :  { %8309 = vsyncadd [#allocation14], 4294967184  ;;  %v8326_v0 = vmov 0   ;;  %v7350_v1 = vld [vmem:[#allocation2 + $0x74] ss:$8 sps:$4 sm:$0xff]   ;;  %v7374_v29 = vld [vmem:[%s8619_s0] sm:$0xff]  }
  0x67   :  { %271 = vmatprep.mubr.bf16.mxu0 %v8326_v0  ;;  %v7352_v2 = vld [vmem:[#allocation2 + $0x70] ss:$8 sps:$4 sm:$0xff]   ;;  %239 = vmatprep.subr.bf16.mxu0 %v7350_v1  ;;  %v7353_v3 = vld [vmem:[#allocation2 + $0x64] ss:$8 sps:$4 sm:$0xff]   ;;  %v7355_v4 = vld [vmem:[#allocation2 + $0x60] ss:$8 sps:$4 sm:$0xff]  }
  0x68   :  { %240 = vmatpush1.bf16.msra.mxu0 %v7352_v2  ;;  %v7356_v5 = vld [vmem:[#allocation2 + $0x54] ss:$8 sps:$4 sm:$0xff]   ;;  %v7358_v6 = vld [vmem:[#allocation2 + $0x50] ss:$8 sps:$4 sm:$0xff]   ;;  %v7359_v7 = vld [vmem:[#allocation2 + $0x44] ss:$8 sps:$4 sm:$0xff]  }
  0x69   :  { %241 = vmatprep.subr.bf16.mxu0 %v7353_v3  ;;  %v7361_v8 = vld [vmem:[#allocation2 + $0x40] ss:$8 sps:$4 sm:$0xff]   ;;  %v7362_v9 = vld [vmem:[#allocation2 + $0x34] ss:$8 sps:$4 sm:$0xff]   ;;  %v7364_v11 = vld [vmem:[#allocation2 + $0x30] ss:$8 sps:$4 sm:$0xff]  }
  0x6a   :  { %v7375_v10 = vld [vmem:[#allocation6 + $0xe4] ss:$16 sps:$4 sm:$0xff]   ;;  %v7380_v12 = vld [vmem:[#allocation6 + $0xe0] ss:$16 sps:$4 sm:$0xff]   ;;  %v7379_v26 = vld [vmem:[#allocation6 + $0xec] ss:$16 sps:$4 sm:$0xff]  }
  0x6b   :  { %712 = vmatprep.subr.bf16.mxu1 %v7375_v10  ;;  %v7381_v13 = vld [vmem:[#allocation6 + $0xc4] ss:$16 sps:$4 sm:$0xff]   ;;  %v7386_v15 = vld [vmem:[#allocation6 + $0xc0] ss:$16 sps:$4 sm:$0xff]   ;;  %v7377_v30 = vld [vmem:[#allocation6 + $0xe8] ss:$16 sps:$4 sm:$0xff]  }
  0x6c   :  { %242 = vmatpush1.bf16.msra.mxu0 %v7355_v4  ;;  %v7365_v14 = vld [vmem:[#allocation2 + $0x24] ss:$8 sps:$4 sm:$0xff]   ;;  %713 = vmatpush1.bf16.msra.mxu1 %v7380_v12  ;;  %v7367_v17 = vld [vmem:[#allocation2 + $0x20] ss:$8 sps:$4 sm:$0xff]   ;;  %v7368_v18 = vld [vmem:[#allocation2 + $0x14] ss:$8 sps:$4 sm:$0xff]  }
  0x6d   :  { %243 = vmatprep.subr.bf16.mxu0 %v7356_v5  ;;  %714 = vmatprep.subr.bf16.mxu1 %v7381_v13  ;;  %v7387_v16 = vld [vmem:[#allocation6 + $0xa4] ss:$16 sps:$4 sm:$0xff]   ;;  %v7392_v19 = vld [vmem:[#allocation6 + $0xa0] ss:$16 sps:$4 sm:$0xff]   ;;  %v7385_v31 = vld [vmem:[#allocation6 + $0xcc] ss:$16 sps:$4 sm:$0xff]  }
  0x6e   :  { %v7393_v20 = vld [vmem:[#allocation6 + $0x84] ss:$16 sps:$4 sm:$0xff]   ;;  %v7398_v23 = vld [vmem:[#allocation6 + $0x80] ss:$16 sps:$4 sm:$0xff]   ;;  %v7383_v34 = vld [vmem:[#allocation6 + $0xc8] ss:$16 sps:$4 sm:$0xff]  }
  0x6f   :  { %v7370_v21 = vld [vmem:[#allocation2 + $0x10] ss:$8 sps:$4 sm:$0xff]   ;;  %v7371_v22 = vld [vmem:[#allocation2 + $0x4] ss:$8 sps:$4 sm:$0xff]   ;;  %v7373_v25 = vld [vmem:[#allocation2] ss:$8 sps:$4 sm:$0xff]  }
  0x70   :  { %244 = vmatpush1.bf16.msra.mxu0 %v7358_v6  ;;  %715 = vmatpush1.bf16.msra.mxu1 %v7386_v15  ;;  %v7399_v24 = vld [vmem:[#allocation6 + $0x64] ss:$16 sps:$4 sm:$0xff]   ;;  %v7404_v27 = vld [vmem:[#allocation6 + $0x60] ss:$16 sps:$4 sm:$0xff]   ;;  %v7391_v35 = vld [vmem:[#allocation6 + $0xac] ss:$16 sps:$4 sm:$0xff]  }
  0x71   :  { %245 = vmatprep.subr.bf16.mxu0 %v7359_v7  ;;  %716 = vmatprep.subr.bf16.mxu1 %v7387_v16  ;;  %v7405_v28 = vld [vmem:[#allocation6 + $0x44] ss:$16 sps:$4 sm:$0xff]   ;;  %v7410_v32 = vld [vmem:[#allocation6 + $0x40] ss:$16 sps:$4 sm:$0xff]   ;;  %v7389_v38 = vld [vmem:[#allocation6 + $0xa8] ss:$16 sps:$4 sm:$0xff]  }
  0x72   :  { %v7411_v33 = vld [vmem:[#allocation6 + $0x24] ss:$16 sps:$4 sm:$0xff]   ;;  %v7416_v36 = vld [vmem:[#allocation6 + $0x20] ss:$16 sps:$4 sm:$0xff]   ;;  %v7397_v39 = vld [vmem:[#allocation6 + $0x8c] ss:$16 sps:$4 sm:$0xff]  }
  0x73   :  { %v7417_v37 = vld [vmem:[#allocation6 + $0x4] ss:$16 sps:$4 sm:$0xff]   ;;  %v7422_v40 = vld [vmem:[#allocation6] ss:$16 sps:$4 sm:$0xff]   ;;  %v7395_v41 = vld [vmem:[#allocation6 + $0x88] ss:$16 sps:$4 sm:$0xff]  }
  0x74   :  { %246 = vmatpush1.bf16.msra.mxu0 %v7361_v8  ;;  %717 = vmatpush1.bf16.msra.mxu1 %v7392_v19  ;;  %v7423_v42 = vld [vmem:[#allocation6 + $0x1e4] ss:$16 sps:$4 sm:$0xff]   ;;  %v7403_v43 = vld [vmem:[#allocation6 + $0x6c] ss:$16 sps:$4 sm:$0xff]   ;;  %v7428_v44 = vld [vmem:[#allocation6 + $0x1e0] ss:$16 sps:$4 sm:$0xff]  }
  0x75   :  { %247 = vmatprep.subr.bf16.mxu0 %v7362_v9  ;;  %718 = vmatprep.subr.bf16.mxu1 %v7393_v20  ;;  %v7429_v45 = vld [vmem:[#allocation6 + $0x1c4] ss:$16 sps:$4 sm:$0xff]   ;;  %v7401_v46 = vld [vmem:[#allocation6 + $0x68] ss:$16 sps:$4 sm:$0xff]   ;;  %v7409_v47 = vld [vmem:[#allocation6 + $0x4c] ss:$16 sps:$4 sm:$0xff]  }
  0x76   :  { %v7434_v48 = vld [vmem:[#allocation6 + $0x1c0] ss:$16 sps:$4 sm:$0xff]   ;;  %v7435_v49 = vld [vmem:[#allocation6 + $0x1a4] ss:$16 sps:$4 sm:$0xff]   ;;  %v7407_v50 = vld [vmem:[#allocation6 + $0x48] ss:$16 sps:$4 sm:$0xff]  }
  0x77   :  { %v7415_v51 = vld [vmem:[#allocation6 + $0x2c] ss:$16 sps:$4 sm:$0xff]   ;;  %v7440_v52 = vld [vmem:[#allocation6 + $0x1a0] ss:$16 sps:$4 sm:$0xff]   ;;  %v7441_v53 = vld [vmem:[#allocation6 + $0x184] ss:$16 sps:$4 sm:$0xff]  }
  0x78   :  { %248 = vmatpush1.bf16.msra.mxu0 %v7364_v11  ;;  %719 = vmatpush1.bf16.msra.mxu1 %v7398_v23  ;;  %v7413_v54 = vld [vmem:[#allocation6 + $0x28] ss:$16 sps:$4 sm:$0xff]   ;;  %v7421_v55 = vld [vmem:[#allocation6 + $0xc] ss:$16 sps:$4 sm:$0xff]   ;;  %v7446_v56 = vld [vmem:[#allocation6 + $0x180] ss:$16 sps:$4 sm:$0xff]  }
  0x79   :  { %249 = vmatprep.subr.bf16.mxu0 %v7365_v14  ;;  %720 = vmatprep.subr.bf16.mxu1 %v7399_v24  ;;  %v7419_v57 = vld [vmem:[#allocation6 + $0x8] ss:$16 sps:$4 sm:$0xff]   ;;  %v7427_v58 = vld [vmem:[#allocation6 + $0x1ec] ss:$16 sps:$4 sm:$0xff]   ;;  %v7447_v2 = vld [vmem:[#allocation6 + $0x164] ss:$16 sps:$4 sm:$0xff]  }
  0x7a   :  { %v7425_v59 = vld [vmem:[#allocation6 + $0x1e8] ss:$16 sps:$4 sm:$0xff]   ;;  %v7433_v60 = vld [vmem:[#allocation6 + $0x1cc] ss:$16 sps:$4 sm:$0xff]   ;;  %v7452_v5 = vld [vmem:[#allocation6 + $0x160] ss:$16 sps:$4 sm:$0xff]  }
  0x7b   :  { %v7431_v61 = vld [vmem:[#allocation6 + $0x1c8] ss:$16 sps:$4 sm:$0xff]   ;;  %v7439_v62 = vld [vmem:[#allocation6 + $0x1ac] ss:$16 sps:$4 sm:$0xff]   ;;  %v7453_v6 = vld [vmem:[#allocation6 + $0x144] ss:$16 sps:$4 sm:$0xff]  }
  0x7c   :  { %250 = vmatpush1.bf16.msra.mxu0 %v7367_v17  ;;  %721 = vmatpush1.bf16.msra.mxu1 %v7404_v27  ;;  %v7437_v63 = vld [vmem:[#allocation6 + $0x1a8] ss:$16 sps:$4 sm:$0xff]   ;;  %v7445_v0 = vld [vmem:[#allocation6 + $0x18c] ss:$16 sps:$4 sm:$0xff]   ;;  %v7458_v9 = vld [vmem:[#allocation6 + $0x140] ss:$16 sps:$4 sm:$0xff]  }
  0x7d   :  { %251 = vmatprep.subr.bf16.mxu0 %v7368_v18  ;;  %722 = vmatprep.subr.bf16.mxu1 %v7405_v28  ;;  %v7443_v1 = vld [vmem:[#allocation6 + $0x188] ss:$16 sps:$4 sm:$0xff]   ;;  %v7451_v3 = vld [vmem:[#allocation6 + $0x16c] ss:$16 sps:$4 sm:$0xff]   ;;  %v7459_v10 = vld [vmem:[#allocation6 + $0x124] ss:$16 sps:$4 sm:$0xff]   ;;  %v297_v28 = vlaneseq }
  0x7e   :  { %v7449_v4 = vld [vmem:[#allocation6 + $0x168] ss:$16 sps:$4 sm:$0xff]   ;;  %v7457_v7 = vld [vmem:[#allocation6 + $0x14c] ss:$16 sps:$4 sm:$0xff]   ;;  %v7464_v13 = vld [vmem:[#allocation6 + $0x120] ss:$16 sps:$4 sm:$0xff]  }
  0x7f   :  { %v7455_v8 = vld [vmem:[#allocation6 + $0x148] ss:$16 sps:$4 sm:$0xff]   ;;  %v7463_v11 = vld [vmem:[#allocation6 + $0x12c] ss:$16 sps:$4 sm:$0xff]   ;;  %v7465_v14 = vld [vmem:[#allocation6 + $0x104] ss:$16 sps:$4 sm:$0xff]  }
  0x80   :  { %252 = vmatpush1.bf16.msra.mxu0 %v7370_v21  ;;  %723 = vmatpush1.bf16.msra.mxu1 %v7410_v32  ;;  %v7461_v12 = vld [vmem:[#allocation6 + $0x128] ss:$16 sps:$4 sm:$0xff]   ;;  %v7469_v16 = vld [vmem:[#allocation6 + $0x10c] ss:$16 sps:$4 sm:$0xff]   ;;  %v7470_v17 = vld [vmem:[#allocation6 + $0x100] ss:$16 sps:$4 sm:$0xff]  }
  0x81   :  { %253 = vmatprep.subr.bf16.mxu0 %v7371_v22  ;;  %724 = vmatprep.subr.bf16.mxu1 %v7411_v33  ;;  %v7467_v15 = vld [vmem:[#allocation6 + $0x108] ss:$16 sps:$4 sm:$0xff]  }
  0x82   :  { %v924_v18 = vld [vmem:[#allocation9 + $0x1c0] sm:$0xff] }
  0x83   :  { %v928_v19 = vld [vmem:[#allocation9 + $0x1e0] sm:$0xff] }
  0x84   :  { %254 = vmatpush1.bf16.msra.mxu0 %v7373_v25  ;;  %725 = vmatpush1.bf16.msra.mxu1 %v7416_v36  ;;  %v1052_v20 = vld [vmem:[#allocation9 + $0x5c0] sm:$0xff]  ;;  %v6596_v21 = vcombine.low %v924_v18, %v928_v19  ;;  %v6597_v22 = vcombine.high %v924_v18, %v928_v19 }
  0x85   :  { %755 = vmatprep.subr.bf16.mxu0 %v7379_v26  ;;  %726 = vmatprep.subr.bf16.mxu1 %v7417_v37  ;;  %v1056_v23 = vld [vmem:[#allocation9 + $0x5e0] sm:$0xff]  ;;  %v8327_v26 = vmov 1966171168  }
  0x86   :  { %v6724_v24 = vcombine.low %v1052_v20, %v1056_v23  ;;  %v6725_v25 = vcombine.high %v1052_v20, %v1056_v23  ;;  %v295_v27 = vunpack.c.l.s4 %v8327_v26  ;;  %v884_v19 = vld [vmem:[#allocation9 + $0x80] sm:$0xff] }
  0x87   :  { %272 = vmatmul.mubr.bf16.vlgmr.msra.gmra.mxu0 %v7374_v29  ;;  %v888_v20 = vld [vmem:[#allocation9 + $0xa0] sm:$0xff] }
  0x88   :  { %756 = vmatpush1.bf16.msra.mxu0 %v7377_v30  ;;  %727 = vmatpush1.bf16.msra.mxu1 %v7422_v40  ;;  %v296_v29 = vunpack.c.0.s8 %v295_v27  ;;  %v8405_v30 = vshrl.u32 %v297_v28, 7  ;;  %v876_v27 = vld [vmem:[#allocation9 + $0x40] sm:$0xff] }
  0x89   :  { %757 = vmatprep.subr.bf16.mxu0 %v7385_v31  ;;  %728 = vmatprep.subr.bf16.mxu1 %v7423_v42  ;;  %v6474_v31 = vld.sshfl [vmem:[#allocation4] sm:$0x11 pattern:$0x75316420]  ;;  %v880_v28 = vld [vmem:[#allocation9 + $0x60] sm:$0xff] }
  0x8a   :  { %v8408_v32 = vsub.s32 %v296_v29, %v8405_v30  ;;  %v8411_v33 = vsub.s32 0, %v8405_v30  ;;  %v1004_v29 = vld [vmem:[#allocation9 + $0x440] sm:$0xff] }
  0x8c   :  { %758 = vmatpush1.bf16.msra.mxu0 %v7383_v34  ;;  %729 = vmatpush2.bf16.msra.mxu1 %v7428_v44  ;;  %v293_v34 = vcombine.high %v6474_v31, %v6474_v31 }
  0x8d   :  { %759 = vmatprep.subr.bf16.mxu0 %v7391_v35  ;;  %730 = vmatprep.subr.bf16.mxu1 %v7429_v45  ;;  %v300_v35 = vrot.slane %v6474_v31, %v8408_v32  ;;  %v1008_v31 = vld [vmem:[#allocation9 + $0x460] sm:$0xff] }
  0x8e   :  { %v307_v36 = vrot.slane %v293_v34, %v8408_v32  ;;  %v6556_v34 = vcombine.low %v884_v19, %v888_v20 }
  0x8f   :  { %v309_v37 = vpack.i.b16 %v300_v35, %v300_v35 }
  0x90   :  { %760 = vmatpush1.bf16.msra.mxu0 %v7389_v38  ;;  %731 = vmatpush2.bf16.msra.mxu1 %v7434_v48 }
  0x91   :  { %761 = vmatprep.subr.bf16.mxu0 %v7397_v39  ;;  %732 = vmatprep.subr.bf16.mxu1 %v7435_v49  ;;  %v316_v39 = vpack.i.b16 %v307_v36, %v307_v36  ;;  %v6549_v36 = vcombine.high %v876_v27, %v880_v28 }
  0x93   :  { %v321_v44 = vrot.slane %v316_v39, %v8411_v33  ;;  %v872_v39 = vld [vmem:[#allocation9 + $0x20] sm:$0xff] }
  0x94   :  { %762 = vmatpush1.bf16.msra.mxu0 %v7395_v41  ;;  %733 = vmatpush2.bf16.msra.mxu1 %v7440_v52  ;;  %v314_v41 = vrot.slane %v309_v37, %v8411_v33  ;;  %v1044_v52 = vld [vmem:[#allocation9 + $0x580] sm:$0xff]  ;;  %v6677_v37 = vcombine.high %v1004_v29, %v1008_v31 }
  0x95   :  { %763 = vmatprep.subr.bf16.mxu0 %v7403_v43  ;;  %734 = vmatprep.subr.bf16.mxu1 %v7441_v53  ;;  %v1048_v53 = vld [vmem:[#allocation9 + $0x5a0] sm:$0xff] }
  0x98   :  { %764 = vmatpush1.bf16.msra.mxu0 %v7401_v46  ;;  %735 = vmatpush2.bf16.msra.mxu1 %v7446_v56  ;;  %v908_v56 = vld [vmem:[#allocation9 + $0x140] sm:$0xff] }
  0x99   :  { %765 = vmatprep.subr.bf16.mxu0 %v7409_v47  ;;  %736 = vmatprep.subr.bf16.mxu1 %v7447_v2 }
  0x9c   :  { %766 = vmatpush1.bf16.msra.mxu0 %v7407_v50  ;;  %737 = vmatpush2.bf16.msra.mxu1 %v7452_v5  ;;  %v916_v50 = vld [vmem:[#allocation9 + $0x180] sm:$0xff] }
  0x9d   :  { %767 = vmatprep.subr.bf16.mxu0 %v7415_v51  ;;  %738 = vmatprep.subr.bf16.mxu1 %v7453_v6  ;;  %v920_v51 = vld [vmem:[#allocation9 + $0x1a0] sm:$0xff] }
  0x9e   :  { %v1028_v5 = vld [vmem:[#allocation9 + $0x500] sm:$0xff] }
  0x9f   :  { %v1032_v6 = vld [vmem:[#allocation9 + $0x520] sm:$0xff] }
  0xa0   :  { %768 = vmatpush1.bf16.msra.mxu0 %v7413_v54  ;;  %739 = vmatpush2.bf16.msra.mxu1 %v7458_v9 }
  0xa1   :  { %769 = vmatprep.subr.bf16.mxu0 %v7421_v55  ;;  %740 = vmatprep.subr.bf16.mxu1 %v7459_v10  ;;  %v6701_v10 = vcombine.high %v1028_v5, %v1032_v6 }
  0xa4   :  { %770 = vmatpush1.bf16.msra.mxu0 %v7419_v57  ;;  %741 = vmatpush2.bf16.msra.mxu1 %v7464_v13  ;;  %v912_v57 = vld [vmem:[#allocation9 + $0x160] sm:$0xff] }
  0xa5   :  { %771 = vmatprep.subr.bf16.mxu0 %v7427_v58  ;;  %742 = vmatprep.subr.bf16.mxu1 %v7465_v14  ;;  %v1036_v58 = vld [vmem:[#allocation9 + $0x540] sm:$0xff] }
  0xa6   :  { %v1020_v13 = vld [vmem:[#allocation9 + $0x4c0] sm:$0xff] }
  0xa7   :  { %v1024_v14 = vld [vmem:[#allocation9 + $0x4e0] sm:$0xff] }
  0xa8   :  { %772 = vmatpush2.bf16.msra.mxu0 %v7425_v59  ;;  %743 = vmatpush2.bf16.msra.mxu1 %v7470_v17  ;;  %v1040_v59 = vld [vmem:[#allocation9 + $0x560] sm:$0xff]  ;;  %v6693_v18 = vcombine.high %v1020_v13, %v1024_v14 }
  0xa9   :  { %773 = vmatprep.subr.bf16.mxu0 %v7433_v60  ;;  %2404 = vmatprep.subr.bf16.mxu1 %v6597_v22  ;;  %v6709_v2 = vcombine.high %v1036_v58, %v1040_v59  ;;  %v1016_v22 = vld [vmem:[#allocation9 + $0x4a0] sm:$0xff] }
  0xac   :  { %774 = vmatpush2.bf16.msra.mxu0 %v7431_v61  ;;  %v6589_v61 = vcombine.high %v916_v50, %v920_v51 }
  0xad   :  { %775 = vmatprep.subr.bf16.mxu0 %v7439_v62  ;;  %v6717_v62 = vcombine.high %v1044_v52, %v1048_v53 }
  0xb0   :  { %776 = vmatpush2.bf16.msra.mxu0 %v7437_v63  ;;  %v6588_v63 = vcombine.low %v916_v50, %v920_v51 }
  0xb1   :  { %777 = vmatprep.subr.bf16.mxu0 %v7445_v0  ;;  %v6716_v0 = vcombine.low %v1044_v52, %v1048_v53 }
  0xb4   :  { %778 = vmatpush2.bf16.msra.mxu0 %v7443_v1  ;;  %v6581_v1 = vcombine.high %v908_v56, %v912_v57 }
  0xb5   :  { %779 = vmatprep.subr.bf16.mxu0 %v7451_v3  ;;  %v900_v3 = vld [vmem:[#allocation9 + $0x100] sm:$0xff] }
  0xb8   :  { %780 = vmatpush2.bf16.msra.mxu0 %v7449_v4  ;;  %v904_v4 = vld [vmem:[#allocation9 + $0x120] sm:$0xff] }
  0xb9   :  { %781 = vmatprep.subr.bf16.mxu0 %v7457_v7  ;;  %v6580_v7 = vcombine.low %v908_v56, %v912_v57  ;;  %v6573_v9 = vcombine.high %v900_v3, %v904_v4  ;;  %v1108_v56 = vld [vmem:[#allocation9 + $0x780] sm:$0xff] }
  0xba   :  { %v1112_v57 = vld [vmem:[#allocation9 + $0x7a0] sm:$0xff] }
  0xbc   :  { %782 = vmatpush2.bf16.msra.mxu0 %v7455_v8  ;;  %v6708_v8 = vcombine.low %v1036_v58, %v1040_v59 }
  0xbd   :  { %783 = vmatprep.subr.bf16.mxu0 %v7463_v11  ;;  %v892_v11 = vld [vmem:[#allocation9 + $0xc0] sm:$0xff] }
  0xc0   :  { %784 = vmatpush2.bf16.msra.mxu0 %v7461_v12  ;;  %v896_v12 = vld [vmem:[#allocation9 + $0xe0] sm:$0xff] }
  0xc1   :  { %785 = vmatprep.subr.bf16.mxu0 %v7469_v16  ;;  %v6700_v16 = vcombine.low %v1028_v5, %v1032_v6  ;;  %v6565_v17 = vcombine.high %v892_v11, %v896_v12  ;;  %v6564_v23 = vcombine.low %v892_v11, %v896_v12  ;;  %v964_v6 = vld [vmem:[#allocation9 + $0x300] sm:$0xff] }
  0xc4   :  { %786 = vmatpush2.bf16.msra.mxu0 %v7467_v15  ;;  %v6572_v15 = vcombine.low %v900_v3, %v904_v4  ;;  %v6780_v3 = vcombine.low %v1108_v56, %v1112_v57 }
  0xc5   :  { %2447 = vmatprep.subr.bf16.mxu0 %v6725_v25  ;;  %v6557_v25 = vcombine.high %v884_v19, %v888_v20 }
 0x147   :  { %v273_v38 = vpop.f32.mrf.mxu0 }
 0x149   :  { %v275_v40 = vpop.f32.mrf.mxu0 }
 0x14b   :  { %v277_v42 = vpop.f32.mrf.mxu0 }
 0x14c   :  { %v282_v43 = vpack.c.bf16 %v277_v42, %v273_v38  ;;  %v868_v38 = vld [vmem:[#allocation9] sm:$0xff]  ;;  %v6548_v42 = vcombine.low %v876_v27, %v880_v28 }
 0x14d   :  { %v279_v45 = vpop.f32.mrf.mxu0  ;;  %v6540_v50 = vcombine.low %v868_v38, %v872_v39  ;;  %v1080_v28 = vld [vmem:[#allocation9 + $0x6a0] sm:$0xff] }
 0x14e   :  { %v322_v46 = vadd.bf16 %v314_v41, %v282_v43  ;;  %v283_v47 = vpack.c.bf16 %v279_v45, %v275_v40  ;;  %v996_v40 = vld [vmem:[#allocation9 + $0x400] sm:$0xff]  ;;  %v6676_v43 = vcombine.low %v1004_v29, %v1008_v31 }
 0x14f   :  { %v1000_v41 = vld [vmem:[#allocation9 + $0x420] sm:$0xff] }
 0x150   :  { %v324_v48 = vmul.bf16 1045249613, %v322_v46  ;;  %v323_v49 = vadd.bf16 %v321_v44, %v283_v47  ;;  %v6541_v44 = vcombine.high %v868_v38, %v872_v39  ;;  %v6669_v45 = vcombine.high %v996_v40, %v1000_v41  ;;  %v992_v47 = vld [vmem:[#allocation9 + $0x3e0] sm:$0xff] }
 0x151   :  { %v6668_v51 = vcombine.low %v996_v40, %v1000_v41  ;;  %v1072_v38 = vld [vmem:[#allocation9 + $0x660] sm:$0xff] }
 0x152   :  { %v325_v54 = vmul.bf16 1045249613, %v323_v49  ;;  %v326_v60 = vmax.bf16 %v324_v48, %v322_v46  ;;  %v988_v46 = vld [vmem:[#allocation9 + $0x3c0] sm:$0xff] }
 0x153   :  { %v1116_v48 = vld [vmem:[#allocation9 + $0x7c0] sm:$0xff]  ;;  %v6661_v52 = vcombine.high %v988_v46, %v992_v47  ;;  %v6660_v58 = vcombine.low %v988_v46, %v992_v47 }
 0x154   :  { %v327_v55 = vmax.bf16 %v325_v54, %v323_v49  ;;  %v1120_v49 = vld [vmem:[#allocation9 + $0x7e0] sm:$0xff] }
 0x155   :  { %v6789_v53 = vcombine.high %v1116_v48, %v1120_v49  ;;  %v980_v54 = vld [vmem:[#allocation9 + $0x380] sm:$0xff]  ;;  %v6788_v59 = vcombine.low %v1116_v48, %v1120_v49 }
 0x156   :  { %744 = vmatprep.mubr.bf16.mxu1 %v327_v55  ;;  %787 = vmatprep.mubr.bf16.mxu0 %v327_v55  ;;  %v984_v55 = vld [vmem:[#allocation9 + $0x3a0] sm:$0xff] }
 0x157   :  { %745 = vmatmul.mubr.bf16.vlgmr.msra.gmra.mxu1 %v326_v60  ;;  %788 = vmatmul.mubr.bf16.vlgmr.msra.gmra.mxu0 %v326_v60  ;;  %v6653_v60 = vcombine.high %v980_v54, %v984_v55  ;;  %v1064_v47 = vld [vmem:[#allocation9 + $0x620] sm:$0xff] }
 0x158   :  { %2405 = vmatpush1.bf16.msra.mxu1 %v6596_v21  ;;  %2448 = vmatpush1.bf16.msra.mxu0 %v6724_v24  ;;  %v1012_v21 = vld [vmem:[#allocation9 + $0x480] sm:$0xff]  ;;  %v6692_v24 = vcombine.low %v1020_v13, %v1024_v14 }
 0x159   :  { %2406 = vmatprep.subr.bf16.mxu1 %v6589_v61  ;;  %2449 = vmatprep.subr.bf16.mxu0 %v6717_v62  ;;  %v6685_v26 = vcombine.high %v1012_v21, %v1016_v22  ;;  %v6684_v35 = vcombine.low %v1012_v21, %v1016_v22  ;;  %v6781_v61 = vcombine.high %v1108_v56, %v1112_v57  ;;  %v972_v62 = vld [vmem:[#allocation9 + $0x340] sm:$0xff] }
 0x15a   :  { %v956_v14 = vld [vmem:[#allocation9 + $0x2c0] sm:$0xff] }
 0x15c   :  { %2407 = vmatpush1.bf16.msra.mxu1 %v6588_v63  ;;  %2450 = vmatpush1.bf16.msra.mxu0 %v6716_v0  ;;  %v976_v63 = vld [vmem:[#allocation9 + $0x360] sm:$0xff] }
 0x15d   :  { %2408 = vmatprep.subr.bf16.mxu1 %v6581_v1  ;;  %2451 = vmatprep.subr.bf16.mxu0 %v6709_v2  ;;  %v1100_v0 = vld [vmem:[#allocation9 + $0x740] sm:$0xff]  ;;  %v6652_v2 = vcombine.low %v980_v54, %v984_v55  ;;  %v6645_v4 = vcombine.high %v972_v62, %v976_v63  ;;  %v1057_v55 = vld [vmem:[#allocation9 + $0x5e8] sm:$0xff] }
 0x15e   :  { %v1104_v1 = vld [vmem:[#allocation9 + $0x760] sm:$0xff] }
 0x15f   :  { %v6773_v5 = vcombine.high %v1100_v0, %v1104_v1  ;;  %v6772_v11 = vcombine.low %v1100_v0, %v1104_v1 }
 0x160   :  { %2409 = vmatpush1.bf16.msra.mxu1 %v6580_v7  ;;  %2452 = vmatpush1.bf16.msra.mxu0 %v6708_v8  ;;  %v968_v7 = vld [vmem:[#allocation9 + $0x320] sm:$0xff] }
 0x161   :  { %2410 = vmatprep.subr.bf16.mxu1 %v6573_v9  ;;  %2453 = vmatprep.subr.bf16.mxu0 %v6701_v10  ;;  %v1092_v8 = vld [vmem:[#allocation9 + $0x700] sm:$0xff]  ;;  %v6644_v10 = vcombine.low %v972_v62, %v976_v63  ;;  %v6637_v12 = vcombine.high %v964_v6, %v968_v7 }
 0x162   :  { %v1096_v9 = vld [vmem:[#allocation9 + $0x720] sm:$0xff] }
 0x163   :  { %v6765_v13 = vcombine.high %v1092_v8, %v1096_v9  ;;  %v6764_v19 = vcombine.low %v1092_v8, %v1096_v9 }
 0x164   :  { %2411 = vmatpush1.bf16.msra.mxu1 %v6572_v15  ;;  %2454 = vmatpush1.bf16.msra.mxu0 %v6700_v16  ;;  %v960_v15 = vld [vmem:[#allocation9 + $0x2e0] sm:$0xff] }
 0x165   :  { %2412 = vmatprep.subr.bf16.mxu1 %v6565_v17  ;;  %2455 = vmatprep.subr.bf16.mxu0 %v6693_v18  ;;  %v1084_v16 = vld [vmem:[#allocation9 + $0x6c0] sm:$0xff]  ;;  %v6636_v18 = vcombine.low %v964_v6, %v968_v7  ;;  %v6629_v20 = vcombine.high %v956_v14, %v960_v15  ;;  %v6628_v22 = vcombine.low %v956_v14, %v960_v15 }
 0x166   :  { %v1088_v17 = vld [vmem:[#allocation9 + $0x6e0] sm:$0xff] }
 0x167   :  { %v6757_v21 = vcombine.high %v1084_v16, %v1088_v17 }
 0x168   :  { %2413 = vmatpush1.bf16.msra.mxu1 %v6564_v23  ;;  %2456 = vmatpush1.bf16.msra.mxu0 %v6692_v24  ;;  %v6756_v23 = vcombine.low %v1084_v16, %v1088_v17  ;;  %v948_v24 = vld [vmem:[#allocation9 + $0x280] sm:$0xff] }
 0x169   :  { %2414 = vmatprep.subr.bf16.mxu1 %v6557_v25  ;;  %2457 = vmatprep.subr.bf16.mxu0 %v6685_v26  ;;  %v952_v25 = vld [vmem:[#allocation9 + $0x2a0] sm:$0xff] }
 0x16a   :  { %v1076_v26 = vld [vmem:[#allocation9 + $0x680] sm:$0xff]  ;;  %v6621_v27 = vcombine.high %v948_v24, %v952_v25  ;;  %v6620_v29 = vcombine.low %v948_v24, %v952_v25 }
 0x16b   :  { %v6748_v31 = vcombine.low %v1076_v26, %v1080_v28 }
 0x16c   :  { %2415 = vmatpush1.bf16.msra.mxu1 %v6556_v34  ;;  %2458 = vmatpush1.bf16.msra.mxu0 %v6684_v35  ;;  %v6749_v34 = vcombine.high %v1076_v26, %v1080_v28  ;;  %v940_v35 = vld [vmem:[#allocation9 + $0x240] sm:$0xff] }
 0x16d   :  { %2416 = vmatprep.subr.bf16.mxu1 %v6549_v36  ;;  %2459 = vmatprep.subr.bf16.mxu0 %v6677_v37  ;;  %v944_v36 = vld [vmem:[#allocation9 + $0x260] sm:$0xff] }
 0x16e   :  { %v1068_v37 = vld [vmem:[#allocation9 + $0x640] sm:$0xff]  ;;  %v6612_v39 = vcombine.low %v940_v35, %v944_v36  ;;  %v6613_v40 = vcombine.high %v940_v35, %v944_v36  ;;  %v1049_v35 = vld [vmem:[#allocation9 + $0x5a8] sm:$0xff] }
 0x16f   :  { %v6740_v41 = vcombine.low %v1068_v37, %v1072_v38 }
 0x170   :  { %2417 = vmatpush1.bf16.msra.mxu1 %v6548_v42  ;;  %2460 = vmatpush1.bf16.msra.mxu0 %v6676_v43  ;;  %v6741_v42 = vcombine.high %v1068_v37, %v1072_v38  ;;  %v932_v43 = vld [vmem:[#allocation9 + $0x200] sm:$0xff] }
 0x171   :  { %2418 = vmatprep.subr.bf16.mxu1 %v6541_v44  ;;  %2461 = vmatprep.subr.bf16.mxu0 %v6669_v45  ;;  %v936_v44 = vld [vmem:[#allocation9 + $0x220] sm:$0xff] }
 0x172   :  { %v1060_v45 = vld [vmem:[#allocation9 + $0x600] sm:$0xff]  ;;  %v6605_v46 = vcombine.high %v932_v43, %v936_v44  ;;  %v6604_v48 = vcombine.low %v932_v43, %v936_v44  ;;  %v913_v43 = vld [vmem:[#allocation9 + $0x168] sm:$0xff] }
 0x173   :  { %v6732_v49 = vcombine.low %v1060_v45, %v1064_v47  ;;  %v1037_v44 = vld [vmem:[#allocation9 + $0x548] sm:$0xff] }
 0x174   :  { %2419 = vmatpush1.bf16.msra.mxu1 %v6540_v50  ;;  %2462 = vmatpush1.bf16.msra.mxu0 %v6668_v51  ;;  %v6733_v50 = vcombine.high %v1060_v45, %v1064_v47  ;;  %v8417_v51 = vld [vmem:[#allocation9 + $0x1c8] sm:$0xff] }
 0x175   :  { %2420 = vmatprep.subr.bf16.mxu1 %v6661_v52  ;;  %2463 = vmatprep.subr.bf16.mxu0 %v6789_v53  ;;  %v8419_v52 = vld [vmem:[#allocation9 + $0x1e8] sm:$0xff] }
 0x176   :  { %v8421_v53 = vld [vmem:[#allocation9 + $0x5c8] sm:$0xff]  ;;  %v6599_v54 = vcombine.high %v8417_v51, %v8419_v52  ;;  %v6598_v56 = vcombine.low %v8417_v51, %v8419_v52 }
 0x177   :  { %v6726_v57 = vcombine.low %v8421_v53, %v1057_v55  ;;  %v1041_v45 = vld [vmem:[#allocation9 + $0x568] sm:$0xff] }
 0x178   :  { %2421 = vmatpush2.bf16.msra.mxu1 %v6660_v58  ;;  %2464 = vmatpush2.bf16.msra.mxu0 %v6788_v59  ;;  %v6727_v58 = vcombine.high %v8421_v53, %v1057_v55  ;;  %v6539_v59 = vld.sshfl [vmem:[#allocation7] sm:$0x33 pattern:$0x75316420]  ;;  %v905_v51 = vld [vmem:[#allocation9 + $0x128] sm:$0xff]  ;;  %v6710_v55 = vcombine.low %v1037_v44, %v1041_v45 }
 0x179   :  { %2422 = vmatprep.subr.bf16.mxu1 %v6653_v60  ;;  %2465 = vmatprep.subr.bf16.mxu0 %v6781_v61  ;;  %v811_v60 = vcombine.high %v6539_v59, %v6539_v59  ;;  %v818_v61 = vrot.slane %v6539_v59, %v8408_v32  ;;  %v1029_v52 = vld [vmem:[#allocation9 + $0x508] sm:$0xff] }
 0x17a   :  { %v1033_v53 = vld [vmem:[#allocation9 + $0x528] sm:$0xff] }
 0x17b   :  { %v825_v62 = vrot.slane %v811_v60, %v8408_v32  ;;  %v826_v63 = vcombine.high %v818_v61, %v818_v61  ;;  %v829_v1 = vpack.i.b16 %v818_v61, %v818_v61  ;;  %v897_v59 = vld [vmem:[#allocation9 + $0xe8] sm:$0xff] }
 0x17c   :  { %2423 = vmatpush2.bf16.msra.mxu1 %v6652_v2  ;;  %2466 = vmatpush2.bf16.msra.mxu0 %v6780_v3  ;;  %v1021_v60 = vld [vmem:[#allocation9 + $0x4c8] sm:$0xff] }
 0x17d   :  { %2424 = vmatprep.subr.bf16.mxu1 %v6645_v4  ;;  %2467 = vmatprep.subr.bf16.mxu0 %v6773_v5  ;;  %v827_v0 = vcombine.high %v825_v62, %v825_v62  ;;  %v843_v2 = vpack.i.b16 %v826_v63, %v826_v63  ;;  %v836_v5 = vpack.i.b16 %v825_v62, %v825_v62  ;;  %v1025_v61 = vld [vmem:[#allocation9 + $0x4e8] sm:$0xff] }
 0x17e   :  { %v834_v9 = vrot.slane %v829_v1, %v8411_v33  ;;  %v6702_v63 = vcombine.low %v1029_v52, %v1033_v53  ;;  %v6695_v1 = vcombine.high %v1021_v60, %v1025_v61 }
 0x17f   :  { %v850_v6 = vpack.i.b16 %v827_v0, %v827_v0  ;;  %v841_v15 = vrot.slane %v836_v5, %v8411_v33  ;;  %v1017_v5 = vld [vmem:[#allocation9 + $0x4a8] sm:$0xff] }
 0x180   :  { %2425 = vmatpush2.bf16.msra.mxu1 %v6644_v10  ;;  %2468 = vmatpush2.bf16.msra.mxu0 %v6772_v11  ;;  %v848_v10 = vrot.slane %v843_v2, %v8411_v33  ;;  %v885_v2 = vld [vmem:[#allocation9 + $0x88] sm:$0xff] }
 0x181   :  { %2426 = vmatprep.subr.bf16.mxu1 %v6637_v12  ;;  %2469 = vmatprep.subr.bf16.mxu0 %v6765_v13  ;;  %v855_v16 = vrot.slane %v850_v6, %v8411_v33 }
 0x184   :  { %2427 = vmatpush2.bf16.msra.mxu1 %v6636_v18  ;;  %2470 = vmatpush2.bf16.msra.mxu0 %v6764_v19 }
 0x185   :  { %2428 = vmatprep.subr.bf16.mxu1 %v6629_v20  ;;  %2471 = vmatprep.subr.bf16.mxu0 %v6757_v21 }
 0x188   :  { %2429 = vmatpush2.bf16.msra.mxu1 %v6628_v22  ;;  %2472 = vmatpush2.bf16.msra.mxu0 %v6756_v23 }
 0x189   :  { %2430 = vmatprep.subr.bf16.mxu1 %v6621_v27  ;;  %2473 = vmatprep.subr.bf16.mxu0 %v6749_v34  ;;  %v1045_v34 = vld [vmem:[#allocation9 + $0x588] sm:$0xff] }
 0x18a   :  { %v6718_v47 = vcombine.low %v1045_v34, %v1049_v35 }
 0x18c   :  { %2431 = vmatpush2.bf16.msra.mxu1 %v6620_v29  ;;  %2474 = vmatpush2.bf16.msra.mxu0 %v6748_v31  ;;  %v917_v29 = vld [vmem:[#allocation9 + $0x188] sm:$0xff] }
 0x18d   :  { %2432 = vmatprep.subr.bf16.mxu1 %v6613_v40  ;;  %2475 = vmatprep.subr.bf16.mxu0 %v6741_v42  ;;  %v921_v31 = vld [vmem:[#allocation9 + $0x1a8] sm:$0xff]  ;;  %v6719_v42 = vcombine.high %v1045_v34, %v1049_v35 }
 0x18e   :  { %v909_v40 = vld [vmem:[#allocation9 + $0x148] sm:$0xff] }
 0x190   :  { %2433 = vmatpush2.bf16.msra.mxu1 %v6612_v39  ;;  %2476 = vmatpush2.bf16.msra.mxu0 %v6740_v41  ;;  %v6591_v41 = vcombine.high %v917_v29, %v921_v31 }
 0x191   :  { %2434 = vmatprep.subr.bf16.mxu1 %v6605_v46  ;;  %2477 = vmatprep.subr.bf16.mxu0 %v6733_v50  ;;  %v6590_v46 = vcombine.low %v917_v29, %v921_v31  ;;  %v901_v50 = vld [vmem:[#allocation9 + $0x108] sm:$0xff] }
 0x192   :  { %v6574_v62 = vcombine.low %v901_v50, %v905_v51  ;;  %v1121_v29 = vld [vmem:[#allocation9 + $0x7e8] sm:$0xff] }
 0x194   :  { %2435 = vmatpush2.bf16.msra.mxu1 %v6604_v48  ;;  %2478 = vmatpush2.bf16.msra.mxu0 %v6732_v49  ;;  %v6583_v48 = vcombine.high %v909_v40, %v913_v43  ;;  %v6711_v49 = vcombine.high %v1037_v44, %v1041_v45  ;;  %v1113_v44 = vld [vmem:[#allocation9 + $0x7a8] sm:$0xff] }
 0x195   :  { %2490 = vmatprep.subr.bf16.mxu1 %v6599_v54  ;;  %2533 = vmatprep.subr.bf16.mxu0 %v6727_v58  ;;  %v6582_v54 = vcombine.low %v909_v40, %v913_v43  ;;  %v893_v58 = vld [vmem:[#allocation9 + $0xc8] sm:$0xff] }
 0x196   :  { %v6567_v0 = vcombine.high %v893_v58, %v897_v59  ;;  %v6566_v6 = vcombine.low %v893_v58, %v897_v59  ;;  %v1109_v43 = vld [vmem:[#allocation9 + $0x788] sm:$0xff] }
 0x197   :  { %v969_v58 = vld [vmem:[#allocation9 + $0x328] sm:$0xff] }
 0x198   :  { %v1093_v59 = vld [vmem:[#allocation9 + $0x708] sm:$0xff] }
 0x217   :  { %v746_v3 = vpop.f32.mrf.mxu1  ;;  %v789_v4 = vpop.f32.mrf.mxu0 }
 0x219   :  { %v748_v7 = vpop.f32.mrf.mxu1  ;;  %v791_v8 = vpop.f32.mrf.mxu0 }
 0x21b   :  { %v750_v11 = vpop.f32.mrf.mxu1  ;;  %v793_v12 = vpop.f32.mrf.mxu0 }
 0x21c   :  { %v798_v13 = vpack.c.bf16 %v750_v11, %v746_v3  ;;  %v800_v14 = vpack.c.bf16 %v793_v12, %v789_v4  ;;  %v889_v3 = vld [vmem:[#allocation9 + $0xa8] sm:$0xff] }
 0x21d   :  { %v752_v17 = vpop.f32.mrf.mxu1  ;;  %v795_v18 = vpop.f32.mrf.mxu0  ;;  %v1013_v4 = vld [vmem:[#allocation9 + $0x488] sm:$0xff] }
 0x21e   :  { %v856_v19 = vadd.bf16 %v834_v9, %v798_v13  ;;  %v858_v20 = vadd.bf16 %v848_v10, %v800_v14  ;;  %v799_v21 = vpack.c.bf16 %v752_v17, %v748_v7  ;;  %v801_v22 = vpack.c.bf16 %v795_v18, %v791_v8  ;;  %v877_v10 = vld [vmem:[#allocation9 + $0x48] sm:$0xff] }
 0x21f   :  { %v6694_v7 = vcombine.low %v1021_v60, %v1025_v61  ;;  %v6559_v8 = vcombine.high %v885_v2, %v889_v3  ;;  %v6687_v9 = vcombine.high %v1013_v4, %v1017_v5  ;;  %v881_v11 = vld [vmem:[#allocation9 + $0x68] sm:$0xff]  ;;  %v6558_v14 = vcombine.low %v885_v2, %v889_v3 }
 0x220   :  { %v857_v23 = vadd.bf16 %v841_v15, %v799_v21  ;;  %v859_v24 = vadd.bf16 %v855_v16, %v801_v22  ;;  %v860_v25 = vmul.bf16 1045249613, %v856_v19  ;;  %v862_v26 = vmul.bf16 1045249613, %v858_v20  ;;  %v1005_v12 = vld [vmem:[#allocation9 + $0x448] sm:$0xff] }
 0x221   :  { %v1009_v13 = vld [vmem:[#allocation9 + $0x468] sm:$0xff]  ;;  %v6686_v15 = vcombine.low %v1013_v4, %v1017_v5  ;;  %v6551_v16 = vcombine.high %v877_v10, %v881_v11  ;;  %v6550_v22 = vcombine.low %v877_v10, %v881_v11 }
 0x222   :  { %v861_v27 = vmul.bf16 1045249613, %v857_v23  ;;  %v863_v28 = vmul.bf16 1045249613, %v859_v24  ;;  %v8439_v38 = vmax.bf16 %v860_v25, %v856_v19  ;;  %v8441_v39 = vmax.bf16 %v862_v26, %v858_v20  ;;  %v869_v18 = vld [vmem:[#allocation9 + $0x8] sm:$0xff] }
 0x223   :  { %v6679_v17 = vcombine.high %v1005_v12, %v1009_v13  ;;  %v873_v19 = vld [vmem:[#allocation9 + $0x28] sm:$0xff] }
 0x224   :  { %v8435_v36 = vmax.bf16 %v861_v27, %v857_v23  ;;  %v8437_v37 = vmax.bf16 %v863_v28, %v859_v24  ;;  %v997_v20 = vld [vmem:[#allocation9 + $0x408] sm:$0xff]  ;;  %v6678_v23 = vcombine.low %v1005_v12, %v1009_v13  ;;  %v6543_v24 = vcombine.high %v869_v18, %v873_v19 }
 0x225   :  { %v1001_v21 = vld [vmem:[#allocation9 + $0x428] sm:$0xff]  ;;  %v6542_v31 = vcombine.low %v869_v18, %v873_v19 }
 0x226   :  { %2436 = vmatprep.mubr.bf16.mxu1 %v8435_v36  ;;  %2479 = vmatprep.mubr.bf16.mxu0 %v8437_v37  ;;  %v6671_v25 = vcombine.high %v997_v20, %v1001_v21  ;;  %v989_v26 = vld [vmem:[#allocation9 + $0x3c8] sm:$0xff]  ;;  %v6670_v34 = vcombine.low %v997_v20, %v1001_v21 }
 0x227   :  { %2437 = vmatmul.mubr.bf16.vlgmr.msra.gmra.mxu1 %v8439_v38  ;;  %2480 = vmatmul.mubr.bf16.vlgmr.msra.gmra.mxu0 %v8441_v39  ;;  %v993_v27 = vld [vmem:[#allocation9 + $0x3e8] sm:$0xff] }
 0x228   :  { %2491 = vmatpush1.bf16.msra.mxu1 %v6598_v56  ;;  %2534 = vmatpush1.bf16.msra.mxu0 %v6726_v57  ;;  %v6575_v56 = vcombine.high %v901_v50, %v905_v51  ;;  %v6703_v57 = vcombine.high %v1029_v52, %v1033_v53  ;;  %v1117_v28 = vld [vmem:[#allocation9 + $0x7c8] sm:$0xff]  ;;  %v6663_v35 = vcombine.high %v989_v26, %v993_v27 }
 0x229   :  { %2522 = vmatprep.mubr.bf16.mxu1 %v8435_v36  ;;  %2565 = vmatprep.mubr.bf16.mxu0 %v8437_v37  ;;  %v6791_v40 = vcombine.high %v1117_v28, %v1121_v29  ;;  %v6662_v45 = vcombine.low %v989_v26, %v993_v27  ;;  %v977_v50 = vld [vmem:[#allocation9 + $0x368] sm:$0xff] }
 0x22a   :  { %2492 = vmatprep.subr.bf16.mxu1 %v6591_v41  ;;  %2535 = vmatprep.subr.bf16.mxu0 %v6719_v42  ;;  %v981_v41 = vld [vmem:[#allocation9 + $0x388] sm:$0xff] }
 0x22b   :  { %v985_v42 = vld [vmem:[#allocation9 + $0x3a8] sm:$0xff] }
 0x22c   :  { %2493 = vmatpush1.bf16.msra.mxu1 %v6590_v46  ;;  %2536 = vmatpush1.bf16.msra.mxu0 %v6718_v47  ;;  %v6790_v46 = vcombine.low %v1117_v28, %v1121_v29  ;;  %v6655_v47 = vcombine.high %v981_v41, %v985_v42  ;;  %v1101_v51 = vld [vmem:[#allocation9 + $0x748] sm:$0xff]  ;;  %v6654_v53 = vcombine.low %v981_v41, %v985_v42  ;;  %v930_v41 = vld [vmem:[#allocation9 + $0x1f0] sm:$0xff] }
 0x22d   :  { %2494 = vmatprep.subr.bf16.mxu1 %v6583_v48  ;;  %2537 = vmatprep.subr.bf16.mxu0 %v6711_v49  ;;  %v6783_v48 = vcombine.high %v1109_v43, %v1113_v44  ;;  %v973_v49 = vld [vmem:[#allocation9 + $0x348] sm:$0xff]  ;;  %v1054_v42 = vld [vmem:[#allocation9 + $0x5d0] sm:$0xff] }
 0x22e   :  { %v1105_v52 = vld [vmem:[#allocation9 + $0x768] sm:$0xff]  ;;  %v6646_v61 = vcombine.low %v973_v49, %v977_v50 }
 0x22f   :  { %v1097_v60 = vld [vmem:[#allocation9 + $0x728] sm:$0xff] }
 0x230   :  { %2495 = vmatpush1.bf16.msra.mxu1 %v6582_v54  ;;  %2538 = vmatpush1.bf16.msra.mxu0 %v6710_v55  ;;  %v6782_v54 = vcombine.low %v1109_v43, %v1113_v44  ;;  %v6647_v55 = vcombine.high %v973_v49, %v977_v50  ;;  %v961_v2 = vld [vmem:[#allocation9 + $0x2e8] sm:$0xff]  ;;  %v1058_v43 = vld [vmem:[#allocation9 + $0x5f0] sm:$0xff] }
 0x231   :  { %2496 = vmatprep.subr.bf16.mxu1 %v6575_v56  ;;  %2539 = vmatprep.subr.bf16.mxu0 %v6703_v57  ;;  %v6775_v56 = vcombine.high %v1101_v51, %v1105_v52  ;;  %v965_v57 = vld [vmem:[#allocation9 + $0x308] sm:$0xff]  ;;  %v922_v49 = vld [vmem:[#allocation9 + $0x1b0] sm:$0xff] }
 0x232   :  { %v1085_v3 = vld [vmem:[#allocation9 + $0x6c8] sm:$0xff]  ;;  %v6638_v5 = vcombine.low %v965_v57, %v969_v58  ;;  %v1046_v50 = vld [vmem:[#allocation9 + $0x590] sm:$0xff] }
 0x233   :  { %v1089_v4 = vld [vmem:[#allocation9 + $0x6e8] sm:$0xff] }
 0x234   :  { %2497 = vmatpush1.bf16.msra.mxu1 %v6574_v62  ;;  %2540 = vmatpush1.bf16.msra.mxu0 %v6702_v63  ;;  %v6774_v62 = vcombine.low %v1101_v51, %v1105_v52  ;;  %v6639_v63 = vcombine.high %v965_v57, %v969_v58  ;;  %v953_v10 = vld [vmem:[#allocation9 + $0x2a8] sm:$0xff]  ;;  %v1050_v51 = vld [vmem:[#allocation9 + $0x5b0] sm:$0xff] }
 0x235   :  { %2498 = vmatprep.subr.bf16.mxu1 %v6567_v0  ;;  %2541 = vmatprep.subr.bf16.mxu0 %v6695_v1  ;;  %v6767_v0 = vcombine.high %v1093_v59, %v1097_v60  ;;  %v957_v1 = vld [vmem:[#allocation9 + $0x2c8] sm:$0xff]  ;;  %v914_v57 = vld [vmem:[#allocation9 + $0x170] sm:$0xff] }
 0x236   :  { %v1077_v11 = vld [vmem:[#allocation9 + $0x688] sm:$0xff]  ;;  %v6630_v13 = vcombine.low %v957_v1, %v961_v2  ;;  %v1038_v58 = vld [vmem:[#allocation9 + $0x550] sm:$0xff] }
 0x237   :  { %v1081_v12 = vld [vmem:[#allocation9 + $0x6a8] sm:$0xff] }
 0x238   :  { %2499 = vmatpush1.bf16.msra.mxu1 %v6566_v6  ;;  %2542 = vmatpush1.bf16.msra.mxu0 %v6694_v7  ;;  %v6766_v6 = vcombine.low %v1093_v59, %v1097_v60  ;;  %v6631_v7 = vcombine.high %v957_v1, %v961_v2  ;;  %v945_v18 = vld [vmem:[#allocation9 + $0x268] sm:$0xff]  ;;  %v1042_v59 = vld [vmem:[#allocation9 + $0x570] sm:$0xff] }
 0x239   :  { %2500 = vmatprep.subr.bf16.mxu1 %v6559_v8  ;;  %2543 = vmatprep.subr.bf16.mxu0 %v6687_v9  ;;  %v6759_v8 = vcombine.high %v1085_v3, %v1089_v4  ;;  %v949_v9 = vld [vmem:[#allocation9 + $0x288] sm:$0xff]  ;;  %v906_v1 = vld [vmem:[#allocation9 + $0x130] sm:$0xff] }
 0x23a   :  { %v1069_v19 = vld [vmem:[#allocation9 + $0x648] sm:$0xff]  ;;  %v6622_v21 = vcombine.low %v949_v9, %v953_v10  ;;  %v1030_v2 = vld [vmem:[#allocation9 + $0x510] sm:$0xff] }
 0x23b   :  { %v1073_v20 = vld [vmem:[#allocation9 + $0x668] sm:$0xff] }
 0x23c   :  { %2501 = vmatpush1.bf16.msra.mxu1 %v6558_v14  ;;  %2544 = vmatpush1.bf16.msra.mxu0 %v6686_v15  ;;  %v6758_v14 = vcombine.low %v1085_v3, %v1089_v4  ;;  %v6623_v15 = vcombine.high %v949_v9, %v953_v10  ;;  %v937_v26 = vld [vmem:[#allocation9 + $0x228] sm:$0xff]  ;;  %v1034_v3 = vld [vmem:[#allocation9 + $0x530] sm:$0xff] }
 0x23d   :  { %2502 = vmatprep.subr.bf16.mxu1 %v6551_v16  ;;  %2545 = vmatprep.subr.bf16.mxu0 %v6679_v17  ;;  %v6751_v16 = vcombine.high %v1077_v11, %v1081_v12  ;;  %v941_v17 = vld [vmem:[#allocation9 + $0x248] sm:$0xff]  ;;  %v898_v9 = vld [vmem:[#allocation9 + $0xf0] sm:$0xff] }
 0x23e   :  { %v1061_v27 = vld [vmem:[#allocation9 + $0x608] sm:$0xff]  ;;  %v6614_v29 = vcombine.low %v941_v17, %v945_v18  ;;  %v1022_v10 = vld [vmem:[#allocation9 + $0x4d0] sm:$0xff] }
 0x23f   :  { %v1065_v28 = vld [vmem:[#allocation9 + $0x628] sm:$0xff] }
 0x240   :  { %2503 = vmatpush1.bf16.msra.mxu1 %v6550_v22  ;;  %2546 = vmatpush1.bf16.msra.mxu0 %v6678_v23  ;;  %v6750_v22 = vcombine.low %v1077_v11, %v1081_v12  ;;  %v6615_v23 = vcombine.high %v941_v17, %v945_v18  ;;  %v1026_v11 = vld [vmem:[#allocation9 + $0x4f0] sm:$0xff] }
 0x241   :  { %2504 = vmatprep.subr.bf16.mxu1 %v6543_v24  ;;  %2547 = vmatprep.subr.bf16.mxu0 %v6671_v25  ;;  %v6743_v24 = vcombine.high %v1069_v19, %v1073_v20  ;;  %v933_v25 = vld [vmem:[#allocation9 + $0x208] sm:$0xff]  ;;  %v890_v17 = vld [vmem:[#allocation9 + $0xb0] sm:$0xff] }
 0x242   :  { %v6606_v44 = vcombine.low %v933_v25, %v937_v26  ;;  %v1014_v18 = vld [vmem:[#allocation9 + $0x490] sm:$0xff] }
 0x244   :  { %2505 = vmatpush1.bf16.msra.mxu1 %v6542_v31  ;;  %2548 = vmatpush1.bf16.msra.mxu0 %v6670_v34  ;;  %v6742_v31 = vcombine.low %v1069_v19, %v1073_v20  ;;  %v6607_v34 = vcombine.high %v933_v25, %v937_v26  ;;  %v1018_v19 = vld [vmem:[#allocation9 + $0x4b0] sm:$0xff] }
 0x245   :  { %2506 = vmatprep.subr.bf16.mxu1 %v6663_v35  ;;  %2549 = vmatprep.subr.bf16.mxu0 %v6791_v40  ;;  %v6735_v35 = vcombine.high %v1061_v27, %v1065_v28  ;;  %v926_v40 = vld [vmem:[#allocation9 + $0x1d0] sm:$0xff] }
 0x246   :  { %v6600_v52 = vcombine.low %v926_v40, %v930_v41  ;;  %v882_v25 = vld [vmem:[#allocation9 + $0x70] sm:$0xff] }
 0x247   :  { %v1006_v26 = vld [vmem:[#allocation9 + $0x450] sm:$0xff] }
 0x248   :  { %2507 = vmatpush2.bf16.msra.mxu1 %v6662_v45  ;;  %2550 = vmatpush2.bf16.msra.mxu0 %v6790_v46  ;;  %v6734_v45 = vcombine.low %v1061_v27, %v1065_v28  ;;  %v6601_v46 = vcombine.high %v926_v40, %v930_v41  ;;  %v1010_v27 = vld [vmem:[#allocation9 + $0x470] sm:$0xff] }
 0x249   :  { %2508 = vmatprep.subr.bf16.mxu1 %v6655_v47  ;;  %2551 = vmatprep.subr.bf16.mxu0 %v6783_v48  ;;  %v6729_v47 = vcombine.high %v1054_v42, %v1058_v43  ;;  %v918_v48 = vld [vmem:[#allocation9 + $0x190] sm:$0xff] }
 0x24a   :  { %v6592_v60 = vcombine.low %v918_v48, %v922_v49  ;;  %v874_v40 = vld [vmem:[#allocation9 + $0x30] sm:$0xff] }
 0x24b   :  { %v998_v41 = vld [vmem:[#allocation9 + $0x410] sm:$0xff] }
 0x24c   :  { %2509 = vmatpush2.bf16.msra.mxu1 %v6654_v53  ;;  %2552 = vmatpush2.bf16.msra.mxu0 %v6782_v54  ;;  %v6728_v53 = vcombine.low %v1054_v42, %v1058_v43  ;;  %v6593_v54 = vcombine.high %v918_v48, %v922_v49  ;;  %v1002_v42 = vld [vmem:[#allocation9 + $0x430] sm:$0xff] }
 0x24d   :  { %2510 = vmatprep.subr.bf16.mxu1 %v6647_v55  ;;  %2553 = vmatprep.subr.bf16.mxu0 %v6775_v56  ;;  %v6721_v55 = vcombine.high %v1046_v50, %v1050_v51  ;;  %v910_v56 = vld [vmem:[#allocation9 + $0x150] sm:$0xff] }
 0x24e   :  { %v6584_v4 = vcombine.low %v910_v56, %v914_v57  ;;  %v994_v48 = vld [vmem:[#allocation9 + $0x3f0] sm:$0xff] }
 0x24f   :  { %v1118_v49 = vld [vmem:[#allocation9 + $0x7d0] sm:$0xff] }
 0x250   :  { %2511 = vmatpush2.bf16.msra.mxu1 %v6646_v61  ;;  %2554 = vmatpush2.bf16.msra.mxu0 %v6774_v62  ;;  %v6720_v61 = vcombine.low %v1046_v50, %v1050_v51  ;;  %v6585_v62 = vcombine.high %v910_v56, %v914_v57  ;;  %v1122_v50 = vld [vmem:[#allocation9 + $0x7f0] sm:$0xff] }
 0x251   :  { %2512 = vmatprep.subr.bf16.mxu1 %v6639_v63  ;;  %2555 = vmatprep.subr.bf16.mxu0 %v6767_v0  ;;  %v6713_v63 = vcombine.high %v1038_v58, %v1042_v59  ;;  %v902_v0 = vld [vmem:[#allocation9 + $0x110] sm:$0xff] }
 0x252   :  { %v6576_v12 = vcombine.low %v902_v0, %v906_v1  ;;  %v986_v56 = vld [vmem:[#allocation9 + $0x3b0] sm:$0xff] }
 0x253   :  { %v1110_v57 = vld [vmem:[#allocation9 + $0x790] sm:$0xff] }
 0x254   :  { %2513 = vmatpush2.bf16.msra.mxu1 %v6638_v5  ;;  %2556 = vmatpush2.bf16.msra.mxu0 %v6766_v6  ;;  %v6712_v5 = vcombine.low %v1038_v58, %v1042_v59  ;;  %v6577_v6 = vcombine.high %v902_v0, %v906_v1  ;;  %v1114_v58 = vld [vmem:[#allocation9 + $0x7b0] sm:$0xff] }
 0x255   :  { %2514 = vmatprep.subr.bf16.mxu1 %v6631_v7  ;;  %2557 = vmatprep.subr.bf16.mxu0 %v6759_v8  ;;  %v6705_v7 = vcombine.high %v1030_v2, %v1034_v3  ;;  %v894_v8 = vld [vmem:[#allocation9 + $0xd0] sm:$0xff] }
 0x256   :  { %v6568_v20 = vcombine.low %v894_v8, %v898_v9  ;;  %v978_v0 = vld [vmem:[#allocation9 + $0x370] sm:$0xff] }
 0x257   :  { %v1102_v1 = vld [vmem:[#allocation9 + $0x750] sm:$0xff] }
 0x258   :  { %2515 = vmatpush2.bf16.msra.mxu1 %v6630_v13  ;;  %2558 = vmatpush2.bf16.msra.mxu0 %v6758_v14  ;;  %v6704_v13 = vcombine.low %v1030_v2, %v1034_v3  ;;  %v6569_v14 = vcombine.high %v894_v8, %v898_v9  ;;  %v1106_v2 = vld [vmem:[#allocation9 + $0x770] sm:$0xff] }
 0x259   :  { %2516 = vmatprep.subr.bf16.mxu1 %v6623_v15  ;;  %2559 = vmatprep.subr.bf16.mxu0 %v6751_v16  ;;  %v6697_v15 = vcombine.high %v1022_v10, %v1026_v11  ;;  %v886_v16 = vld [vmem:[#allocation9 + $0x90] sm:$0xff] }
 0x25a   :  { %v6560_v28 = vcombine.low %v886_v16, %v890_v17  ;;  %v970_v8 = vld [vmem:[#allocation9 + $0x330] sm:$0xff] }
 0x25b   :  { %v1094_v9 = vld [vmem:[#allocation9 + $0x710] sm:$0xff] }
 0x25c   :  { %2517 = vmatpush2.bf16.msra.mxu1 %v6622_v21  ;;  %2560 = vmatpush2.bf16.msra.mxu0 %v6750_v22  ;;  %v6696_v21 = vcombine.low %v1022_v10, %v1026_v11  ;;  %v6561_v22 = vcombine.high %v886_v16, %v890_v17  ;;  %v1098_v10 = vld [vmem:[#allocation9 + $0x730] sm:$0xff] }
 0x25d   :  { %2518 = vmatprep.subr.bf16.mxu1 %v6615_v23  ;;  %2561 = vmatprep.subr.bf16.mxu0 %v6743_v24  ;;  %v6689_v23 = vcombine.high %v1014_v18, %v1018_v19  ;;  %v878_v24 = vld [vmem:[#allocation9 + $0x50] sm:$0xff] }
 0x25e   :  { %v6552_v43 = vcombine.low %v878_v24, %v882_v25  ;;  %v962_v16 = vld [vmem:[#allocation9 + $0x2f0] sm:$0xff] }
 0x25f   :  { %v1086_v17 = vld [vmem:[#allocation9 + $0x6d0] sm:$0xff] }
 0x260   :  { %2519 = vmatpush2.bf16.msra.mxu1 %v6614_v29  ;;  %2562 = vmatpush2.bf16.msra.mxu0 %v6742_v31  ;;  %v6688_v29 = vcombine.low %v1014_v18, %v1018_v19  ;;  %v6553_v31 = vcombine.high %v878_v24, %v882_v25  ;;  %v1090_v18 = vld [vmem:[#allocation9 + $0x6f0] sm:$0xff] }
 0x261   :  { %2520 = vmatprep.subr.bf16.mxu1 %v6607_v34  ;;  %2563 = vmatprep.subr.bf16.mxu0 %v6735_v35  ;;  %v6681_v34 = vcombine.high %v1006_v26, %v1010_v27  ;;  %v870_v35 = vld [vmem:[#allocation9 + $0x10] sm:$0xff] }
 0x262   :  { %v6544_v51 = vcombine.low %v870_v35, %v874_v40  ;;  %v954_v24 = vld [vmem:[#allocation9 + $0x2b0] sm:$0xff] }
 0x263   :  { %v1078_v25 = vld [vmem:[#allocation9 + $0x690] sm:$0xff] }
 0x264   :  { %2521 = vmatpush2.bf16.msra.mxu1 %v6606_v44  ;;  %2564 = vmatpush2.bf16.msra.mxu0 %v6734_v45  ;;  %v6680_v44 = vcombine.low %v1006_v26, %v1010_v27  ;;  %v6545_v45 = vcombine.high %v870_v35, %v874_v40  ;;  %v1082_v26 = vld [vmem:[#allocation9 + $0x6b0] sm:$0xff] }
 0x265   :  { %2576 = vmatprep.subr.bf16.mxu1 %v6601_v46  ;;  %2619 = vmatprep.subr.bf16.mxu0 %v6729_v47  ;;  %v6673_v46 = vcombine.high %v998_v41, %v1002_v42  ;;  %v990_v47 = vld [vmem:[#allocation9 + $0x3d0] sm:$0xff] }
 0x266   :  { %v6664_v59 = vcombine.low %v990_v47, %v994_v48  ;;  %v946_v35 = vld [vmem:[#allocation9 + $0x270] sm:$0xff] }
 0x267   :  { %2523 = vmatmul.mubr.bf16.vlgmr.msra.gmra.mxu1 %v8439_v38  ;;  %2566 = vmatmul.mubr.bf16.vlgmr.msra.gmra.mxu0 %v8441_v39  ;;  %v1070_v40 = vld [vmem:[#allocation9 + $0x650] sm:$0xff] }
 0x268   :  { %2577 = vmatpush1.bf16.msra.mxu1 %v6600_v52  ;;  %2608 = vmatprep.mubr.bf16.mxu1 %v8435_v36  ;;  %v6672_v52 = vcombine.low %v998_v41, %v1002_v42  ;;  %v1074_v41 = vld [vmem:[#allocation9 + $0x670] sm:$0xff] }
 0x269   :  { %2620 = vmatpush1.bf16.msra.mxu0 %v6728_v53  ;;  %2651 = vmatprep.mubr.bf16.mxu0 %v8437_v37  ;;  %v6665_v53 = vcombine.high %v990_v47, %v994_v48  ;;  %v938_v47 = vld [vmem:[#allocation9 + $0x230] sm:$0xff] }
 0x26a   :  { %2578 = vmatprep.subr.bf16.mxu1 %v6593_v54  ;;  %2621 = vmatprep.subr.bf16.mxu0 %v6721_v55  ;;  %v6793_v54 = vcombine.high %v1118_v49, %v1122_v50  ;;  %v982_v55 = vld [vmem:[#allocation9 + $0x390] sm:$0xff] }
 0x26b   :  { %v6656_v3 = vcombine.low %v982_v55, %v986_v56  ;;  %v1062_v48 = vld [vmem:[#allocation9 + $0x610] sm:$0xff] }
 0x26c   :  { %2579 = vmatpush1.bf16.msra.mxu1 %v6592_v60  ;;  %v6792_v60 = vcombine.low %v1118_v49, %v1122_v50  ;;  %v1066_v49 = vld [vmem:[#allocation9 + $0x630] sm:$0xff] }
 0x26d   :  { %2622 = vmatpush1.bf16.msra.mxu0 %v6720_v61  ;;  %2580 = vmatprep.subr.bf16.mxu1 %v6585_v62  ;;  %v6657_v61 = vcombine.high %v982_v55, %v986_v56  ;;  %v6785_v62 = vcombine.high %v1110_v57, %v1114_v58  ;;  %v931_v55 = vld [vmem:[#allocation9 + $0x1f8] sm:$0xff] }
 0x26e   :  { %2623 = vmatprep.subr.bf16.mxu0 %v6713_v63  ;;  %v974_v63 = vld [vmem:[#allocation9 + $0x350] sm:$0xff]  ;;  %v1055_v56 = vld [vmem:[#allocation9 + $0x5d8] sm:$0xff] }
 0x26f   :  { %v6648_v11 = vcombine.low %v974_v63, %v978_v0 }
 0x270   :  { %2581 = vmatpush1.bf16.msra.mxu1 %v6584_v4  ;;  %v6784_v4 = vcombine.low %v1110_v57, %v1114_v58  ;;  %v1059_v57 = vld [vmem:[#allocation9 + $0x5f8] sm:$0xff] }
 0x271   :  { %2624 = vmatpush1.bf16.msra.mxu0 %v6712_v5  ;;  %2582 = vmatprep.subr.bf16.mxu1 %v6577_v6  ;;  %v6649_v5 = vcombine.high %v974_v63, %v978_v0  ;;  %v6777_v6 = vcombine.high %v1102_v1, %v1106_v2  ;;  %v923_v63 = vld [vmem:[#allocation9 + $0x1b8] sm:$0xff] }
 0x272   :  { %2625 = vmatprep.subr.bf16.mxu0 %v6705_v7  ;;  %v966_v7 = vld [vmem:[#allocation9 + $0x310] sm:$0xff] }
 0x273   :  { %v6640_v19 = vcombine.low %v966_v7, %v970_v8 }
 0x274   :  { %2583 = vmatpush1.bf16.msra.mxu1 %v6576_v12  ;;  %v6776_v12 = vcombine.low %v1102_v1, %v1106_v2  ;;  %v1047_v1 = vld [vmem:[#allocation9 + $0x598] sm:$0xff] }
 0x275   :  { %2626 = vmatpush1.bf16.msra.mxu0 %v6704_v13  ;;  %2584 = vmatprep.subr.bf16.mxu1 %v6569_v14  ;;  %v6641_v13 = vcombine.high %v966_v7, %v970_v8  ;;  %v6769_v14 = vcombine.high %v1094_v9, %v1098_v10  ;;  %v1051_v2 = vld [vmem:[#allocation9 + $0x5b8] sm:$0xff] }
 0x276   :  { %2627 = vmatprep.subr.bf16.mxu0 %v6697_v15  ;;  %v958_v15 = vld [vmem:[#allocation9 + $0x2d0] sm:$0xff]  ;;  %v6723_v7 = vcombine.high %v1047_v1, %v1051_v2  ;;  %v1039_v8 = vld [vmem:[#allocation9 + $0x558] sm:$0xff] }
 0x277   :  { %v6632_v27 = vcombine.low %v958_v15, %v962_v16 }
 0x278   :  { %2585 = vmatpush1.bf16.msra.mxu1 %v6568_v20  ;;  %v6768_v20 = vcombine.low %v1094_v9, %v1098_v10  ;;  %v1043_v9 = vld [vmem:[#allocation9 + $0x578] sm:$0xff] }
 0x279   :  { %2628 = vmatpush1.bf16.msra.mxu0 %v6696_v21  ;;  %2586 = vmatprep.subr.bf16.mxu1 %v6561_v22  ;;  %v6633_v21 = vcombine.high %v958_v15, %v962_v16  ;;  %v6761_v22 = vcombine.high %v1086_v17, %v1090_v18  ;;  %v907_v15 = vld [vmem:[#allocation9 + $0x138] sm:$0xff] }
 0x27a   :  { %2629 = vmatprep.subr.bf16.mxu0 %v6689_v23  ;;  %v950_v23 = vld [vmem:[#allocation9 + $0x290] sm:$0xff]  ;;  %v1031_v16 = vld [vmem:[#allocation9 + $0x518] sm:$0xff] }
 0x27b   :  { %v6624_v42 = vcombine.low %v950_v23, %v954_v24 }
 0x27c   :  { %2587 = vmatpush1.bf16.msra.mxu1 %v6560_v28  ;;  %v6760_v28 = vcombine.low %v1086_v17, %v1090_v18  ;;  %v1035_v17 = vld [vmem:[#allocation9 + $0x538] sm:$0xff] }
 0x27d   :  { %2630 = vmatpush1.bf16.msra.mxu0 %v6688_v29  ;;  %2588 = vmatprep.subr.bf16.mxu1 %v6553_v31  ;;  %v6625_v29 = vcombine.high %v950_v23, %v954_v24  ;;  %v6753_v31 = vcombine.high %v1078_v25, %v1082_v26  ;;  %v1023_v23 = vld [vmem:[#allocation9 + $0x4d8] sm:$0xff] }
 0x27e   :  { %2631 = vmatprep.subr.bf16.mxu0 %v6681_v34  ;;  %v942_v34 = vld [vmem:[#allocation9 + $0x250] sm:$0xff]  ;;  %v1027_v24 = vld [vmem:[#allocation9 + $0x4f8] sm:$0xff] }
 0x27f   :  { %v6616_v50 = vcombine.low %v942_v34, %v946_v35 }
 0x280   :  { %2589 = vmatpush1.bf16.msra.mxu1 %v6552_v43  ;;  %v6752_v43 = vcombine.low %v1078_v25, %v1082_v26  ;;  %v6706_v25 = vcombine.low %v1031_v16, %v1035_v17 }
 0x281   :  { %2632 = vmatpush1.bf16.msra.mxu0 %v6680_v44  ;;  %2590 = vmatprep.subr.bf16.mxu1 %v6545_v45  ;;  %v6617_v44 = vcombine.high %v942_v34, %v946_v35  ;;  %v6745_v45 = vcombine.high %v1070_v40, %v1074_v41  ;;  %v1019_v34 = vld [vmem:[#allocation9 + $0x4b8] sm:$0xff] }
 0x282   :  { %2633 = vmatprep.subr.bf16.mxu0 %v6673_v46  ;;  %v934_v46 = vld [vmem:[#allocation9 + $0x210] sm:$0xff] }
 0x283   :  { %v6608_v58 = vcombine.low %v934_v46, %v938_v47 }
 0x284   :  { %2591 = vmatpush1.bf16.msra.mxu1 %v6544_v51  ;;  %v6744_v51 = vcombine.low %v1070_v40, %v1074_v41  ;;  %v6698_v40 = vcombine.low %v1023_v23, %v1027_v24 }
 0x285   :  { %2634 = vmatpush1.bf16.msra.mxu0 %v6672_v52  ;;  %2592 = vmatprep.subr.bf16.mxu1 %v6665_v53  ;;  %v6609_v52 = vcombine.high %v934_v46, %v938_v47  ;;  %v6737_v53 = vcombine.high %v1062_v48, %v1066_v49  ;;  %v1011_v46 = vld [vmem:[#allocation9 + $0x478] sm:$0xff] }
 0x286   :  { %2635 = vmatprep.subr.bf16.mxu0 %v6793_v54  ;;  %v927_v54 = vld [vmem:[#allocation9 + $0x1d8] sm:$0xff] }
 0x287   :  { %v6602_v0 = vcombine.low %v927_v54, %v931_v55 }
 0x288   :  { %2593 = vmatpush2.bf16.msra.mxu1 %v6664_v59  ;;  %v6736_v59 = vcombine.low %v1062_v48, %v1066_v49 }
 0x289   :  { %2636 = vmatpush2.bf16.msra.mxu0 %v6792_v60  ;;  %2594 = vmatprep.subr.bf16.mxu1 %v6657_v61  ;;  %v6603_v60 = vcombine.high %v927_v54, %v931_v55  ;;  %v6731_v61 = vcombine.high %v1055_v56, %v1059_v57  ;;  %v1003_v54 = vld [vmem:[#allocation9 + $0x438] sm:$0xff] }
 0x28a   :  { %2637 = vmatprep.subr.bf16.mxu0 %v6785_v62  ;;  %v919_v62 = vld [vmem:[#allocation9 + $0x198] sm:$0xff] }
 0x28b   :  { %v6594_v10 = vcombine.low %v919_v62, %v923_v63 }
 0x28c   :  { %2595 = vmatpush2.bf16.msra.mxu1 %v6656_v3  ;;  %v6730_v3 = vcombine.low %v1055_v56, %v1059_v57 }
 0x28d   :  { %2638 = vmatpush2.bf16.msra.mxu0 %v6784_v4  ;;  %2596 = vmatprep.subr.bf16.mxu1 %v6649_v5  ;;  %v6595_v4 = vcombine.high %v919_v62, %v923_v63  ;;  %v911_v5 = vld [vmem:[#allocation9 + $0x158] sm:$0xff] }
 0x28e   :  { %2639 = vmatprep.subr.bf16.mxu0 %v6777_v6  ;;  %v915_v6 = vld [vmem:[#allocation9 + $0x178] sm:$0xff] }
 0x28f   :  { %v6586_v18 = vcombine.low %v911_v5, %v915_v6  ;;  %v1123_v62 = vld [vmem:[#allocation9 + $0x7f8] sm:$0xff] }
 0x290   :  { %2597 = vmatpush2.bf16.msra.mxu1 %v6648_v11  ;;  %v6722_v11 = vcombine.low %v1047_v1, %v1051_v2 }
 0x291   :  { %2640 = vmatpush2.bf16.msra.mxu0 %v6776_v12  ;;  %2598 = vmatprep.subr.bf16.mxu1 %v6641_v13  ;;  %v6587_v12 = vcombine.high %v911_v5, %v915_v6  ;;  %v6715_v13 = vcombine.high %v1039_v8, %v1043_v9  ;;  %v1111_v5 = vld [vmem:[#allocation9 + $0x798] sm:$0xff] }
 0x292   :  { %2641 = vmatprep.subr.bf16.mxu0 %v6769_v14  ;;  %v903_v14 = vld [vmem:[#allocation9 + $0x118] sm:$0xff] }
 0x293   :  { %v1115_v6 = vld [vmem:[#allocation9 + $0x7b8] sm:$0xff] }
 0x294   :  { %2599 = vmatpush2.bf16.msra.mxu1 %v6640_v19  ;;  %v6714_v19 = vcombine.low %v1039_v8, %v1043_v9 }
 0x295   :  { %2642 = vmatpush2.bf16.msra.mxu0 %v6768_v20  ;;  %2600 = vmatprep.subr.bf16.mxu1 %v6633_v21  ;;  %v6579_v20 = vcombine.high %v903_v14, %v907_v15  ;;  %v895_v21 = vld [vmem:[#allocation9 + $0xd8] sm:$0xff] }
 0x296   :  { %2643 = vmatprep.subr.bf16.mxu0 %v6761_v22  ;;  %v899_v22 = vld [vmem:[#allocation9 + $0xf8] sm:$0xff] }
 0x297   :  { %v6571_v26 = vcombine.high %v895_v21, %v899_v22  ;;  %v6570_v35 = vcombine.low %v895_v21, %v899_v22  ;;  %v1099_v21 = vld [vmem:[#allocation9 + $0x738] sm:$0xff] }
 0x298   :  { %2601 = vmatpush2.bf16.msra.mxu1 %v6632_v27  ;;  %v6699_v27 = vcombine.high %v1023_v23, %v1027_v24 }
 0x299   :  { %2644 = vmatpush2.bf16.msra.mxu0 %v6760_v28  ;;  %2602 = vmatprep.subr.bf16.mxu1 %v6625_v29  ;;  %v887_v28 = vld [vmem:[#allocation9 + $0x98] sm:$0xff] }
 0x29a   :  { %2645 = vmatprep.subr.bf16.mxu0 %v6753_v31  ;;  %v891_v29 = vld [vmem:[#allocation9 + $0xb8] sm:$0xff] }
 0x29b   :  { %v1015_v31 = vld [vmem:[#allocation9 + $0x498] sm:$0xff]  ;;  %v6563_v41 = vcombine.high %v887_v28, %v891_v29  ;;  %v6562_v47 = vcombine.low %v887_v28, %v891_v29 }
 0x29c   :  { %2603 = vmatpush2.bf16.msra.mxu1 %v6624_v42  ;;  %v6691_v42 = vcombine.high %v1015_v31, %v1019_v34  ;;  %v6690_v48 = vcombine.low %v1015_v31, %v1019_v34  ;;  %v1091_v28 = vld [vmem:[#allocation9 + $0x6f8] sm:$0xff] }
 0x29d   :  { %2646 = vmatpush2.bf16.msra.mxu0 %v6752_v43  ;;  %2604 = vmatprep.subr.bf16.mxu1 %v6617_v44  ;;  %v879_v43 = vld [vmem:[#allocation9 + $0x58] sm:$0xff] }
 0x29e   :  { %2647 = vmatprep.subr.bf16.mxu0 %v6745_v45  ;;  %v883_v44 = vld [vmem:[#allocation9 + $0x78] sm:$0xff] }
 0x29f   :  { %v1007_v45 = vld [vmem:[#allocation9 + $0x458] sm:$0xff]  ;;  %v6555_v49 = vcombine.high %v879_v43, %v883_v44  ;;  %v6554_v55 = vcombine.low %v879_v43, %v883_v44 }
 0x2a0   :  { %2605 = vmatpush2.bf16.msra.mxu1 %v6616_v50  ;;  %v6683_v50 = vcombine.high %v1007_v45, %v1011_v46  ;;  %v6682_v56 = vcombine.low %v1007_v45, %v1011_v46  ;;  %v1083_v43 = vld [vmem:[#allocation9 + $0x6b8] sm:$0xff] }
 0x2a1   :  { %2648 = vmatpush2.bf16.msra.mxu0 %v6744_v51  ;;  %2606 = vmatprep.subr.bf16.mxu1 %v6609_v52  ;;  %v871_v51 = vld [vmem:[#allocation9 + $0x18] sm:$0xff] }
 0x2a2   :  { %2649 = vmatprep.subr.bf16.mxu0 %v6737_v53  ;;  %v875_v52 = vld [vmem:[#allocation9 + $0x38] sm:$0xff] }
 0x2a3   :  { %v999_v53 = vld [vmem:[#allocation9 + $0x418] sm:$0xff]  ;;  %v6547_v57 = vcombine.high %v871_v51, %v875_v52  ;;  %v6546_v63 = vcombine.low %v871_v51, %v875_v52 }
 0x2a4   :  { %2607 = vmatpush2.bf16.msra.mxu1 %v6608_v58  ;;  %v6675_v58 = vcombine.high %v999_v53, %v1003_v54  ;;  %v1075_v51 = vld [vmem:[#allocation9 + $0x678] sm:$0xff] }
 0x2a5   :  { %2650 = vmatpush2.bf16.msra.mxu0 %v6736_v59  ;;  %2662 = vmatprep.subr.bf16.mxu1 %v6603_v60  ;;  %v991_v59 = vld [vmem:[#allocation9 + $0x3d8] sm:$0xff] }
 0x2a6   :  { %2705 = vmatprep.subr.bf16.mxu0 %v6731_v61  ;;  %v995_v60 = vld [vmem:[#allocation9 + $0x3f8] sm:$0xff] }
 0x2a7   :  { %2609 = vmatmul.mubr.bf16.vlgmr.msra.gmra.mxu1 %v8439_v38  ;;  %v1119_v61 = vld [vmem:[#allocation9 + $0x7d8] sm:$0xff]  ;;  %v6667_v1 = vcombine.high %v991_v59, %v995_v60 }
 0x2a8   :  { %2652 = vmatmul.mubr.bf16.vlgmr.msra.gmra.mxu0 %v8441_v39  ;;  %2663 = vmatpush1.bf16.msra.mxu1 %v6602_v0  ;;  %v6674_v0 = vcombine.low %v999_v53, %v1003_v54  ;;  %v6795_v2 = vcombine.high %v1119_v61, %v1123_v62  ;;  %v6794_v8 = vcombine.low %v1119_v61, %v1123_v62 }
 0x2a9   :  { %2694 = vmatprep.mubr.bf16.mxu1 %v8435_v36  ;;  %2706 = vmatpush1.bf16.msra.mxu0 %v6730_v3  ;;  %v6707_v36 = vcombine.high %v1031_v16, %v1035_v17  ;;  %v983_v3 = vld [vmem:[#allocation9 + $0x398] sm:$0xff]  ;;  %v6786_v16 = vcombine.low %v1111_v5, %v1115_v6 }
 0x2aa   :  { %2737 = vmatprep.mubr.bf16.mxu0 %v8437_v37  ;;  %2664 = vmatprep.subr.bf16.mxu1 %v6595_v4  ;;  %v6578_v37 = vcombine.low %v903_v14, %v907_v15  ;;  %v987_v4 = vld [vmem:[#allocation9 + $0x3b8] sm:$0xff] }
 0x2ab   :  { %2707 = vmatprep.subr.bf16.mxu0 %v6723_v7  ;;  %v6666_v7 = vcombine.low %v991_v59, %v995_v60  ;;  %v6659_v9 = vcombine.high %v983_v3, %v987_v4  ;;  %v1107_v14 = vld [vmem:[#allocation9 + $0x778] sm:$0xff]  ;;  %v6658_v15 = vcombine.low %v983_v3, %v987_v4  ;;  %v8457_v60 = vld [vmem:[#allocation10] sm:$0xff]  ;;  %v7473_v4 = vld [vmem:[#allocation12 + $0x18c] ss:$28 sps:$4 sm:$0xff]  }
 0x2ac   :  { %2665 = vmatpush1.bf16.msra.mxu1 %v6594_v10  ;;  %v6787_v10 = vcombine.high %v1111_v5, %v1115_v6  ;;  %v1067_v59 = vld [vmem:[#allocation9 + $0x638] sm:$0xff]  ;;  %v7488_v6 = vld [vmem:[#allocation12 + $0x50c] ss:$28 sps:$4 sm:$0xff]  }
 0x2ad   :  { %2708 = vmatpush1.bf16.msra.mxu0 %v6722_v11  ;;  %2666 = vmatprep.subr.bf16.mxu1 %v6587_v12  ;;  %v975_v11 = vld [vmem:[#allocation9 + $0x358] sm:$0xff] }
 0x2ae   :  { %2709 = vmatprep.subr.bf16.mxu0 %v6715_v13  ;;  %v979_v12 = vld [vmem:[#allocation9 + $0x378] sm:$0xff] }
 0x2af   :  { %v1103_v13 = vld [vmem:[#allocation9 + $0x758] sm:$0xff]  ;;  %v6651_v17 = vcombine.high %v975_v11, %v979_v12  ;;  %v6650_v22 = vcombine.low %v975_v11, %v979_v12 }
 0x2b0   :  { %2667 = vmatpush1.bf16.msra.mxu1 %v6586_v18  ;;  %v6779_v18 = vcombine.high %v1103_v13, %v1107_v14  ;;  %v6778_v23 = vcombine.low %v1103_v13, %v1107_v14  ;;  %v7494_v11 = vld [vmem:[#allocation12 + $0x4d4] ss:$28 sps:$4 sm:$0xff]  }
 0x2b1   :  { %2710 = vmatpush1.bf16.msra.mxu0 %v6714_v19  ;;  %2668 = vmatprep.subr.bf16.mxu1 %v6579_v20  ;;  %v967_v19 = vld [vmem:[#allocation9 + $0x318] sm:$0xff] }
 0x2b2   :  { %2711 = vmatprep.subr.bf16.mxu0 %v6707_v36  ;;  %v971_v20 = vld [vmem:[#allocation9 + $0x338] sm:$0xff] }
 0x2b3   :  { %v1095_v36 = vld [vmem:[#allocation9 + $0x718] sm:$0xff]  ;;  %v6643_v24 = vcombine.high %v967_v19, %v971_v20  ;;  %v6642_v29 = vcombine.low %v967_v19, %v971_v20  ;;  %v7500_v20 = vld [vmem:[#allocation12 + $0x49c] ss:$28 sps:$4 sm:$0xff]  }
 0x2b4   :  { %2669 = vmatpush1.bf16.msra.mxu1 %v6578_v37  ;;  %v6771_v37 = vcombine.high %v1095_v36, %v1099_v21  ;;  %v6770_v31 = vcombine.low %v1095_v36, %v1099_v21  ;;  %v7474_v14 = vld [vmem:[#allocation12 + $0x150] ss:$28 sps:$4 sm:$0xff]   ;;  %v7477_v21 = vld [vmem:[#allocation12 + $0x118] ss:$28 sps:$4 sm:$0xff]  }
 0x2b5   :  { %2712 = vmatpush1.bf16.msra.mxu0 %v6706_v25  ;;  %2670 = vmatprep.subr.bf16.mxu1 %v6571_v26  ;;  %v959_v25 = vld [vmem:[#allocation9 + $0x2d8] sm:$0xff] }
 0x2b6   :  { %2713 = vmatprep.subr.bf16.mxu0 %v6699_v27  ;;  %v963_v26 = vld [vmem:[#allocation9 + $0x2f8] sm:$0xff] }
 0x2b7   :  { %v1087_v27 = vld [vmem:[#allocation9 + $0x6d8] sm:$0xff]  ;;  %v6635_v34 = vcombine.high %v959_v25, %v963_v26  ;;  %v6634_v44 = vcombine.low %v959_v25, %v963_v26 }
 0x2b8   :  { %2671 = vmatpush1.bf16.msra.mxu1 %v6570_v35  ;;  %v6763_v35 = vcombine.high %v1087_v27, %v1091_v28  ;;  %v6762_v45 = vcombine.low %v1087_v27, %v1091_v28  ;;  %v7506_v27 = vld [vmem:[#allocation12 + $0x464] ss:$28 sps:$4 sm:$0xff]  }
 0x2b9   :  { %2714 = vmatpush1.bf16.msra.mxu0 %v6698_v40  ;;  %2672 = vmatprep.subr.bf16.mxu1 %v6563_v41  ;;  %v951_v40 = vld [vmem:[#allocation9 + $0x298] sm:$0xff] }
 0x2ba   :  { %2715 = vmatprep.subr.bf16.mxu0 %v6691_v42  ;;  %v955_v41 = vld [vmem:[#allocation9 + $0x2b8] sm:$0xff] }
 0x2bb   :  { %v1079_v42 = vld [vmem:[#allocation9 + $0x698] sm:$0xff]  ;;  %v6627_v46 = vcombine.high %v951_v40, %v955_v41  ;;  %v6626_v52 = vcombine.low %v951_v40, %v955_v41  ;;  %v7512_v40 = vld [vmem:[#allocation12 + $0x42c] ss:$28 sps:$4 sm:$0xff]  }
 0x2bc   :  { %2673 = vmatpush1.bf16.msra.mxu1 %v6562_v47  ;;  %v6755_v47 = vcombine.high %v1079_v42, %v1083_v43  ;;  %v6754_v53 = vcombine.low %v1079_v42, %v1083_v43  ;;  %v7483_v42 = vld [vmem:[#allocation12 + $0xa8] ss:$28 sps:$4 sm:$0xff]   ;;  %v7491_v43 = vld [vmem:[#allocation12 + $0x74] ss:$28 sps:$4 sm:$0xff]  }
 0x2bd   :  { %2716 = vmatpush1.bf16.msra.mxu0 %v6690_v48  ;;  %2674 = vmatprep.subr.bf16.mxu1 %v6555_v49  ;;  %v943_v48 = vld [vmem:[#allocation9 + $0x258] sm:$0xff] }
 0x2be   :  { %2717 = vmatprep.subr.bf16.mxu0 %v6683_v50  ;;  %v947_v49 = vld [vmem:[#allocation9 + $0x278] sm:$0xff] }
 0x2bf   :  { %v1071_v50 = vld [vmem:[#allocation9 + $0x658] sm:$0xff]  ;;  %v6619_v54 = vcombine.high %v943_v48, %v947_v49  ;;  %v6618_v61 = vcombine.low %v943_v48, %v947_v49  ;;  %v7497_v48 = vld [vmem:[#allocation12 + $0x3c] ss:$28 sps:$4 sm:$0xff]  }
 0x2c0   :  { %2675 = vmatpush1.bf16.msra.mxu1 %v6554_v55  ;;  %v6747_v55 = vcombine.high %v1071_v50, %v1075_v51  ;;  %v6746_v62 = vcombine.low %v1071_v50, %v1075_v51  ;;  %v7516_v49 = vld [vmem:[#allocation12 + $0x3f0] ss:$28 sps:$4 sm:$0xff]   ;;  %v7524_v50 = vld [vmem:[#allocation12 + $0x3bc] ss:$28 sps:$4 sm:$0xff]  }
 0x2c1   :  { %2718 = vmatpush1.bf16.msra.mxu0 %v6682_v56  ;;  %2676 = vmatprep.subr.bf16.mxu1 %v6547_v57  ;;  %v935_v56 = vld [vmem:[#allocation9 + $0x218] sm:$0xff] }
 0x2c2   :  { %2719 = vmatprep.subr.bf16.mxu0 %v6675_v58  ;;  %v939_v57 = vld [vmem:[#allocation9 + $0x238] sm:$0xff] }
 0x2c3   :  { %v1063_v58 = vld [vmem:[#allocation9 + $0x618] sm:$0xff] }
 0x2c4   :  { %2677 = vmatpush1.bf16.msra.mxu1 %v6546_v63  ;;  %v6611_v63 = vcombine.high %v935_v56, %v939_v57  ;;  %v6738_v3 = vcombine.low %v1063_v58, %v1067_v59  ;;  %v7495_v51 = vld [vmem:[#allocation12 + $0x38] ss:$28 sps:$4 sm:$0xff]  }
 0x2c5   :  { %2720 = vmatpush1.bf16.msra.mxu0 %v6674_v0  ;;  %2678 = vmatprep.subr.bf16.mxu1 %v6667_v1  ;;  %v6739_v0 = vcombine.high %v1063_v58, %v1067_v59  ;;  %v8461_v1 = vrot.slane %v8457_v60, %v8408_v32  ;;  %v7536_v58 = vld [vmem:[#allocation12 + $0x6cc] ss:$28 sps:$4 sm:$0xff]  }
 0x2c6   :  { %2721 = vmatprep.subr.bf16.mxu0 %v6795_v2  ;;  %v6610_v2 = vcombine.low %v935_v56, %v939_v57  ;;  %v7509_v56 = vld [vmem:[#allocation12 + $0x34c] ss:$28 sps:$4 sm:$0xff]   ;;  %v7528_v57 = vld [vmem:[#allocation12 + $0x380] ss:$28 sps:$4 sm:$0xff]  }
 0x2c7   :  { %v2773_v5 = vcombine.high %v8461_v1, %v8461_v1  ;;  %v7507_v59 = vld [vmem:[#allocation12 + $0x348] ss:$28 sps:$4 sm:$0xff]  }
 0x2c8   :  { %2679 = vmatpush2.bf16.msra.mxu1 %v6666_v7  ;;  %v7471_v7 = vld [vmem:[#allocation12 + $0x188] ss:$28 sps:$4 sm:$0xff]  }
 0x2c9   :  { %2722 = vmatpush2.bf16.msra.mxu0 %v6794_v8  ;;  %2680 = vmatprep.subr.bf16.mxu1 %v6659_v9  ;;  %v7476_v8 = vld [vmem:[#allocation12 + $0x154] ss:$28 sps:$4 sm:$0xff]   ;;  %v7486_v9 = vld [vmem:[#allocation12 + $0x508] ss:$28 sps:$4 sm:$0xff]  }
 0x2ca   :  { %2723 = vmatprep.subr.bf16.mxu0 %v6787_v10  ;;  %v8466_v10 = vrot.slane %v2773_v5, %v8408_v32  ;;  %v7519_v5 = vld [vmem:[#allocation12 + $0x2d8] ss:$28 sps:$4 sm:$0xff]  }
 0x2cc   :  { %2681 = vmatpush2.bf16.msra.mxu1 %v6658_v15  ;;  %v2815_v19 = vpack.i.b16 %v8466_v10, %v8466_v10 }
 0x2cd   :  { %2724 = vmatpush2.bf16.msra.mxu0 %v6786_v16  ;;  %2682 = vmatprep.subr.bf16.mxu1 %v6651_v17  ;;  %v7479_v17 = vld [vmem:[#allocation12 + $0x11c] ss:$28 sps:$4 sm:$0xff]  }
 0x2ce   :  { %2725 = vmatprep.subr.bf16.mxu0 %v6779_v18  ;;  %v7492_v18 = vld [vmem:[#allocation12 + $0x4d0] ss:$28 sps:$4 sm:$0xff]   ;;  %v2820_v26 = vrot.slane %v2815_v19, %v8411_v33 }
 0x2d0   :  { %2683 = vmatpush2.bf16.msra.mxu1 %v6650_v22 }
 0x2d1   :  { %2726 = vmatpush2.bf16.msra.mxu0 %v6778_v23  ;;  %2684 = vmatprep.subr.bf16.mxu1 %v6643_v24  ;;  %v7482_v23 = vld [vmem:[#allocation12 + $0xe4] ss:$28 sps:$4 sm:$0xff]   ;;  %v7498_v24 = vld [vmem:[#allocation12 + $0x498] ss:$28 sps:$4 sm:$0xff]  }
 0x2d2   :  { %2727 = vmatprep.subr.bf16.mxu0 %v6771_v37 }
 0x2d4   :  { %2685 = vmatpush2.bf16.msra.mxu1 %v6642_v29  ;;  %v7480_v29 = vld [vmem:[#allocation12 + $0xe0] ss:$28 sps:$4 sm:$0xff]  }
 0x2d5   :  { %2728 = vmatpush2.bf16.msra.mxu0 %v6770_v31  ;;  %2686 = vmatprep.subr.bf16.mxu1 %v6635_v34  ;;  %v7485_v31 = vld [vmem:[#allocation12 + $0xac] ss:$28 sps:$4 sm:$0xff]   ;;  %v7504_v34 = vld [vmem:[#allocation12 + $0x460] ss:$28 sps:$4 sm:$0xff]  }
 0x2d6   :  { %2729 = vmatprep.subr.bf16.mxu0 %v6763_v35 }
 0x2d8   :  { %2687 = vmatpush2.bf16.msra.mxu1 %v6634_v44  ;;  %v7510_v44 = vld [vmem:[#allocation12 + $0x428] ss:$28 sps:$4 sm:$0xff]  }
 0x2d9   :  { %2730 = vmatpush2.bf16.msra.mxu0 %v6762_v45  ;;  %2688 = vmatprep.subr.bf16.mxu1 %v6627_v46  ;;  %v7518_v46 = vld [vmem:[#allocation12 + $0x3f4] ss:$28 sps:$4 sm:$0xff]  }
 0x2da   :  { %2731 = vmatprep.subr.bf16.mxu0 %v6755_v47  ;;  %v7489_v47 = vld [vmem:[#allocation12 + $0x70] ss:$28 sps:$4 sm:$0xff]  }
 0x2dc   :  { %2689 = vmatpush2.bf16.msra.mxu1 %v6626_v52  ;;  %v7503_v52 = vld [vmem:[#allocation12 + $0x4] ss:$28 sps:$4 sm:$0xff]  }
 0x2dd   :  { %2732 = vmatpush2.bf16.msra.mxu0 %v6754_v53  ;;  %2690 = vmatprep.subr.bf16.mxu1 %v6619_v54  ;;  %v7522_v53 = vld [vmem:[#allocation12 + $0x3b8] ss:$28 sps:$4 sm:$0xff]   ;;  %v7530_v54 = vld [vmem:[#allocation12 + $0x384] ss:$28 sps:$4 sm:$0xff]  }
 0x2de   :  { %2733 = vmatprep.subr.bf16.mxu0 %v6747_v55  ;;  %v7501_v55 = vld [vmem:[#allocation12] ss:$28 sps:$4 sm:$0xff]  }
 0x2e0   :  { %2691 = vmatpush2.bf16.msra.mxu1 %v6618_v61  ;;  %v7515_v61 = vld [vmem:[#allocation12 + $0x314] ss:$28 sps:$4 sm:$0xff]  }
 0x2e1   :  { %2734 = vmatpush2.bf16.msra.mxu0 %v6746_v62  ;;  %2692 = vmatprep.subr.bf16.mxu1 %v6611_v63  ;;  %v7534_v62 = vld [vmem:[#allocation12 + $0x6c8] ss:$28 sps:$4 sm:$0xff]   ;;  %v7542_v63 = vld [vmem:[#allocation12 + $0x694] ss:$28 sps:$4 sm:$0xff]  }
 0x2e2   :  { %2735 = vmatprep.subr.bf16.mxu0 %v6739_v0  ;;  %v7513_v0 = vld [vmem:[#allocation12 + $0x310] ss:$28 sps:$4 sm:$0xff]  }
 0x2e4   :  { %2693 = vmatpush2.bf16.msra.mxu1 %v6610_v2  ;;  %v7521_v2 = vld [vmem:[#allocation12 + $0x2dc] ss:$28 sps:$4 sm:$0xff]  }
 0x2e5   :  { %2736 = vmatpush2.bf16.msra.mxu0 %v6738_v3  ;;  %5740 = vmatprep.subr.bf16.mxu1 %v7473_v4  ;;  %v7540_v3 = vld [vmem:[#allocation12 + $0x690] ss:$28 sps:$4 sm:$0xff]   ;;  %v7548_v4 = vld [vmem:[#allocation12 + $0x65c] ss:$28 sps:$4 sm:$0xff]  }
 0x2e6   :  { %5783 = vmatprep.subr.bf16.mxu0 %v7488_v6  ;;  %v7527_v6 = vld [vmem:[#allocation12 + $0x2a4] ss:$28 sps:$4 sm:$0xff]  }
 0x2e7   :  { %2695 = vmatmul.mubr.bf16.vlgmr.msra.gmra.mxu1 %v8439_v38  ;;  %v8469_v12 = vpop.f32.mrf.mxu1  ;;  %v8471_v13 = vpop.f32.mrf.mxu0 }
 0x2e8   :  { %2738 = vmatmul.mubr.bf16.vlgmr.msra.gmra.mxu0 %v8441_v39  ;;  %5741 = vmatpush1.bf16.msra.mxu1 %v7471_v7  ;;  %v7546_v7 = vld [vmem:[#allocation12 + $0x658] ss:$28 sps:$4 sm:$0xff]  }
 0x2e9   :  { %v2440_v15 = vpop.f32.mrf.mxu1  ;;  %v2483_v16 = vpop.f32.mrf.mxu0  ;;  %5742 = vmatprep.subr.bf16.mxu1 %v7476_v8  ;;  %5784 = vmatpush1.bf16.msra.mxu0 %v7486_v9  ;;  %v7554_v8 = vld [vmem:[#allocation12 + $0x624] ss:$28 sps:$4 sm:$0xff]  }
 0x2ea   :  { %5785 = vmatprep.subr.bf16.mxu0 %v7494_v11  ;;  %v2484_v37 = vadd.f32 %v2483_v16, %v2440_v15  ;;  %v7525_v9 = vld [vmem:[#allocation12 + $0x2a0] ss:$28 sps:$4 sm:$0xff]   ;;  %v2781_v11 = vrot.slane %v8461_v1, %v8408_v32  ;;  %v7557_v16 = vld [vmem:[#allocation12 + $0x5ec] ss:$28 sps:$4 sm:$0xff]   ;;  %v2482_v1 = vadd.f32 %v8471_v13, %v8469_v12 }
 0x2eb   :  { %v8476_v38 = vpop.f32.mrf.mxu1  ;;  %v8478_v36 = vpop.f32.mrf.mxu0  ;;  %v7552_v15 = vld [vmem:[#allocation12 + $0x620] ss:$28 sps:$4 sm:$0xff]  }
 0x2ec   :  { %5743 = vmatpush1.bf16.msra.mxu1 %v7474_v14  ;;  %v7533_v14 = vld [vmem:[#allocation12 + $0x26c] ss:$28 sps:$4 sm:$0xff]   ;;  %v2808_v19 = vpack.i.b16 %v2781_v11, %v2781_v11  ;;  %v7566_v12 = vld [vmem:[#allocation12 + $0x544] ss:$28 sps:$4 sm:$0xff]  }
 0x2ed   :  { %v2444_v39 = vpop.f32.mrf.mxu1  ;;  %v2487_v22 = vpop.f32.mrf.mxu0  ;;  %5744 = vmatprep.subr.bf16.mxu1 %v7479_v17  ;;  %5786 = vmatpush1.bf16.msra.mxu0 %v7492_v18  ;;  %v7531_v17 = vld [vmem:[#allocation12 + $0x268] ss:$28 sps:$4 sm:$0xff]   ;;  %v2486_v18 = vadd.f32 %v8478_v36, %v8476_v38  ;;  %v7563_v38 = vld [vmem:[#allocation12 + $0x57c] ss:$28 sps:$4 sm:$0xff]  }
 0x2ee   :  { %v2488_v25 = vadd.f32 %v2487_v22, %v2444_v39  ;;  %5787 = vmatprep.subr.bf16.mxu0 %v7500_v20  ;;  %v7539_v20 = vld [vmem:[#allocation12 + $0x234] ss:$28 sps:$4 sm:$0xff]   ;;  %v7549_v13 = vld [vmem:[#allocation12 + $0x1c0] ss:$28 sps:$4 sm:$0xff]  }
 0x2ef   :  { %v7560_v39 = vld [vmem:[#allocation12 + $0x5b4] ss:$28 sps:$4 sm:$0xff]  }
 0x2f0   :  { %v2749_v28 = vpack.c.bf16 %v2488_v25, %v2484_v37  ;;  %5745 = vmatpush1.bf16.msra.mxu1 %v7477_v21  ;;  %v7555_v21 = vld [vmem:[#allocation12 + $0x5e8] ss:$28 sps:$4 sm:$0xff]   ;;  %v7537_v22 = vld [vmem:[#allocation12 + $0x230] ss:$28 sps:$4 sm:$0xff]   ;;  %v7545_v37 = vld [vmem:[#allocation12 + $0x1fc] ss:$28 sps:$4 sm:$0xff]  }
 0x2f1   :  { %5746 = vmatprep.subr.bf16.mxu1 %v7482_v23  ;;  %5788 = vmatpush1.bf16.msra.mxu0 %v7498_v24  ;;  %v2748_v23 = vpack.c.bf16 %v2486_v18, %v2482_v1  ;;  %v2813_v24 = vrot.slane %v2808_v19, %v8411_v33  ;;  %v7558_v25 = vld [vmem:[#allocation12 + $0x5b0] ss:$28 sps:$4 sm:$0xff]   ;;  %v7543_v36 = vld [vmem:[#allocation12 + $0x1f8] ss:$28 sps:$4 sm:$0xff]  }
 0x2f2   :  { %v2864_v35 = vadd.bf16 %v2820_v26, %v2749_v28  ;;  %5789 = vmatprep.subr.bf16.mxu0 %v7506_v27  ;;  %v7551_v27 = vld [vmem:[#allocation12 + $0x1c4] ss:$28 sps:$4 sm:$0xff]   ;;  %v7561_v28 = vld [vmem:[#allocation12 + $0x578] ss:$28 sps:$4 sm:$0xff]  }
 0x2f3   :  { %v2863_v26 = vadd.bf16 %v2813_v24, %v2748_v23  ;;  %v7624_v19 = vld [vmem:[#allocation12 + $0xbd4] ss:$28 sps:$4 sm:$0xff]   ;;  %v7630_v1 = vld [vmem:[#allocation12 + $0xb9c] ss:$28 sps:$4 sm:$0xff]   ;;  %v7590_v23 = vld [vmem:[#allocation12 + $0x704] ss:$28 sps:$4 sm:$0xff]  }
 0x2f4   :  { %v2872_v41 = vmul.bf16 1045249613, %v2864_v35  ;;  %5747 = vmatpush1.bf16.msra.mxu1 %v7480_v29  ;;  %v7628_v24 = vld [vmem:[#allocation12 + $0xb98] ss:$28 sps:$4 sm:$0xff]  }
 0x2f5   :  { %5748 = vmatprep.subr.bf16.mxu1 %v7485_v31  ;;  %5790 = vmatpush1.bf16.msra.mxu0 %v7504_v34  ;;  %v2871_v29 = vmul.bf16 1045249613, %v2863_v26  ;;  %v7564_v31 = vld [vmem:[#allocation12 + $0x540] ss:$28 sps:$4 sm:$0xff]   ;;  %v7569_v34 = vld [vmem:[#allocation12 + $0x88c] ss:$28 sps:$4 sm:$0xff]  }
 0x2f6   :  { %v8481_v45 = vmax.bf16 %v2872_v41, %v2864_v35  ;;  %5791 = vmatprep.subr.bf16.mxu0 %v7512_v40  ;;  %v7618_v35 = vld [vmem:[#allocation12 + $0xc0c] ss:$28 sps:$4 sm:$0xff]   ;;  %v2803_v40 = vcombine.high %v2781_v11, %v2781_v11 }
 0x2f7   :  { %v7567_v41 = vld [vmem:[#allocation12 + $0x888] ss:$28 sps:$4 sm:$0xff]  }
 0x2f8   :  { %5749 = vmatpush1.bf16.msra.mxu1 %v7483_v42  ;;  %5772 = vmatprep.mubr.bf16.mxu1 %v8481_v45  ;;  %v8491_v42 = vmax.bf16 %v2871_v29, %v2863_v26  ;;  %v7642_v26 = vld [vmem:[#allocation12 + $0xb2c] ss:$28 sps:$4 sm:$0xff]  }
 0x2f9   :  { %5750 = vmatprep.subr.bf16.mxu1 %v7491_v43  ;;  %5792 = vmatpush1.bf16.msra.mxu0 %v7510_v44  ;;  %v7572_v43 = vld [vmem:[#allocation12 + $0x854] ss:$28 sps:$4 sm:$0xff]   ;;  %v2805_v44 = vcombine.high %v8466_v10, %v8466_v10 }
 0x2fa   :  { %5793 = vmatprep.subr.bf16.mxu0 %v7518_v46  ;;  %v7573_v10 = vld [vmem:[#allocation12 + $0x818] ss:$28 sps:$4 sm:$0xff]   ;;  %v7594_v29 = vld [vmem:[#allocation12 + $0xa10] ss:$28 sps:$4 sm:$0xff]  }
 0x2fc   :  { %5751 = vmatpush1.bf16.msra.mxu1 %v7489_v47 }
 0x2fd   :  { %5752 = vmatprep.subr.bf16.mxu1 %v7497_v48  ;;  %5794 = vmatpush1.bf16.msra.mxu0 %v7516_v49  ;;  %v2822_v48 = vpack.i.b16 %v2803_v40, %v2803_v40  ;;  %v7570_v49 = vld [vmem:[#allocation12 + $0x850] ss:$28 sps:$4 sm:$0xff]   ;;  %v7597_v40 = vld [vmem:[#allocation12 + $0x9d8] ss:$28 sps:$4 sm:$0xff]  }
 0x2fe   :  { %5795 = vmatprep.subr.bf16.mxu0 %v7524_v50 }
 0x300   :  { %5753 = vmatpush1.bf16.msra.mxu1 %v7495_v51 }
 0x301   :  { %5754 = vmatprep.subr.bf16.mxu1 %v7503_v52  ;;  %5796 = vmatpush1.bf16.msra.mxu0 %v7522_v53  ;;  %v7575_v52 = vld [vmem:[#allocation12 + $0x81c] ss:$28 sps:$4 sm:$0xff]   ;;  %v2829_v53 = vpack.i.b16 %v2805_v44, %v2805_v44  ;;  %v7660_v44 = vld [vmem:[#allocation12 + $0xa84] ss:$28 sps:$4 sm:$0xff]  }
 0x302   :  { %5797 = vmatprep.subr.bf16.mxu0 %v7530_v54 }
 0x304   :  { %5755 = vmatpush1.bf16.msra.mxu1 %v7501_v55 }
 0x305   :  { %5756 = vmatprep.subr.bf16.mxu1 %v7509_v56  ;;  %5798 = vmatpush1.bf16.msra.mxu0 %v7528_v57 }
 0x306   :  { %5799 = vmatprep.subr.bf16.mxu0 %v7536_v58  ;;  %v2827_v58 = vrot.slane %v2822_v48, %v8411_v33  ;;  %v7658_v48 = vld [vmem:[#allocation12 + $0xa80] ss:$28 sps:$4 sm:$0xff]  }
 0x308   :  { %5757 = vmatpush2.bf16.msra.mxu1 %v7507_v59 }
 0x309   :  { %5758 = vmatprep.subr.bf16.mxu1 %v7515_v61  ;;  %5800 = vmatpush2.bf16.msra.mxu0 %v7534_v62  ;;  %v7578_v62 = vld [vmem:[#allocation12 + $0x7e4] ss:$28 sps:$4 sm:$0xff]  }
 0x30a   :  { %5801 = vmatprep.subr.bf16.mxu0 %v7542_v63 }
 0x30c   :  { %5759 = vmatpush2.bf16.msra.mxu1 %v7513_v0 }
 0x30d   :  { %5760 = vmatprep.subr.bf16.mxu1 %v7521_v2  ;;  %5802 = vmatpush2.bf16.msra.mxu0 %v7540_v3  ;;  %v2834_v3 = vrot.slane %v2829_v53, %v8411_v33  ;;  %v7672_v53 = vld [vmem:[#allocation12 + $0xd94] ss:$28 sps:$4 sm:$0xff]  }
 0x30e   :  { %5803 = vmatprep.subr.bf16.mxu0 %v7548_v4 }
 0x310   :  { %5761 = vmatpush2.bf16.msra.mxu1 %v7519_v5 }
 0x311   :  { %5762 = vmatprep.subr.bf16.mxu1 %v7527_v6  ;;  %5804 = vmatpush2.bf16.msra.mxu0 %v7546_v7  ;;  %v7576_v6 = vld [vmem:[#allocation12 + $0x7e0] ss:$28 sps:$4 sm:$0xff]   ;;  %v7581_v7 = vld [vmem:[#allocation12 + $0x7ac] ss:$28 sps:$4 sm:$0xff]  }
 0x312   :  { %5805 = vmatprep.subr.bf16.mxu0 %v7554_v8 }
 0x314   :  { %5763 = vmatpush2.bf16.msra.mxu1 %v7525_v9 }
 0x315   :  { %5764 = vmatprep.subr.bf16.mxu1 %v7533_v14  ;;  %5806 = vmatpush2.bf16.msra.mxu0 %v7552_v15  ;;  %v7579_v14 = vld [vmem:[#allocation12 + $0x7a8] ss:$28 sps:$4 sm:$0xff]   ;;  %v7584_v15 = vld [vmem:[#allocation12 + $0x774] ss:$28 sps:$4 sm:$0xff]  }
 0x316   :  { %5807 = vmatprep.subr.bf16.mxu0 %v7557_v16 }
 0x318   :  { %5765 = vmatpush2.bf16.msra.mxu1 %v7531_v17  ;;  %v7616_v17 = vld [vmem:[#allocation12 + $0xc08] ss:$28 sps:$4 sm:$0xff]  }
 0x319   :  { %5766 = vmatprep.subr.bf16.mxu1 %v7539_v20  ;;  %5808 = vmatpush2.bf16.msra.mxu0 %v7555_v21  ;;  %v7582_v20 = vld [vmem:[#allocation12 + $0x770] ss:$28 sps:$4 sm:$0xff]   ;;  %v7587_v21 = vld [vmem:[#allocation12 + $0x73c] ss:$28 sps:$4 sm:$0xff]  }
 0x31a   :  { %5809 = vmatprep.subr.bf16.mxu0 %v7560_v39  ;;  %v7622_v39 = vld [vmem:[#allocation12 + $0xbd0] ss:$28 sps:$4 sm:$0xff]  }
 0x31c   :  { %5767 = vmatpush2.bf16.msra.mxu1 %v7537_v22  ;;  %v7585_v22 = vld [vmem:[#allocation12 + $0x738] ss:$28 sps:$4 sm:$0xff]  }
 0x31d   :  { %5768 = vmatprep.subr.bf16.mxu1 %v7545_v37  ;;  %5810 = vmatpush2.bf16.msra.mxu0 %v7558_v25  ;;  %v7636_v37 = vld [vmem:[#allocation12 + $0xb64] ss:$28 sps:$4 sm:$0xff]  }
 0x31e   :  { %5811 = vmatprep.subr.bf16.mxu0 %v7563_v38  ;;  %v7588_v25 = vld [vmem:[#allocation12 + $0x700] ss:$28 sps:$4 sm:$0xff]   ;;  %v7593_v38 = vld [vmem:[#allocation12 + $0xa4c] ss:$28 sps:$4 sm:$0xff]  }
 0x320   :  { %5769 = vmatpush2.bf16.msra.mxu1 %v7543_v36  ;;  %v7634_v36 = vld [vmem:[#allocation12 + $0xb60] ss:$28 sps:$4 sm:$0xff]  }
 0x321   :  { %5770 = vmatprep.subr.bf16.mxu1 %v7551_v27  ;;  %5812 = vmatpush2.bf16.msra.mxu0 %v7561_v28  ;;  %v7591_v27 = vld [vmem:[#allocation12 + $0xa48] ss:$28 sps:$4 sm:$0xff]   ;;  %v7596_v28 = vld [vmem:[#allocation12 + $0xa14] ss:$28 sps:$4 sm:$0xff]  }
 0x322   :  { %5813 = vmatprep.subr.bf16.mxu0 %v7566_v12  ;;  %v7640_v12 = vld [vmem:[#allocation12 + $0xb28] ss:$28 sps:$4 sm:$0xff]  }
 0x324   :  { %5771 = vmatpush2.bf16.msra.mxu1 %v7549_v13  ;;  %v7648_v13 = vld [vmem:[#allocation12 + $0xaf4] ss:$28 sps:$4 sm:$0xff]  }
 0x325   :  { %5814 = vmatpush2.bf16.msra.mxu0 %v7564_v31  ;;  %5826 = vmatprep.subr.bf16.mxu1 %v7569_v34  ;;  %v7599_v31 = vld [vmem:[#allocation12 + $0x9dc] ss:$28 sps:$4 sm:$0xff]   ;;  %v7646_v34 = vld [vmem:[#allocation12 + $0xaf0] ss:$28 sps:$4 sm:$0xff]  }
 0x326   :  { %5869 = vmatprep.subr.bf16.mxu0 %v7618_v35  ;;  %v7654_v35 = vld [vmem:[#allocation12 + $0xabc] ss:$28 sps:$4 sm:$0xff]  }
 0x327   :  { %v2524_v46 = vpop.f32.mrf.mxu1  ;;  %v2567_v47 = vpop.f32.mrf.mxu0  ;;  %5773 = vmatmul.mubr.bf16.vlgmr.msra.gmra.mxu1 %v8491_v42 }
 0x328   :  { %5827 = vmatpush1.bf16.msra.mxu1 %v7567_v41  ;;  %v2568_v56 = vadd.f32 %v2567_v47, %v2524_v46  ;;  %v7602_v41 = vld [vmem:[#allocation12 + $0x9a4] ss:$28 sps:$4 sm:$0xff]   ;;  %v7605_v47 = vld [vmem:[#allocation12 + $0x96c] ss:$28 sps:$4 sm:$0xff]  }
 0x329   :  { %v2526_v50 = vpop.f32.mrf.mxu1  ;;  %v2569_v51 = vpop.f32.mrf.mxu0  ;;  %5828 = vmatprep.subr.bf16.mxu1 %v7572_v43  ;;  %v7652_v43 = vld [vmem:[#allocation12 + $0xab8] ss:$28 sps:$4 sm:$0xff]   ;;  %v7600_v46 = vld [vmem:[#allocation12 + $0x9a0] ss:$28 sps:$4 sm:$0xff]  }
 0x32a   :  { %v2570_v63 = vadd.f32 %v2569_v51, %v2526_v50  ;;  %v7603_v50 = vld [vmem:[#allocation12 + $0x968] ss:$28 sps:$4 sm:$0xff]   ;;  %v7609_v51 = vld [vmem:[#allocation12 + $0x934] ss:$28 sps:$4 sm:$0xff]  }
 0x32b   :  { %v2528_v54 = vpop.f32.mrf.mxu1  ;;  %v2571_v55 = vpop.f32.mrf.mxu0 }
 0x32c   :  { %v2572_v57 = vadd.f32 %v2571_v55, %v2528_v54  ;;  %5829 = vmatpush1.bf16.msra.mxu1 %v7570_v49  ;;  %v7666_v49 = vld [vmem:[#allocation12 + $0xdcc] ss:$28 sps:$4 sm:$0xff]   ;;  %v7612_v55 = vld [vmem:[#allocation12 + $0x8fc] ss:$28 sps:$4 sm:$0xff]  }
 0x32d   :  { %v2530_v59 = vpop.f32.mrf.mxu1  ;;  %v2573_v61 = vpop.f32.mrf.mxu0  ;;  %5830 = vmatprep.subr.bf16.mxu1 %v7575_v52  ;;  %v7664_v52 = vld [vmem:[#allocation12 + $0xdc8] ss:$28 sps:$4 sm:$0xff]   ;;  %v7607_v54 = vld [vmem:[#allocation12 + $0x930] ss:$28 sps:$4 sm:$0xff]  }
 0x32e   :  { %v2750_v0 = vpack.c.bf16 %v2572_v57, %v2568_v56  ;;  %v2574_v2 = vadd.f32 %v2573_v61, %v2530_v59  ;;  %v7670_v56 = vld [vmem:[#allocation12 + $0xd90] ss:$28 sps:$4 sm:$0xff]   ;;  %v2758_v57 = vcombine.high %v8457_v60, %v8457_v60  ;;  %v7615_v59 = vld [vmem:[#allocation12 + $0x8c4] ss:$28 sps:$4 sm:$0xff]   ;;  %v7676_v61 = vld [vmem:[#allocation12 + $0xd58] ss:$28 sps:$4 sm:$0xff]  }
 0x32f   :  { %v7690_v60 = vld [vmem:[#allocation12 + $0xcec] ss:$28 sps:$4 sm:$0xff]  }
 0x330   :  { %v2865_v4 = vadd.bf16 %v2827_v58, %v2750_v0  ;;  %v2751_v5 = vpack.c.bf16 %v2574_v2, %v2570_v63  ;;  %5831 = vmatpush1.bf16.msra.mxu1 %v7573_v10  ;;  %v7678_v58 = vld [vmem:[#allocation12 + $0xd5c] ss:$28 sps:$4 sm:$0xff]   ;;  %v7684_v63 = vld [vmem:[#allocation12 + $0xd24] ss:$28 sps:$4 sm:$0xff]   ;;  %v7621_v2 = vld [vmem:[#allocation12 + $0x194] ss:$28 sps:$4 sm:$0xff]  }
 0x331   :  { %5832 = vmatprep.subr.bf16.mxu1 %v7578_v62  ;;  %v7610_v10 = vld [vmem:[#allocation12 + $0x8f8] ss:$28 sps:$4 sm:$0xff]   ;;  %v2772_v62 = vrot.slane %v2758_v57, %v8408_v32  ;;  %v7613_v0 = vld [vmem:[#allocation12 + $0x8c0] ss:$28 sps:$4 sm:$0xff]  }
 0x332   :  { %v2866_v8 = vadd.bf16 %v2834_v3, %v2751_v5  ;;  %v2873_v9 = vmul.bf16 1045249613, %v2865_v4  ;;  %v7682_v3 = vld [vmem:[#allocation12 + $0xd20] ss:$28 sps:$4 sm:$0xff]  }
 0x333   :  { %v8508_v5 = vrot.slane %v2772_v62, %v8408_v32  ;;  %v7655_v57 = vld [vmem:[#allocation12 + $0x40] ss:$28 sps:$4 sm:$0xff]  }
 0x334   :  { %v2874_v11 = vmul.bf16 1045249613, %v2866_v8  ;;  %5833 = vmatpush1.bf16.msra.mxu1 %v7576_v6  ;;  %v8500_v18 = vmax.bf16 %v2873_v9, %v2865_v4  ;;  %v2774_v4 = vcombine.high %v2772_v62, %v2772_v62  ;;  %v7688_v6 = vld [vmem:[#allocation12 + $0xce8] ss:$28 sps:$4 sm:$0xff]   ;;  %v7696_v9 = vld [vmem:[#allocation12 + $0xcb4] ss:$28 sps:$4 sm:$0xff]  }
 0x335   :  { %5834 = vmatprep.subr.bf16.mxu1 %v7581_v7  ;;  %v7675_v62 = vld [vmem:[#allocation12 + $0x31c] ss:$28 sps:$4 sm:$0xff]  }
 0x336   :  { %v8498_v16 = vmax.bf16 %v2874_v11, %v2866_v8  ;;  %v8511_v8 = vrot.slane %v2774_v4, %v8408_v32  ;;  %v7685_v4 = vld [vmem:[#allocation12 + $0x2a8] ss:$28 sps:$4 sm:$0xff]  }
 0x338   :  { %5815 = vmatprep.mubr.bf16.mxu0 %v8498_v16  ;;  %5835 = vmatpush1.bf16.msra.mxu1 %v7579_v14 }
 0x339   :  { %5816 = vmatmul.mubr.bf16.vlgmr.msra.gmra.mxu0 %v8500_v18  ;;  %5836 = vmatprep.subr.bf16.mxu1 %v7584_v15  ;;  %v2836_v15 = vpack.i.b16 %v8508_v5, %v8508_v5 }
 0x33a   :  { %5870 = vmatpush1.bf16.msra.mxu0 %v7616_v17 }
 0x33b   :  { %5871 = vmatprep.subr.bf16.mxu0 %v7624_v19  ;;  %v7694_v19 = vld [vmem:[#allocation12 + $0xcb0] ss:$28 sps:$4 sm:$0xff]  }
 0x33c   :  { %5837 = vmatpush1.bf16.msra.mxu1 %v7582_v20 }
 0x33d   :  { %5838 = vmatprep.subr.bf16.mxu1 %v7587_v21  ;;  %v2843_v21 = vpack.i.b16 %v8511_v8, %v8511_v8 }
 0x33e   :  { %5872 = vmatpush1.bf16.msra.mxu0 %v7622_v39  ;;  %v7702_v39 = vld [vmem:[#allocation12 + $0xc7c] ss:$28 sps:$4 sm:$0xff]  }
 0x33f   :  { %5873 = vmatprep.subr.bf16.mxu0 %v7630_v1 }
 0x340   :  { %5839 = vmatpush1.bf16.msra.mxu1 %v7585_v22 }
 0x341   :  { %5840 = vmatprep.subr.bf16.mxu1 %v7590_v23  ;;  %v2841_v23 = vrot.slane %v2836_v15, %v8411_v33  ;;  %v7699_v15 = vld [vmem:[#allocation12 + $0x23c] ss:$28 sps:$4 sm:$0xff]  }
 0x342   :  { %5874 = vmatpush1.bf16.msra.mxu0 %v7628_v24 }
 0x343   :  { %5875 = vmatprep.subr.bf16.mxu0 %v7636_v37 }
 0x344   :  { %5841 = vmatpush1.bf16.msra.mxu1 %v7588_v25  ;;  %v7700_v25 = vld [vmem:[#allocation12 + $0xc78] ss:$28 sps:$4 sm:$0xff]  }
 0x345   :  { %5842 = vmatprep.subr.bf16.mxu1 %v7593_v38 }
 0x346   :  { %5876 = vmatpush1.bf16.msra.mxu0 %v7634_v36 }
 0x347   :  { %5877 = vmatprep.subr.bf16.mxu0 %v7642_v26 }
 0x348   :  { %5843 = vmatpush2.bf16.msra.mxu1 %v7591_v27  ;;  %v2848_v27 = vrot.slane %v2843_v21, %v8411_v33 }
 0x349   :  { %5844 = vmatprep.subr.bf16.mxu1 %v7596_v28  ;;  %v7708_v28 = vld [vmem:[#allocation12 + $0xc44] ss:$28 sps:$4 sm:$0xff]  }
 0x34a   :  { %5878 = vmatpush1.bf16.msra.mxu0 %v7640_v12 }
 0x34b   :  { %5879 = vmatprep.subr.bf16.mxu0 %v7648_v13 }
 0x34c   :  { %5845 = vmatpush2.bf16.msra.mxu1 %v7594_v29  ;;  %v7706_v29 = vld [vmem:[#allocation12 + $0xc40] ss:$28 sps:$4 sm:$0xff]  }
 0x34d   :  { %5846 = vmatprep.subr.bf16.mxu1 %v7599_v31 }
 0x34e   :  { %5880 = vmatpush1.bf16.msra.mxu0 %v7646_v34  ;;  %v7714_v34 = vld [vmem:[#allocation12 + $0x514] ss:$28 sps:$4 sm:$0xff]  }
 0x34f   :  { %5881 = vmatprep.subr.bf16.mxu0 %v7654_v35 }
 0x350   :  { %5847 = vmatpush2.bf16.msra.mxu1 %v7597_v40 }
 0x351   :  { %5848 = vmatprep.subr.bf16.mxu1 %v7602_v41 }
 0x352   :  { %5882 = vmatpush1.bf16.msra.mxu0 %v7652_v43  ;;  %v7619_v43 = vld [vmem:[#allocation12 + $0x190] ss:$28 sps:$4 sm:$0xff]  }
 0x353   :  { %5883 = vmatprep.subr.bf16.mxu0 %v7660_v44 }
 0x354   :  { %5849 = vmatpush2.bf16.msra.mxu1 %v7600_v46  ;;  %v7627_v46 = vld [vmem:[#allocation12 + $0x15c] ss:$28 sps:$4 sm:$0xff]  }
 0x355   :  { %5850 = vmatprep.subr.bf16.mxu1 %v7605_v47  ;;  %v7625_v47 = vld [vmem:[#allocation12 + $0x158] ss:$28 sps:$4 sm:$0xff]  }
 0x356   :  { %5884 = vmatpush1.bf16.msra.mxu0 %v7658_v48  ;;  %v7633_v48 = vld [vmem:[#allocation12 + $0x124] ss:$28 sps:$4 sm:$0xff]  }
 0x357   :  { %5885 = vmatprep.subr.bf16.mxu0 %v7666_v49  ;;  %v7631_v49 = vld [vmem:[#allocation12 + $0x120] ss:$28 sps:$4 sm:$0xff]  }
 0x358   :  { %5851 = vmatpush2.bf16.msra.mxu1 %v7603_v50  ;;  %v7639_v50 = vld [vmem:[#allocation12 + $0xec] ss:$28 sps:$4 sm:$0xff]  }
 0x359   :  { %5852 = vmatprep.subr.bf16.mxu1 %v7609_v51  ;;  %v7637_v51 = vld [vmem:[#allocation12 + $0xe8] ss:$28 sps:$4 sm:$0xff]  }
 0x35a   :  { %5886 = vmatpush2.bf16.msra.mxu0 %v7664_v52  ;;  %v7645_v52 = vld [vmem:[#allocation12 + $0xb4] ss:$28 sps:$4 sm:$0xff]  }
 0x35b   :  { %5887 = vmatprep.subr.bf16.mxu0 %v7672_v53  ;;  %v7643_v53 = vld [vmem:[#allocation12 + $0xb0] ss:$28 sps:$4 sm:$0xff]  }
 0x35c   :  { %5853 = vmatpush2.bf16.msra.mxu1 %v7607_v54  ;;  %v7651_v54 = vld [vmem:[#allocation12 + $0x7c] ss:$28 sps:$4 sm:$0xff]  }
 0x35d   :  { %5854 = vmatprep.subr.bf16.mxu1 %v7612_v55  ;;  %v7649_v55 = vld [vmem:[#allocation12 + $0x78] ss:$28 sps:$4 sm:$0xff]  }
 0x35e   :  { %5888 = vmatpush2.bf16.msra.mxu0 %v7670_v56  ;;  %v7657_v56 = vld [vmem:[#allocation12 + $0x44] ss:$28 sps:$4 sm:$0xff]  }
 0x35f   :  { %5889 = vmatprep.subr.bf16.mxu0 %v7678_v58  ;;  %v7663_v58 = vld [vmem:[#allocation12 + $0xc] ss:$28 sps:$4 sm:$0xff]  }
 0x360   :  { %5855 = vmatpush2.bf16.msra.mxu1 %v7610_v10  ;;  %v7661_v10 = vld [vmem:[#allocation12 + $0x8] ss:$28 sps:$4 sm:$0xff]  }
 0x361   :  { %5856 = vmatprep.subr.bf16.mxu1 %v7615_v59  ;;  %v7669_v59 = vld [vmem:[#allocation12 + $0x354] ss:$28 sps:$4 sm:$0xff]  }
 0x362   :  { %5890 = vmatpush2.bf16.msra.mxu0 %v7676_v61  ;;  %v7667_v61 = vld [vmem:[#allocation12 + $0x350] ss:$28 sps:$4 sm:$0xff]  }
 0x363   :  { %5891 = vmatprep.subr.bf16.mxu0 %v7684_v63  ;;  %v7673_v63 = vld [vmem:[#allocation12 + $0x318] ss:$28 sps:$4 sm:$0xff]  }
 0x364   :  { %5857 = vmatpush2.bf16.msra.mxu1 %v7613_v0  ;;  %v7681_v0 = vld [vmem:[#allocation12 + $0x2e4] ss:$28 sps:$4 sm:$0xff]  }
 0x365   :  { %5912 = vmatprep.subr.bf16.mxu1 %v7621_v2  ;;  %v7679_v2 = vld [vmem:[#allocation12 + $0x2e0] ss:$28 sps:$4 sm:$0xff]  }
 0x366   :  { %5892 = vmatpush2.bf16.msra.mxu0 %v7682_v3  ;;  %v7687_v3 = vld [vmem:[#allocation12 + $0x2ac] ss:$28 sps:$4 sm:$0xff]  }
 0x367   :  { %v2610_v7 = vpop.f32.mrf.mxu1  ;;  %5893 = vmatprep.subr.bf16.mxu0 %v7690_v60  ;;  %v7693_v60 = vld [vmem:[#allocation12 + $0x274] ss:$28 sps:$4 sm:$0xff]  }
 0x368   :  { %v2653_v11 = vpop.f32.mrf.mxu0 }
 0x369   :  { %v2612_v14 = vpop.f32.mrf.mxu1  ;;  %v2654_v22 = vadd.f32 %v2653_v11, %v2610_v7  ;;  %v2806_v11 = vcombine.high %v8511_v8, %v8511_v8 }
 0x36a   :  { %v2655_v17 = vpop.f32.mrf.mxu0  ;;  %5894 = vmatpush2.bf16.msra.mxu0 %v7688_v6  ;;  %v2804_v6 = vcombine.high %v8508_v5, %v8508_v5 }
 0x36b   :  { %v2614_v20 = vpop.f32.mrf.mxu1  ;;  %5895 = vmatprep.subr.bf16.mxu0 %v7696_v9  ;;  %v2656_v38 = vadd.f32 %v2655_v17, %v2612_v14  ;;  %v7691_v9 = vld [vmem:[#allocation12 + $0x270] ss:$28 sps:$4 sm:$0xff]  }
 0x36c   :  { %v2657_v1 = vpop.f32.mrf.mxu0 }
 0x36d   :  { %v2658_v32 = vadd.f32 %v2657_v1, %v2614_v20  ;;  %v2616_v24 = vpop.f32.mrf.mxu1  ;;  %v2857_v1 = vpack.i.b16 %v2806_v11, %v2806_v11  ;;  %v7751_v11 = vld [vmem:[#allocation12 + $0x740] ss:$28 sps:$4 sm:$0xff]  }
 0x36e   :  { %v2659_v37 = vpop.f32.mrf.mxu0  ;;  %5896 = vmatpush2.bf16.msra.mxu0 %v7694_v19  ;;  %v2850_v19 = vpack.i.b16 %v2804_v6, %v2804_v6  ;;  %v7750_v6 = vld [vmem:[#allocation12 + $0x3c4] ss:$28 sps:$4 sm:$0xff]  }
 0x36f   :  { %v2752_v36 = vpack.c.bf16 %v2658_v32, %v2654_v22  ;;  %v2660_v26 = vadd.f32 %v2659_v37, %v2616_v24  ;;  %5897 = vmatprep.subr.bf16.mxu0 %v7702_v39  ;;  %v7697_v39 = vld [vmem:[#allocation12 + $0x238] ss:$28 sps:$4 sm:$0xff]   ;;  %v7705_v32 = vld [vmem:[#allocation12 + $0x204] ss:$28 sps:$4 sm:$0xff]  }
 0x370   :  { %v2855_v24 = vrot.slane %v2850_v19, %v8411_v33  ;;  %v7757_v19 = vld [vmem:[#allocation12 + $0x708] ss:$28 sps:$4 sm:$0xff]  }
 0x371   :  { %v2867_v12 = vadd.bf16 %v2841_v23, %v2752_v36  ;;  %v2753_v13 = vpack.c.bf16 %v2660_v26, %v2656_v38  ;;  %v2862_v26 = vrot.slane %v2857_v1, %v8411_v33  ;;  %v7763_v1 = vld [vmem:[#allocation12 + $0xa50] ss:$28 sps:$4 sm:$0xff]  }
 0x372   :  { %5898 = vmatpush2.bf16.msra.mxu0 %v7700_v25 }
 0x373   :  { %v2868_v31 = vadd.bf16 %v2848_v27, %v2753_v13  ;;  %5899 = vmatprep.subr.bf16.mxu0 %v7708_v28  ;;  %v2875_v35 = vmul.bf16 1045249613, %v2867_v12  ;;  %v7703_v27 = vld [vmem:[#allocation12 + $0x200] ss:$28 sps:$4 sm:$0xff]   ;;  %v7711_v28 = vld [vmem:[#allocation12 + $0x1cc] ss:$28 sps:$4 sm:$0xff]  }
 0x375   :  { %v2876_v40 = vmul.bf16 1045249613, %v2868_v31  ;;  %v8521_v44 = vmax.bf16 %v2875_v35, %v2867_v12  ;;  %v7717_v35 = vld [vmem:[#allocation12 + $0x894] ss:$28 sps:$4 sm:$0xff]  }
 0x376   :  { %5900 = vmatpush2.bf16.msra.mxu0 %v7706_v29 }
 0x377   :  { %v8519_v41 = vmax.bf16 %v2876_v40, %v2868_v31  ;;  %5955 = vmatprep.subr.bf16.mxu0 %v7714_v34  ;;  %v7709_v31 = vld [vmem:[#allocation12 + $0x1c8] ss:$28 sps:$4 sm:$0xff]  }
 0x379   :  { %5858 = vmatprep.mubr.bf16.mxu1 %v8519_v41 }
 0x37a   :  { %5859 = vmatmul.mubr.bf16.vlgmr.msra.gmra.mxu1 %v8521_v44 }
 0x37b   :  { %5913 = vmatpush1.bf16.msra.mxu1 %v7619_v43  ;;  %5944 = vmatprep.mubr.bf16.mxu1 %v8481_v45 }
 0x37c   :  { %5914 = vmatprep.subr.bf16.mxu1 %v7627_v46  ;;  %v7712_v46 = vld [vmem:[#allocation12 + $0x510] ss:$28 sps:$4 sm:$0xff]  }
 0x37f   :  { %5915 = vmatpush1.bf16.msra.mxu1 %v7625_v47  ;;  %v7715_v47 = vld [vmem:[#allocation12 + $0x890] ss:$28 sps:$4 sm:$0xff]  }
 0x380   :  { %5916 = vmatprep.subr.bf16.mxu1 %v7633_v48 }
 0x383   :  { %5917 = vmatpush1.bf16.msra.mxu1 %v7631_v49  ;;  %v7720_v49 = vld [vmem:[#allocation12 + $0x4dc] ss:$28 sps:$4 sm:$0xff]  }
 0x384   :  { %5918 = vmatprep.subr.bf16.mxu1 %v7639_v50  ;;  %v7723_v50 = vld [vmem:[#allocation12 + $0x85c] ss:$28 sps:$4 sm:$0xff]  }
 0x387   :  { %5919 = vmatpush1.bf16.msra.mxu1 %v7637_v51  ;;  %v7718_v51 = vld [vmem:[#allocation12 + $0x4d8] ss:$28 sps:$4 sm:$0xff]  }
 0x388   :  { %5920 = vmatprep.subr.bf16.mxu1 %v7645_v52  ;;  %v7721_v52 = vld [vmem:[#allocation12 + $0x858] ss:$28 sps:$4 sm:$0xff]  }
 0x38b   :  { %5921 = vmatpush1.bf16.msra.mxu1 %v7643_v53  ;;  %v7726_v53 = vld [vmem:[#allocation12 + $0x4a4] ss:$28 sps:$4 sm:$0xff]  }
 0x38c   :  { %5922 = vmatprep.subr.bf16.mxu1 %v7651_v54  ;;  %v7729_v54 = vld [vmem:[#allocation12 + $0x824] ss:$28 sps:$4 sm:$0xff]  }
 0x38f   :  { %5923 = vmatpush1.bf16.msra.mxu1 %v7649_v55  ;;  %v7724_v55 = vld [vmem:[#allocation12 + $0x4a0] ss:$28 sps:$4 sm:$0xff]  }
 0x390   :  { %5924 = vmatprep.subr.bf16.mxu1 %v7657_v56  ;;  %v7727_v56 = vld [vmem:[#allocation12 + $0x820] ss:$28 sps:$4 sm:$0xff]  }
 0x393   :  { %5925 = vmatpush1.bf16.msra.mxu1 %v7655_v57  ;;  %v7732_v57 = vld [vmem:[#allocation12 + $0x46c] ss:$28 sps:$4 sm:$0xff]  }
 0x394   :  { %5926 = vmatprep.subr.bf16.mxu1 %v7663_v58  ;;  %v7735_v58 = vld [vmem:[#allocation12 + $0x7ec] ss:$28 sps:$4 sm:$0xff]  }
 0x397   :  { %5927 = vmatpush1.bf16.msra.mxu1 %v7661_v10  ;;  %v7730_v10 = vld [vmem:[#allocation12 + $0x468] ss:$28 sps:$4 sm:$0xff]  }
 0x398   :  { %5928 = vmatprep.subr.bf16.mxu1 %v7669_v59  ;;  %v7733_v59 = vld [vmem:[#allocation12 + $0x7e8] ss:$28 sps:$4 sm:$0xff]  }
 0x39b   :  { %5929 = vmatpush2.bf16.msra.mxu1 %v7667_v61  ;;  %v7738_v61 = vld [vmem:[#allocation12 + $0x434] ss:$28 sps:$4 sm:$0xff]  }
 0x39c   :  { %5930 = vmatprep.subr.bf16.mxu1 %v7675_v62  ;;  %v7741_v62 = vld [vmem:[#allocation12 + $0x7b4] ss:$28 sps:$4 sm:$0xff]  }
 0x39f   :  { %5931 = vmatpush2.bf16.msra.mxu1 %v7673_v63  ;;  %v7736_v63 = vld [vmem:[#allocation12 + $0x430] ss:$28 sps:$4 sm:$0xff]  }
 0x3a0   :  { %5932 = vmatprep.subr.bf16.mxu1 %v7681_v0  ;;  %v7739_v0 = vld [vmem:[#allocation12 + $0x7b0] ss:$28 sps:$4 sm:$0xff]  }
 0x3a3   :  { %5933 = vmatpush2.bf16.msra.mxu1 %v7679_v2  ;;  %v7744_v2 = vld [vmem:[#allocation12 + $0x3fc] ss:$28 sps:$4 sm:$0xff]  }
 0x3a4   :  { %5934 = vmatprep.subr.bf16.mxu1 %v7687_v3  ;;  %v7747_v3 = vld [vmem:[#allocation12 + $0x77c] ss:$28 sps:$4 sm:$0xff]  }
 0x3a7   :  { %5935 = vmatpush2.bf16.msra.mxu1 %v7685_v4  ;;  %v2696_v7 = vpop.f32.mrf.mxu1  ;;  %v7742_v4 = vld [vmem:[#allocation12 + $0x3f8] ss:$28 sps:$4 sm:$0xff]  }
 0x3a8   :  { %v2739_v14 = vpop.f32.mrf.mxu0  ;;  %5936 = vmatprep.subr.bf16.mxu1 %v7693_v60  ;;  %v7745_v60 = vld [vmem:[#allocation12 + $0x778] ss:$28 sps:$4 sm:$0xff]  }
 0x3a9   :  { %v2698_v17 = vpop.f32.mrf.mxu1  ;;  %v2740_v5 = vadd.f32 %v2739_v14, %v2696_v7  ;;  %v7753_v7 = vld [vmem:[#allocation12 + $0x744] ss:$28 sps:$4 sm:$0xff]   ;;  %v7756_v14 = vld [vmem:[#allocation12 + $0x38c] ss:$28 sps:$4 sm:$0xff]  }
 0x3aa   :  { %v2741_v20 = vpop.f32.mrf.mxu0 }
 0x3ab   :  { %5937 = vmatpush2.bf16.msra.mxu1 %v7691_v9  ;;  %v2700_v21 = vpop.f32.mrf.mxu1  ;;  %v2742_v8 = vadd.f32 %v2741_v20, %v2698_v17  ;;  %v7748_v9 = vld [vmem:[#allocation12 + $0x3c0] ss:$28 sps:$4 sm:$0xff]   ;;  %v7754_v17 = vld [vmem:[#allocation12 + $0x388] ss:$28 sps:$4 sm:$0xff]   ;;  %v7762_v20 = vld [vmem:[#allocation12 + $0x6d4] ss:$28 sps:$4 sm:$0xff]  }
 0x3ac   :  { %v2743_v22 = vpop.f32.mrf.mxu0  ;;  %5938 = vmatprep.subr.bf16.mxu1 %v7699_v15  ;;  %v7759_v15 = vld [vmem:[#allocation12 + $0x70c] ss:$28 sps:$4 sm:$0xff]  }
 0x3ad   :  { %v2744_v23 = vadd.f32 %v2743_v22, %v2700_v21  ;;  %v2702_v37 = vpop.f32.mrf.mxu1  ;;  %v7765_v21 = vld [vmem:[#allocation12 + $0xa54] ss:$28 sps:$4 sm:$0xff]   ;;  %v7768_v22 = vld [vmem:[#allocation12 + $0x69c] ss:$28 sps:$4 sm:$0xff]  }
 0x3ae   :  { %v2745_v25 = vpop.f32.mrf.mxu0 }
 0x3af   :  { %v2754_v38 = vpack.c.bf16 %v2744_v23, %v2740_v5  ;;  %v2746_v36 = vadd.f32 %v2745_v25, %v2702_v37  ;;  %5939 = vmatpush2.bf16.msra.mxu1 %v7697_v39  ;;  %v7760_v39 = vld [vmem:[#allocation12 + $0x6d0] ss:$28 sps:$4 sm:$0xff]   ;;  %v7766_v5 = vld [vmem:[#allocation12 + $0x698] ss:$28 sps:$4 sm:$0xff]   ;;  %v7777_v37 = vld [vmem:[#allocation12 + $0x9e4] ss:$28 sps:$4 sm:$0xff]  }
 0x3b0   :  { %5940 = vmatprep.subr.bf16.mxu1 %v7705_v32  ;;  %v7771_v32 = vld [vmem:[#allocation12 + $0xa1c] ss:$28 sps:$4 sm:$0xff]  }
 0x3b1   :  { %v2869_v12 = vadd.bf16 %v2855_v24, %v2754_v38  ;;  %v2755_v13 = vpack.c.bf16 %v2746_v36, %v2742_v8  ;;  %v7769_v23 = vld [vmem:[#allocation12 + $0xa18] ss:$28 sps:$4 sm:$0xff]   ;;  %v7774_v24 = vld [vmem:[#allocation12 + $0x664] ss:$28 sps:$4 sm:$0xff]   ;;  %v7780_v38 = vld [vmem:[#allocation12 + $0x62c] ss:$28 sps:$4 sm:$0xff]  }
 0x3b2   :  { %v7772_v25 = vld [vmem:[#allocation12 + $0x660] ss:$28 sps:$4 sm:$0xff]   ;;  %v7783_v36 = vld [vmem:[#allocation12 + $0x9ac] ss:$28 sps:$4 sm:$0xff]  }
 0x3b3   :  { %v2870_v29 = vadd.bf16 %v2862_v26, %v2755_v13  ;;  %5941 = vmatpush2.bf16.msra.mxu1 %v7703_v27  ;;  %v2877_v34 = vmul.bf16 1045249613, %v2869_v12  ;;  %v7775_v8 = vld [vmem:[#allocation12 + $0x9e0] ss:$28 sps:$4 sm:$0xff]   ;;  %v7778_v26 = vld [vmem:[#allocation12 + $0x628] ss:$28 sps:$4 sm:$0xff]  }
 0x3b4   :  { %5942 = vmatprep.subr.bf16.mxu1 %v7711_v28  ;;  %v7781_v27 = vld [vmem:[#allocation12 + $0x9a8] ss:$28 sps:$4 sm:$0xff]   ;;  %v7786_v28 = vld [vmem:[#allocation12 + $0x5f4] ss:$28 sps:$4 sm:$0xff]  }
 0x3b5   :  { %v2878_v40 = vmul.bf16 1045249613, %v2870_v29  ;;  %v8534_v48 = vmax.bf16 %v2877_v34, %v2869_v12  ;;  %v7789_v12 = vld [vmem:[#allocation12 + $0x974] ss:$28 sps:$4 sm:$0xff]   ;;  %v7795_v34 = vld [vmem:[#allocation12 + $0x93c] ss:$28 sps:$4 sm:$0xff]  }
 0x3b6   :  { %v7784_v13 = vld [vmem:[#allocation12 + $0x5f0] ss:$28 sps:$4 sm:$0xff]  }
 0x3b7   :  { %v8532_v43 = vmax.bf16 %v2878_v40, %v2870_v29  ;;  %5943 = vmatpush2.bf16.msra.mxu1 %v7709_v31  ;;  %v7787_v29 = vld [vmem:[#allocation12 + $0x970] ss:$28 sps:$4 sm:$0xff]   ;;  %v7792_v31 = vld [vmem:[#allocation12 + $0x5bc] ss:$28 sps:$4 sm:$0xff]  }
 0x3b8   :  { %5998 = vmatprep.subr.bf16.mxu1 %v7717_v35  ;;  %v7790_v35 = vld [vmem:[#allocation12 + $0x5b8] ss:$28 sps:$4 sm:$0xff]  }
 0x3b9   :  { %5901 = vmatprep.mubr.bf16.mxu0 %v8532_v43  ;;  %v7793_v40 = vld [vmem:[#allocation12 + $0x938] ss:$28 sps:$4 sm:$0xff]  }
 0x3ba   :  { %5945 = vmatmul.mubr.bf16.vlgmr.msra.gmra.mxu1 %v8491_v42  ;;  %5902 = vmatmul.mubr.bf16.vlgmr.msra.gmra.mxu0 %v8534_v48 }
 0x3bb   :  { %5956 = vmatpush1.bf16.msra.mxu0 %v7712_v46  ;;  %5999 = vmatpush1.bf16.msra.mxu1 %v7715_v47  ;;  %v7798_v46 = vld [vmem:[#allocation12 + $0x584] ss:$28 sps:$4 sm:$0xff]  }
 0x3bc   :  { %6030 = vmatprep.mubr.bf16.mxu1 %v8519_v41  ;;  %5987 = vmatprep.mubr.bf16.mxu0 %v8498_v16  ;;  %v7801_v47 = vld [vmem:[#allocation12 + $0x904] ss:$28 sps:$4 sm:$0xff]  }
 0x3bd   :  { %5957 = vmatprep.subr.bf16.mxu0 %v7720_v49  ;;  %6000 = vmatprep.subr.bf16.mxu1 %v7723_v50  ;;  %v7796_v49 = vld [vmem:[#allocation12 + $0x580] ss:$28 sps:$4 sm:$0xff]  }
 0x3be   :  { %v7799_v50 = vld [vmem:[#allocation12 + $0x900] ss:$28 sps:$4 sm:$0xff]  }
 0x3bf   :  { %5958 = vmatpush1.bf16.msra.mxu0 %v7718_v51  ;;  %6001 = vmatpush1.bf16.msra.mxu1 %v7721_v52  ;;  %v7804_v51 = vld [vmem:[#allocation12 + $0x54c] ss:$28 sps:$4 sm:$0xff]  }
 0x3c0   :  { %5959 = vmatprep.subr.bf16.mxu0 %v7726_v53  ;;  %6002 = vmatprep.subr.bf16.mxu1 %v7729_v54  ;;  %v7807_v52 = vld [vmem:[#allocation12 + $0x8cc] ss:$28 sps:$4 sm:$0xff]  }
 0x3c1   :  { %v7802_v53 = vld [vmem:[#allocation12 + $0x548] ss:$28 sps:$4 sm:$0xff]  }
 0x3c2   :  { %v7805_v54 = vld [vmem:[#allocation12 + $0x8c8] ss:$28 sps:$4 sm:$0xff]  }
 0x3c3   :  { %5960 = vmatpush1.bf16.msra.mxu0 %v7724_v55  ;;  %6003 = vmatpush1.bf16.msra.mxu1 %v7727_v56  ;;  %v7810_v55 = vld [vmem:[#allocation12 + $0xc14] ss:$28 sps:$4 sm:$0xff]   ;;  %v7813_v56 = vld [vmem:[#allocation12 + $0x19c] ss:$28 sps:$4 sm:$0xff]  }
 0x3c4   :  { %5961 = vmatprep.subr.bf16.mxu0 %v7732_v57  ;;  %6004 = vmatprep.subr.bf16.mxu1 %v7735_v58  ;;  %v7808_v57 = vld [vmem:[#allocation12 + $0xc10] ss:$28 sps:$4 sm:$0xff]   ;;  %v7811_v58 = vld [vmem:[#allocation12 + $0x198] ss:$28 sps:$4 sm:$0xff]  }
 0x3c7   :  { %5962 = vmatpush1.bf16.msra.mxu0 %v7730_v10  ;;  %6005 = vmatpush1.bf16.msra.mxu1 %v7733_v59  ;;  %v7816_v10 = vld [vmem:[#allocation12 + $0xbdc] ss:$28 sps:$4 sm:$0xff]   ;;  %v7819_v59 = vld [vmem:[#allocation12 + $0x164] ss:$28 sps:$4 sm:$0xff]  }
 0x3c8   :  { %5963 = vmatprep.subr.bf16.mxu0 %v7738_v61  ;;  %6006 = vmatprep.subr.bf16.mxu1 %v7741_v62  ;;  %v7814_v61 = vld [vmem:[#allocation12 + $0xbd8] ss:$28 sps:$4 sm:$0xff]   ;;  %v7817_v62 = vld [vmem:[#allocation12 + $0x160] ss:$28 sps:$4 sm:$0xff]  }
 0x3cb   :  { %5964 = vmatpush1.bf16.msra.mxu0 %v7736_v63  ;;  %6007 = vmatpush1.bf16.msra.mxu1 %v7739_v0  ;;  %v7822_v63 = vld [vmem:[#allocation12 + $0xba4] ss:$28 sps:$4 sm:$0xff]   ;;  %v7825_v0 = vld [vmem:[#allocation12 + $0x12c] ss:$28 sps:$4 sm:$0xff]  }
 0x3cc   :  { %5965 = vmatprep.subr.bf16.mxu0 %v7744_v2  ;;  %6008 = vmatprep.subr.bf16.mxu1 %v7747_v3  ;;  %v7820_v2 = vld [vmem:[#allocation12 + $0xba0] ss:$28 sps:$4 sm:$0xff]   ;;  %v7823_v3 = vld [vmem:[#allocation12 + $0x128] ss:$28 sps:$4 sm:$0xff]  }
 0x3cf   :  { %5966 = vmatpush1.bf16.msra.mxu0 %v7742_v4  ;;  %6009 = vmatpush1.bf16.msra.mxu1 %v7745_v60  ;;  %v7828_v4 = vld [vmem:[#allocation12 + $0xb6c] ss:$28 sps:$4 sm:$0xff]   ;;  %v7831_v60 = vld [vmem:[#allocation12 + $0xf4] ss:$28 sps:$4 sm:$0xff]  }
 0x3d0   :  { %5967 = vmatprep.subr.bf16.mxu0 %v7750_v6  ;;  %6010 = vmatprep.subr.bf16.mxu1 %v7753_v7  ;;  %v7826_v6 = vld [vmem:[#allocation12 + $0xb68] ss:$28 sps:$4 sm:$0xff]   ;;  %v7829_v7 = vld [vmem:[#allocation12 + $0xf0] ss:$28 sps:$4 sm:$0xff]  }
 0x3d3   :  { %5968 = vmatpush1.bf16.msra.mxu0 %v7748_v9  ;;  %6011 = vmatpush1.bf16.msra.mxu1 %v7751_v11  ;;  %v7834_v9 = vld [vmem:[#allocation12 + $0xb34] ss:$28 sps:$4 sm:$0xff]   ;;  %v7837_v11 = vld [vmem:[#allocation12 + $0xbc] ss:$28 sps:$4 sm:$0xff]  }
 0x3d4   :  { %5969 = vmatprep.subr.bf16.mxu0 %v7756_v14  ;;  %6012 = vmatprep.subr.bf16.mxu1 %v7759_v15  ;;  %v7832_v14 = vld [vmem:[#allocation12 + $0xb30] ss:$28 sps:$4 sm:$0xff]   ;;  %v7835_v15 = vld [vmem:[#allocation12 + $0xb8] ss:$28 sps:$4 sm:$0xff]  }
 0x3d7   :  { %5970 = vmatpush1.bf16.msra.mxu0 %v7754_v17  ;;  %6013 = vmatpush1.bf16.msra.mxu1 %v7757_v19  ;;  %v7840_v17 = vld [vmem:[#allocation12 + $0xafc] ss:$28 sps:$4 sm:$0xff]   ;;  %v7843_v19 = vld [vmem:[#allocation12 + $0x84] ss:$28 sps:$4 sm:$0xff]  }
 0x3d8   :  { %5971 = vmatprep.subr.bf16.mxu0 %v7762_v20  ;;  %6014 = vmatprep.subr.bf16.mxu1 %v7765_v21  ;;  %v7838_v20 = vld [vmem:[#allocation12 + $0xaf8] ss:$28 sps:$4 sm:$0xff]   ;;  %v7841_v21 = vld [vmem:[#allocation12 + $0x80] ss:$28 sps:$4 sm:$0xff]  }
 0x3db   :  { %5972 = vmatpush2.bf16.msra.mxu0 %v7760_v39  ;;  %6015 = vmatpush2.bf16.msra.mxu1 %v7763_v1  ;;  %v7846_v39 = vld [vmem:[#allocation12 + $0xac4] ss:$28 sps:$4 sm:$0xff]   ;;  %v7849_v1 = vld [vmem:[#allocation12 + $0x4c] ss:$28 sps:$4 sm:$0xff]  }
 0x3dc   :  { %5973 = vmatprep.subr.bf16.mxu0 %v7768_v22  ;;  %6016 = vmatprep.subr.bf16.mxu1 %v7771_v32  ;;  %v7844_v22 = vld [vmem:[#allocation12 + $0xac0] ss:$28 sps:$4 sm:$0xff]   ;;  %v7847_v32 = vld [vmem:[#allocation12 + $0x48] ss:$28 sps:$4 sm:$0xff]  }
 0x3df   :  { %5974 = vmatpush2.bf16.msra.mxu0 %v7766_v5  ;;  %6017 = vmatpush2.bf16.msra.mxu1 %v7769_v23  ;;  %v7852_v5 = vld [vmem:[#allocation12 + $0xa8c] ss:$28 sps:$4 sm:$0xff]   ;;  %v7855_v23 = vld [vmem:[#allocation12 + $0x14] ss:$28 sps:$4 sm:$0xff]  }
 0x3e0   :  { %5975 = vmatprep.subr.bf16.mxu0 %v7774_v24  ;;  %6018 = vmatprep.subr.bf16.mxu1 %v7777_v37  ;;  %v7850_v24 = vld [vmem:[#allocation12 + $0xa88] ss:$28 sps:$4 sm:$0xff]   ;;  %v7853_v37 = vld [vmem:[#allocation12 + $0x10] ss:$28 sps:$4 sm:$0xff]  }
 0x3e3   :  { %5976 = vmatpush2.bf16.msra.mxu0 %v7772_v25  ;;  %6019 = vmatpush2.bf16.msra.mxu1 %v7775_v8  ;;  %v7858_v25 = vld [vmem:[#allocation12 + $0xdd4] ss:$28 sps:$4 sm:$0xff]   ;;  %v7861_v8 = vld [vmem:[#allocation12 + $0x35c] ss:$28 sps:$4 sm:$0xff]  }
 0x3e4   :  { %5977 = vmatprep.subr.bf16.mxu0 %v7780_v38  ;;  %6020 = vmatprep.subr.bf16.mxu1 %v7783_v36  ;;  %v7856_v38 = vld [vmem:[#allocation12 + $0xdd0] ss:$28 sps:$4 sm:$0xff]   ;;  %v7859_v36 = vld [vmem:[#allocation12 + $0x358] ss:$28 sps:$4 sm:$0xff]  }
 0x3e7   :  { %5978 = vmatpush2.bf16.msra.mxu0 %v7778_v26  ;;  %6021 = vmatpush2.bf16.msra.mxu1 %v7781_v27  ;;  %v7864_v26 = vld [vmem:[#allocation12 + $0xd9c] ss:$28 sps:$4 sm:$0xff]   ;;  %v7867_v27 = vld [vmem:[#allocation12 + $0x324] ss:$28 sps:$4 sm:$0xff]  }
 0x3e8   :  { %5979 = vmatprep.subr.bf16.mxu0 %v7786_v28  ;;  %6022 = vmatprep.subr.bf16.mxu1 %v7789_v12  ;;  %v7862_v28 = vld [vmem:[#allocation12 + $0xd98] ss:$28 sps:$4 sm:$0xff]   ;;  %v7865_v12 = vld [vmem:[#allocation12 + $0x320] ss:$28 sps:$4 sm:$0xff]  }
 0x3eb   :  { %5980 = vmatpush2.bf16.msra.mxu0 %v7784_v13  ;;  %6023 = vmatpush2.bf16.msra.mxu1 %v7787_v29  ;;  %v7870_v13 = vld [vmem:[#allocation12 + $0xd64] ss:$28 sps:$4 sm:$0xff]   ;;  %v7873_v29 = vld [vmem:[#allocation12 + $0x2ec] ss:$28 sps:$4 sm:$0xff]  }
 0x3ec   :  { %5981 = vmatprep.subr.bf16.mxu0 %v7792_v31  ;;  %6024 = vmatprep.subr.bf16.mxu1 %v7795_v34  ;;  %v7868_v31 = vld [vmem:[#allocation12 + $0xd60] ss:$28 sps:$4 sm:$0xff]   ;;  %v7871_v34 = vld [vmem:[#allocation12 + $0x2e8] ss:$28 sps:$4 sm:$0xff]  }
 0x3ef   :  { %5982 = vmatpush2.bf16.msra.mxu0 %v7790_v35  ;;  %6025 = vmatpush2.bf16.msra.mxu1 %v7793_v40  ;;  %v7876_v35 = vld [vmem:[#allocation12 + $0xd2c] ss:$28 sps:$4 sm:$0xff]   ;;  %v7879_v40 = vld [vmem:[#allocation12 + $0x2b4] ss:$28 sps:$4 sm:$0xff]  }
 0x3f0   :  { %5983 = vmatprep.subr.bf16.mxu0 %v7798_v46  ;;  %6026 = vmatprep.subr.bf16.mxu1 %v7801_v47  ;;  %v7874_v46 = vld [vmem:[#allocation12 + $0xd28] ss:$28 sps:$4 sm:$0xff]   ;;  %v7877_v47 = vld [vmem:[#allocation12 + $0x2b0] ss:$28 sps:$4 sm:$0xff]  }
 0x3f3   :  { %5984 = vmatpush2.bf16.msra.mxu0 %v7796_v49  ;;  %6027 = vmatpush2.bf16.msra.mxu1 %v7799_v50  ;;  %v7882_v49 = vld [vmem:[#allocation12 + $0xcf4] ss:$28 sps:$4 sm:$0xff]   ;;  %v7885_v50 = vld [vmem:[#allocation12 + $0x27c] ss:$28 sps:$4 sm:$0xff]  }
 0x3f4   :  { %5985 = vmatprep.subr.bf16.mxu0 %v7804_v51  ;;  %6028 = vmatprep.subr.bf16.mxu1 %v7807_v52  ;;  %v7880_v51 = vld [vmem:[#allocation12 + $0xcf0] ss:$28 sps:$4 sm:$0xff]   ;;  %v7883_v52 = vld [vmem:[#allocation12 + $0x278] ss:$28 sps:$4 sm:$0xff]  }
 0x3f7   :  { %5986 = vmatpush2.bf16.msra.mxu0 %v7802_v53  ;;  %6029 = vmatpush2.bf16.msra.mxu1 %v7805_v54  ;;  %v7888_v53 = vld [vmem:[#allocation12 + $0xcbc] ss:$28 sps:$4 sm:$0xff]   ;;  %v7891_v54 = vld [vmem:[#allocation12 + $0x244] ss:$28 sps:$4 sm:$0xff]  }
 0x3f8   :  { %6041 = vmatprep.subr.bf16.mxu0 %v7810_v55  ;;  %6084 = vmatprep.subr.bf16.mxu1 %v7813_v56  ;;  %v7886_v55 = vld [vmem:[#allocation12 + $0xcb8] ss:$28 sps:$4 sm:$0xff]   ;;  %v7889_v56 = vld [vmem:[#allocation12 + $0x240] ss:$28 sps:$4 sm:$0xff]  }
 0x3fa   :  { %5988 = vmatmul.mubr.bf16.vlgmr.msra.gmra.mxu0 %v8500_v18  ;;  %6031 = vmatmul.mubr.bf16.vlgmr.msra.gmra.mxu1 %v8521_v44 }
 0x3fb   :  { %6042 = vmatpush1.bf16.msra.mxu0 %v7808_v57  ;;  %6073 = vmatprep.mubr.bf16.mxu0 %v8532_v43  ;;  %v7894_v57 = vld [vmem:[#allocation12 + $0xc84] ss:$28 sps:$4 sm:$0xff]  }
 0x3fc   :  { %6085 = vmatpush1.bf16.msra.mxu1 %v7811_v58  ;;  %6116 = vmatprep.mubr.bf16.mxu1 %v8481_v45  ;;  %v7897_v58 = vld [vmem:[#allocation12 + $0x20c] ss:$28 sps:$4 sm:$0xff]  }
 0x3fd   :  { %6043 = vmatprep.subr.bf16.mxu0 %v7816_v10  ;;  %6086 = vmatprep.subr.bf16.mxu1 %v7819_v59  ;;  %v7892_v10 = vld [vmem:[#allocation12 + $0xc80] ss:$28 sps:$4 sm:$0xff]   ;;  %v7895_v59 = vld [vmem:[#allocation12 + $0x208] ss:$28 sps:$4 sm:$0xff]  }
 0x3ff   :  { %6044 = vmatpush1.bf16.msra.mxu0 %v7814_v61  ;;  %v7900_v61 = vld [vmem:[#allocation12 + $0xc4c] ss:$28 sps:$4 sm:$0xff]  }
 0x400   :  { %6087 = vmatpush1.bf16.msra.mxu1 %v7817_v62  ;;  %6045 = vmatprep.subr.bf16.mxu0 %v7822_v63  ;;  %v7903_v62 = vld [vmem:[#allocation12 + $0x1d4] ss:$28 sps:$4 sm:$0xff]   ;;  %v7898_v63 = vld [vmem:[#allocation12 + $0xc48] ss:$28 sps:$4 sm:$0xff]  }
 0x401   :  { %6088 = vmatprep.subr.bf16.mxu1 %v7825_v0  ;;  %v7901_v0 = vld [vmem:[#allocation12 + $0x1d0] ss:$28 sps:$4 sm:$0xff]  }
 0x403   :  { %6046 = vmatpush1.bf16.msra.mxu0 %v7820_v2  ;;  %v7906_v2 = vld [vmem:[#allocation12 + $0x51c] ss:$28 sps:$4 sm:$0xff]  }
 0x404   :  { %6089 = vmatpush1.bf16.msra.mxu1 %v7823_v3  ;;  %6047 = vmatprep.subr.bf16.mxu0 %v7828_v4  ;;  %v7909_v3 = vld [vmem:[#allocation12 + $0x89c] ss:$28 sps:$4 sm:$0xff]  }
 0x405   :  { %6090 = vmatprep.subr.bf16.mxu1 %v7831_v60  ;;  %v7904_v4 = vld [vmem:[#allocation12 + $0x518] ss:$28 sps:$4 sm:$0xff]  }
 0x406   :  { %v7907_v60 = vld [vmem:[#allocation12 + $0x898] ss:$28 sps:$4 sm:$0xff]  }
 0x407   :  { %6048 = vmatpush1.bf16.msra.mxu0 %v7826_v6  ;;  %v7912_v6 = vld [vmem:[#allocation12 + $0x4e4] ss:$28 sps:$4 sm:$0xff]  }
 0x408   :  { %6091 = vmatpush1.bf16.msra.mxu1 %v7829_v7  ;;  %6049 = vmatprep.subr.bf16.mxu0 %v7834_v9  ;;  %v7915_v7 = vld [vmem:[#allocation12 + $0x864] ss:$28 sps:$4 sm:$0xff]  }
 0x409   :  { %6092 = vmatprep.subr.bf16.mxu1 %v7837_v11  ;;  %v7910_v9 = vld [vmem:[#allocation12 + $0x4e0] ss:$28 sps:$4 sm:$0xff]  }
 0x40a   :  { %v7913_v11 = vld [vmem:[#allocation12 + $0x860] ss:$28 sps:$4 sm:$0xff]  }
 0x40b   :  { %6050 = vmatpush1.bf16.msra.mxu0 %v7832_v14  ;;  %v7918_v14 = vld [vmem:[#allocation12 + $0x4ac] ss:$28 sps:$4 sm:$0xff]  }
 0x40c   :  { %6093 = vmatpush1.bf16.msra.mxu1 %v7835_v15  ;;  %6051 = vmatprep.subr.bf16.mxu0 %v7840_v17  ;;  %v7921_v15 = vld [vmem:[#allocation12 + $0x82c] ss:$28 sps:$4 sm:$0xff]  }
 0x40d   :  { %6094 = vmatprep.subr.bf16.mxu1 %v7843_v19  ;;  %v7916_v17 = vld [vmem:[#allocation12 + $0x4a8] ss:$28 sps:$4 sm:$0xff]  }
 0x40e   :  { %v7919_v19 = vld [vmem:[#allocation12 + $0x828] ss:$28 sps:$4 sm:$0xff]  }
 0x40f   :  { %6052 = vmatpush1.bf16.msra.mxu0 %v7838_v20  ;;  %v7924_v20 = vld [vmem:[#allocation12 + $0x474] ss:$28 sps:$4 sm:$0xff]  }
 0x410   :  { %6095 = vmatpush1.bf16.msra.mxu1 %v7841_v21  ;;  %6053 = vmatprep.subr.bf16.mxu0 %v7846_v39  ;;  %v7927_v21 = vld [vmem:[#allocation12 + $0x7f4] ss:$28 sps:$4 sm:$0xff]  }
 0x411   :  { %6096 = vmatprep.subr.bf16.mxu1 %v7849_v1  ;;  %v7922_v39 = vld [vmem:[#allocation12 + $0x470] ss:$28 sps:$4 sm:$0xff]  }
 0x412   :  { %v7925_v1 = vld [vmem:[#allocation12 + $0x7f0] ss:$28 sps:$4 sm:$0xff]  }
 0x413   :  { %6054 = vmatpush1.bf16.msra.mxu0 %v7844_v22  ;;  %v7930_v22 = vld [vmem:[#allocation12 + $0x43c] ss:$28 sps:$4 sm:$0xff]  }
 0x414   :  { %6097 = vmatpush1.bf16.msra.mxu1 %v7847_v32  ;;  %6055 = vmatprep.subr.bf16.mxu0 %v7852_v5  ;;  %v7933_v32 = vld [vmem:[#allocation12 + $0x7bc] ss:$28 sps:$4 sm:$0xff]  }
 0x415   :  { %6098 = vmatprep.subr.bf16.mxu1 %v7855_v23  ;;  %v7928_v5 = vld [vmem:[#allocation12 + $0x438] ss:$28 sps:$4 sm:$0xff]  }
 0x416   :  { %v7931_v23 = vld [vmem:[#allocation12 + $0x7b8] ss:$28 sps:$4 sm:$0xff]  }
 0x417   :  { %6056 = vmatpush1.bf16.msra.mxu0 %v7850_v24  ;;  %v7936_v24 = vld [vmem:[#allocation12 + $0x404] ss:$28 sps:$4 sm:$0xff]  }
 0x418   :  { %6099 = vmatpush1.bf16.msra.mxu1 %v7853_v37  ;;  %6057 = vmatprep.subr.bf16.mxu0 %v7858_v25  ;;  %v7939_v37 = vld [vmem:[#allocation12 + $0x784] ss:$28 sps:$4 sm:$0xff]  }
 0x419   :  { %6100 = vmatprep.subr.bf16.mxu1 %v7861_v8  ;;  %v7934_v25 = vld [vmem:[#allocation12 + $0x400] ss:$28 sps:$4 sm:$0xff]  }
 0x41a   :  { %v7937_v8 = vld [vmem:[#allocation12 + $0x780] ss:$28 sps:$4 sm:$0xff]  }
 0x41b   :  { %6058 = vmatpush2.bf16.msra.mxu0 %v7856_v38  ;;  %v7942_v38 = vld [vmem:[#allocation12 + $0x3cc] ss:$28 sps:$4 sm:$0xff]  }
 0x41c   :  { %6101 = vmatpush2.bf16.msra.mxu1 %v7859_v36  ;;  %6059 = vmatprep.subr.bf16.mxu0 %v7864_v26  ;;  %v7945_v36 = vld [vmem:[#allocation12 + $0x74c] ss:$28 sps:$4 sm:$0xff]  }
 0x41d   :  { %6102 = vmatprep.subr.bf16.mxu1 %v7867_v27  ;;  %v7940_v26 = vld [vmem:[#allocation12 + $0x3c8] ss:$28 sps:$4 sm:$0xff]  }
 0x41e   :  { %v7943_v27 = vld [vmem:[#allocation12 + $0x748] ss:$28 sps:$4 sm:$0xff]  }
 0x41f   :  { %6060 = vmatpush2.bf16.msra.mxu0 %v7862_v28  ;;  %v7948_v28 = vld [vmem:[#allocation12 + $0x394] ss:$28 sps:$4 sm:$0xff]  }
 0x420   :  { %6103 = vmatpush2.bf16.msra.mxu1 %v7865_v12  ;;  %6061 = vmatprep.subr.bf16.mxu0 %v7870_v13  ;;  %v7951_v12 = vld [vmem:[#allocation12 + $0x714] ss:$28 sps:$4 sm:$0xff]  }
 0x421   :  { %6104 = vmatprep.subr.bf16.mxu1 %v7873_v29  ;;  %v7946_v13 = vld [vmem:[#allocation12 + $0x390] ss:$28 sps:$4 sm:$0xff]  }
 0x422   :  { %v7949_v29 = vld [vmem:[#allocation12 + $0x710] ss:$28 sps:$4 sm:$0xff]  }
 0x423   :  { %6062 = vmatpush2.bf16.msra.mxu0 %v7868_v31  ;;  %v7954_v31 = vld [vmem:[#allocation12 + $0x6dc] ss:$28 sps:$4 sm:$0xff]  }
 0x424   :  { %6105 = vmatpush2.bf16.msra.mxu1 %v7871_v34  ;;  %6063 = vmatprep.subr.bf16.mxu0 %v7876_v35  ;;  %v7957_v34 = vld [vmem:[#allocation12 + $0xa5c] ss:$28 sps:$4 sm:$0xff]  }
 0x425   :  { %6106 = vmatprep.subr.bf16.mxu1 %v7879_v40  ;;  %v7952_v35 = vld [vmem:[#allocation12 + $0x6d8] ss:$28 sps:$4 sm:$0xff]  }
 0x426   :  { %v7955_v40 = vld [vmem:[#allocation12 + $0xa58] ss:$28 sps:$4 sm:$0xff]  }
 0x427   :  { %6064 = vmatpush2.bf16.msra.mxu0 %v7874_v46  ;;  %v7960_v46 = vld [vmem:[#allocation12 + $0x6a4] ss:$28 sps:$4 sm:$0xff]  }
 0x428   :  { %6107 = vmatpush2.bf16.msra.mxu1 %v7877_v47  ;;  %6065 = vmatprep.subr.bf16.mxu0 %v7882_v49  ;;  %v7963_v47 = vld [vmem:[#allocation12 + $0xa24] ss:$28 sps:$4 sm:$0xff]  }
 0x429   :  { %6108 = vmatprep.subr.bf16.mxu1 %v7885_v50  ;;  %v7958_v49 = vld [vmem:[#allocation12 + $0x6a0] ss:$28 sps:$4 sm:$0xff]  }
 0x42a   :  { %v7961_v50 = vld [vmem:[#allocation12 + $0xa20] ss:$28 sps:$4 sm:$0xff]  }
 0x42b   :  { %6066 = vmatpush2.bf16.msra.mxu0 %v7880_v51  ;;  %v7966_v51 = vld [vmem:[#allocation12 + $0x66c] ss:$28 sps:$4 sm:$0xff]  }
 0x42c   :  { %6109 = vmatpush2.bf16.msra.mxu1 %v7883_v52  ;;  %6067 = vmatprep.subr.bf16.mxu0 %v7888_v53  ;;  %v7969_v52 = vld [vmem:[#allocation12 + $0x9ec] ss:$28 sps:$4 sm:$0xff]  }
 0x42d   :  { %6110 = vmatprep.subr.bf16.mxu1 %v7891_v54  ;;  %v7964_v53 = vld [vmem:[#allocation12 + $0x668] ss:$28 sps:$4 sm:$0xff]  }
 0x42e   :  { %v7967_v54 = vld [vmem:[#allocation12 + $0x9e8] ss:$28 sps:$4 sm:$0xff]  }
 0x42f   :  { %6068 = vmatpush2.bf16.msra.mxu0 %v7886_v55  ;;  %v7972_v55 = vld [vmem:[#allocation12 + $0x634] ss:$28 sps:$4 sm:$0xff]  }
 0x430   :  { %6111 = vmatpush2.bf16.msra.mxu1 %v7889_v56  ;;  %6069 = vmatprep.subr.bf16.mxu0 %v7894_v57  ;;  %v7975_v56 = vld [vmem:[#allocation12 + $0x9b4] ss:$28 sps:$4 sm:$0xff]   ;;  %v5774_v57 = vpop.f32.mrf.mxu1 }
 0x431   :  { %6112 = vmatprep.subr.bf16.mxu1 %v7897_v58  ;;  %v7970_v58 = vld [vmem:[#allocation12 + $0x630] ss:$28 sps:$4 sm:$0xff]  }
 0x433   :  { %6070 = vmatpush2.bf16.msra.mxu0 %v7892_v10  ;;  %v7973_v10 = vld [vmem:[#allocation12 + $0x9b0] ss:$28 sps:$4 sm:$0xff]  }
 0x434   :  { %6113 = vmatpush2.bf16.msra.mxu1 %v7895_v59  ;;  %6071 = vmatprep.subr.bf16.mxu0 %v7900_v61  ;;  %v7978_v59 = vld [vmem:[#allocation12 + $0x5fc] ss:$28 sps:$4 sm:$0xff]  }
 0x435   :  { %6114 = vmatprep.subr.bf16.mxu1 %v7903_v62  ;;  %v7981_v61 = vld [vmem:[#allocation12 + $0x97c] ss:$28 sps:$4 sm:$0xff]   ;;  %v5776_v62 = vpop.f32.mrf.mxu1 }
 0x437   :  { %6072 = vmatpush2.bf16.msra.mxu0 %v7898_v63  ;;  %v7976_v63 = vld [vmem:[#allocation12 + $0x5f8] ss:$28 sps:$4 sm:$0xff]  }
 0x438   :  { %6115 = vmatpush2.bf16.msra.mxu1 %v7901_v0  ;;  %6127 = vmatprep.subr.bf16.mxu0 %v7906_v2  ;;  %v7979_v0 = vld [vmem:[#allocation12 + $0x978] ss:$28 sps:$4 sm:$0xff]   ;;  %v7984_v2 = vld [vmem:[#allocation12 + $0x5c4] ss:$28 sps:$4 sm:$0xff]  }
 0x439   :  { %6170 = vmatprep.subr.bf16.mxu1 %v7909_v3  ;;  %v7987_v3 = vld [vmem:[#allocation12 + $0x944] ss:$28 sps:$4 sm:$0xff]  }
 0x43a   :  { %6074 = vmatmul.mubr.bf16.vlgmr.msra.gmra.mxu0 %v8534_v48 }
 0x43b   :  { %6117 = vmatmul.mubr.bf16.vlgmr.msra.gmra.mxu1 %v8491_v42  ;;  %6128 = vmatpush1.bf16.msra.mxu0 %v7904_v4  ;;  %v5778_v4 = vpop.f32.mrf.mxu1 }
 0x43c   :  { %6159 = vmatprep.mubr.bf16.mxu0 %v8498_v16  ;;  %6171 = vmatpush1.bf16.msra.mxu1 %v7907_v60  ;;  %v7982_v60 = vld [vmem:[#allocation12 + $0x5c0] ss:$28 sps:$4 sm:$0xff]  }
 0x43d   :  { %6202 = vmatprep.mubr.bf16.mxu1 %v8519_v41  ;;  %6129 = vmatprep.subr.bf16.mxu0 %v7912_v6  ;;  %v5817_v6 = vpop.f32.mrf.mxu0 }
 0x43e   :  { %6172 = vmatprep.subr.bf16.mxu1 %v7915_v7  ;;  %v7985_v7 = vld [vmem:[#allocation12 + $0x940] ss:$28 sps:$4 sm:$0xff]  }
 0x43f   :  { %6130 = vmatpush1.bf16.msra.mxu0 %v7910_v9  ;;  %v7990_v9 = vld [vmem:[#allocation12 + $0x58c] ss:$28 sps:$4 sm:$0xff]  }
 0x440   :  { %6173 = vmatpush1.bf16.msra.mxu1 %v7913_v11  ;;  %6131 = vmatprep.subr.bf16.mxu0 %v7918_v14  ;;  %v7993_v11 = vld [vmem:[#allocation12 + $0x90c] ss:$28 sps:$4 sm:$0xff]   ;;  %v8549_v14 = vld [vmem:[#allocation13] sm:$0xff] }
 0x441   :  { %6174 = vmatprep.subr.bf16.mxu1 %v7921_v15  ;;  %v5780_v15 = vpop.f32.mrf.mxu1 }
 0x443   :  { %6132 = vmatpush1.bf16.msra.mxu0 %v7916_v17  ;;  %v3407_v17 = vsub.s32 1, %v8405_v30 }
 0x444   :  { %6175 = vmatpush1.bf16.msra.mxu1 %v7919_v19  ;;  %6133 = vmatprep.subr.bf16.mxu0 %v7924_v20  ;;  %v7988_v19 = vld [vmem:[#allocation12 + $0x588] ss:$28 sps:$4 sm:$0xff]   ;;  %v5819_v20 = vpop.f32.mrf.mxu0 }
 0x445   :  { %6176 = vmatprep.subr.bf16.mxu1 %v7927_v21  ;;  %v5860_v21 = vpop.f32.mrf.mxu1 }
 0x447   :  { %6134 = vmatpush1.bf16.msra.mxu0 %v7922_v39  ;;  %v7991_v39 = vld [vmem:[#allocation12 + $0x908] ss:$28 sps:$4 sm:$0xff]  }
 0x448   :  { %6177 = vmatpush1.bf16.msra.mxu1 %v7925_v1  ;;  %6135 = vmatprep.subr.bf16.mxu0 %v7930_v22  ;;  %v7996_v1 = vld [vmem:[#allocation12 + $0x554] ss:$28 sps:$4 sm:$0xff]   ;;  %v3404_v22 = vrot.slane %v8549_v14, %v8411_v33 }
 0x449   :  { %6178 = vmatprep.subr.bf16.mxu1 %v7933_v32  ;;  %v7999_v32 = vld [vmem:[#allocation12 + $0x8d4] ss:$28 sps:$4 sm:$0xff]  }
 0x44b   :  { %6136 = vmatpush1.bf16.msra.mxu0 %v7928_v5  ;;  %v3408_v5 = vrot.slane %v8549_v14, %v3407_v17  ;;  %v8024_v17 = vld [vmem:[#allocation12 + $0xc0] ss:$28 sps:$4 sm:$0xff]  }
 0x44c   :  { %6179 = vmatpush1.bf16.msra.mxu1 %v7931_v23  ;;  %6137 = vmatprep.subr.bf16.mxu0 %v7936_v24  ;;  %v7994_v23 = vld [vmem:[#allocation12 + $0x550] ss:$28 sps:$4 sm:$0xff]   ;;  %v5821_v24 = vpop.f32.mrf.mxu0 }
 0x44d   :  { %6180 = vmatprep.subr.bf16.mxu1 %v7939_v37  ;;  %v5862_v37 = vpop.f32.mrf.mxu1 }
 0x44e   :  { %v5823_v33 = vpop.f32.mrf.mxu0 }
 0x44f   :  { %6138 = vmatpush1.bf16.msra.mxu0 %v7934_v25  ;;  %v7997_v25 = vld [vmem:[#allocation12 + $0x8d0] ss:$28 sps:$4 sm:$0xff]  }
 0x450   :  { %6181 = vmatpush1.bf16.msra.mxu1 %v7937_v8  ;;  %6139 = vmatprep.subr.bf16.mxu0 %v7942_v38  ;;  %v8002_v8 = vld [vmem:[#allocation12 + $0xc1c] ss:$28 sps:$4 sm:$0xff]   ;;  %v5775_v38 = vadd.f32 %v5774_v57, %v3404_v22 }
 0x451   :  { %6182 = vmatprep.subr.bf16.mxu1 %v7945_v36  ;;  %v8003_v36 = vld [vmem:[#allocation12 + $0x360] ss:$28 sps:$4 sm:$0xff]  }
 0x453   :  { %6140 = vmatpush1.bf16.msra.mxu0 %v7940_v26  ;;  %v5777_v26 = vadd.f32 %v5776_v62, %v3408_v5 }
 0x454   :  { %6183 = vmatpush1.bf16.msra.mxu1 %v7943_v27  ;;  %6141 = vmatprep.subr.bf16.mxu0 %v7948_v28  ;;  %v5818_v27 = vadd.f32 %v5817_v6, %v5775_v38  ;;  %v8000_v28 = vld [vmem:[#allocation12 + $0xc18] ss:$28 sps:$4 sm:$0xff]  }
 0x455   :  { %6184 = vmatprep.subr.bf16.mxu1 %v7951_v12  ;;  %v5864_v12 = vpop.f32.mrf.mxu1  ;;  %v8018_v6 = vld [vmem:[#allocation12 + $0x2b8] ss:$28 sps:$4 sm:$0xff]  }
 0x456   :  { %v8038_v38 = vld [vmem:[#allocation12 + $0x1d8] ss:$28 sps:$4 sm:$0xff]  }
 0x457   :  { %6142 = vmatpush1.bf16.msra.mxu0 %v7946_v13  ;;  %v8004_v13 = vld [vmem:[#allocation12 + $0x1a0] ss:$28 sps:$4 sm:$0xff]  }
 0x458   :  { %6185 = vmatpush1.bf16.msra.mxu1 %v7949_v29  ;;  %6143 = vmatprep.subr.bf16.mxu0 %v7954_v31  ;;  %v5779_v29 = vadd.f32 %v5778_v4, %v3404_v22  ;;  %v5820_v31 = vadd.f32 %v5819_v20, %v5777_v26  ;;  %v8017_v4 = vld [vmem:[#allocation12 + $0xb74] ss:$28 sps:$4 sm:$0xff]   ;;  %v8028_v20 = vld [vmem:[#allocation12 + $0x248] ss:$28 sps:$4 sm:$0xff]  }
 0x459   :  { %6186 = vmatprep.subr.bf16.mxu1 %v7957_v34  ;;  %v5861_v34 = vadd.f32 %v5860_v21, %v5818_v27  ;;  %v8029_v22 = vld [vmem:[#allocation12 + $0x88] ss:$28 sps:$4 sm:$0xff]   ;;  %v8039_v26 = vld [vmem:[#allocation12 + $0x18] ss:$28 sps:$4 sm:$0xff]  }
 0x45a   :  { %v8042_v27 = vld [vmem:[#allocation12 + $0xddc] ss:$28 sps:$4 sm:$0xff]  }
 0x45b   :  { %6144 = vmatpush2.bf16.msra.mxu0 %v7952_v35  ;;  %v8007_v35 = vld [vmem:[#allocation12 + $0xbe4] ss:$28 sps:$4 sm:$0xff]  }
 0x45c   :  { %6187 = vmatpush2.bf16.msra.mxu1 %v7955_v40  ;;  %6145 = vmatprep.subr.bf16.mxu0 %v7960_v46  ;;  %v5781_v40 = vadd.f32 %v5780_v15, %v3408_v5  ;;  %v8020_v15 = vld [vmem:[#allocation12 + $0xb38] ss:$28 sps:$4 sm:$0xff]   ;;  %v8033_v5 = vld [vmem:[#allocation12 + $0x210] ss:$28 sps:$4 sm:$0xff]  }
 0x45d   :  { %6188 = vmatprep.subr.bf16.mxu1 %v7963_v47  ;;  %v8008_v47 = vld [vmem:[#allocation12 + $0x328] ss:$28 sps:$4 sm:$0xff]  }
 0x45e   :  { %v5824_v57 = vadd.f32 %v5823_v33, %v5781_v40  ;;  %v8040_v33 = vld [vmem:[#allocation12 + $0xdd8] ss:$28 sps:$4 sm:$0xff]   ;;  %v8053_v40 = vld [vmem:[#allocation12 + $0x9f0] ss:$28 sps:$4 sm:$0xff]  }
 0x45f   :  { %6146 = vmatpush2.bf16.msra.mxu0 %v7958_v49  ;;  %v5822_v49 = vadd.f32 %v5821_v24, %v5779_v29  ;;  %v8030_v24 = vld [vmem:[#allocation12 + $0xac8] ss:$28 sps:$4 sm:$0xff]  }
 0x460   :  { %6189 = vmatpush2.bf16.msra.mxu1 %v7961_v50  ;;  %6147 = vmatprep.subr.bf16.mxu0 %v7966_v51  ;;  %v5863_v50 = vadd.f32 %v5862_v37, %v5820_v31  ;;  %v8048_v29 = vld [vmem:[#allocation12 + $0xa28] ss:$28 sps:$4 sm:$0xff]   ;;  %v8045_v31 = vld [vmem:[#allocation12 + $0xda0] ss:$28 sps:$4 sm:$0xff]  }
 0x461   :  { %6190 = vmatprep.subr.bf16.mxu1 %v7969_v52  ;;  %v8005_v52 = vld [vmem:[#allocation12 + $0xbe0] ss:$28 sps:$4 sm:$0xff]  }
 0x463   :  { %6148 = vmatpush2.bf16.msra.mxu0 %v7964_v53  ;;  %v5866_v53 = vpop.f32.mrf.mxu1 }
 0x464   :  { %6191 = vmatpush2.bf16.msra.mxu1 %v7967_v54  ;;  %6149 = vmatprep.subr.bf16.mxu0 %v7972_v55  ;;  %v8009_v55 = vld [vmem:[#allocation12 + $0x168] ss:$28 sps:$4 sm:$0xff]   ;;  %v5867_v62 = vadd.f32 %v5866_v53, %v5824_v57  ;;  %v8060_v53 = vld [vmem:[#allocation12 + $0xcf8] ss:$28 sps:$4 sm:$0xff]   ;;  %v8065_v57 = vld [vmem:[#allocation12 + $0xcc0] ss:$28 sps:$4 sm:$0xff]  }
 0x465   :  { %6192 = vmatprep.subr.bf16.mxu1 %v7975_v56  ;;  %v8012_v56 = vld [vmem:[#allocation12 + $0xbac] ss:$28 sps:$4 sm:$0xff]  }
 0x467   :  { %6150 = vmatpush2.bf16.msra.mxu0 %v7970_v58  ;;  %v5865_v58 = vadd.f32 %v5864_v12, %v5822_v49  ;;  %v8044_v12 = vld [vmem:[#allocation12 + $0x8a0] ss:$28 sps:$4 sm:$0xff]   ;;  %v8057_v49 = vld [vmem:[#allocation12 + $0xd34] ss:$28 sps:$4 sm:$0xff]  }
 0x468   :  { %6193 = vmatpush2.bf16.msra.mxu1 %v7973_v10  ;;  %6151 = vmatprep.subr.bf16.mxu0 %v7978_v59  ;;  %v8013_v59 = vld [vmem:[#allocation12 + $0x2f0] ss:$28 sps:$4 sm:$0xff]  }
 0x469   :  { %6194 = vmatprep.subr.bf16.mxu1 %v7981_v61 }
 0x46b   :  { %6152 = vmatpush2.bf16.msra.mxu0 %v7976_v63 }
 0x46c   :  { %6195 = vmatpush2.bf16.msra.mxu1 %v7979_v0  ;;  %6153 = vmatprep.subr.bf16.mxu0 %v7984_v2  ;;  %v8010_v0 = vld [vmem:[#allocation12 + $0xba8] ss:$28 sps:$4 sm:$0xff]  }
 0x46d   :  { %6196 = vmatprep.subr.bf16.mxu1 %v7987_v3  ;;  %v8014_v3 = vld [vmem:[#allocation12 + $0x130] ss:$28 sps:$4 sm:$0xff]  }
 0x46f   :  { %6154 = vmatpush2.bf16.msra.mxu0 %v7982_v60 }
 0x470   :  { %6197 = vmatpush2.bf16.msra.mxu1 %v7985_v7  ;;  %6155 = vmatprep.subr.bf16.mxu0 %v7990_v9  ;;  %v8019_v7 = vld [vmem:[#allocation12 + $0xf8] ss:$28 sps:$4 sm:$0xff]  }
 0x471   :  { %6198 = vmatprep.subr.bf16.mxu1 %v7993_v11  ;;  %v8022_v9 = vld [vmem:[#allocation12 + $0xb3c] ss:$28 sps:$4 sm:$0xff]  }
 0x472   :  { %v8023_v11 = vld [vmem:[#allocation12 + $0x280] ss:$28 sps:$4 sm:$0xff]  }
 0x473   :  { %6156 = vmatpush2.bf16.msra.mxu0 %v7988_v19  ;;  %v8027_v19 = vld [vmem:[#allocation12 + $0xb04] ss:$28 sps:$4 sm:$0xff]  }
 0x474   :  { %6199 = vmatpush2.bf16.msra.mxu1 %v7991_v39  ;;  %6157 = vmatprep.subr.bf16.mxu0 %v7996_v1  ;;  %v8025_v39 = vld [vmem:[#allocation12 + $0xb00] ss:$28 sps:$4 sm:$0xff]  }
 0x475   :  { %6200 = vmatprep.subr.bf16.mxu1 %v7999_v32  ;;  %v8032_v32 = vld [vmem:[#allocation12 + $0xacc] ss:$28 sps:$4 sm:$0xff]  }
 0x477   :  { %6158 = vmatpush2.bf16.msra.mxu0 %v7994_v23 }
 0x478   :  { %6201 = vmatpush2.bf16.msra.mxu1 %v7997_v25  ;;  %6213 = vmatprep.subr.bf16.mxu0 %v8002_v8  ;;  %v8034_v25 = vld [vmem:[#allocation12 + $0x50] ss:$28 sps:$4 sm:$0xff]  }
 0x479   :  { %7244 = vmatprep.subr.bf16.mxu1 %v8003_v36  ;;  %v8037_v8 = vld [vmem:[#allocation12 + $0xa94] ss:$28 sps:$4 sm:$0xff]  }
 0x47a   :  { %6160 = vmatmul.mubr.bf16.vlgmr.msra.gmra.mxu0 %v8500_v18  ;;  %v5903_v46 = vpop.f32.mrf.mxu0  ;;  %v8035_v36 = vld [vmem:[#allocation12 + $0xa90] ss:$28 sps:$4 sm:$0xff]  }
 0x47b   :  { %6203 = vmatmul.mubr.bf16.vlgmr.msra.gmra.mxu1 %v8521_v44  ;;  %v5904_v51 = vadd.f32 %v5903_v46, %v5861_v34  ;;  %6214 = vmatpush1.bf16.msra.mxu0 %v8000_v28  ;;  %v8043_v28 = vld [vmem:[#allocation12 + $0xa60] ss:$28 sps:$4 sm:$0xff]   ;;  %v8049_v34 = vld [vmem:[#allocation12 + $0x868] ss:$28 sps:$4 sm:$0xff]  }
 0x47c   :  { %6245 = vmatprep.mubr.bf16.mxu0 %v8532_v43  ;;  %7245 = vmatpush3.bf16.msra.mxu1 %v8004_v13  ;;  %v5905_v54 = vpop.f32.mrf.mxu0  ;;  %v8047_v13 = vld [vmem:[#allocation12 + $0xda4] ss:$28 sps:$4 sm:$0xff]  }
 0x47d   :  { %8112 = vtanh.f32 %v5904_v51  ;;  %6288 = vmatprep.mubr.bf16.mxu1 %v8481_v45  ;;  %v5906_v10 = vadd.f32 %v5905_v54, %v5863_v50  ;;  %6215 = vmatprep.subr.bf16.mxu0 %v8007_v35  ;;  %v8015_v45 = vld [vmem:[#allocation12 + $0xb70] ss:$28 sps:$4 sm:$0xff]   ;;  %v8050_v46 = vld [vmem:[#allocation12 + $0xd68] ss:$28 sps:$4 sm:$0xff]   ;;  %v8058_v50 = vld [vmem:[#allocation12 + $0x9b8] ss:$28 sps:$4 sm:$0xff]  }
 0x47e   :  { %7246 = vmatprep.subr.bf16.mxu1 %v8008_v47  ;;  %v5907_v61 = vpop.f32.mrf.mxu0  ;;  %v8052_v35 = vld [vmem:[#allocation12 + $0xd6c] ss:$28 sps:$4 sm:$0xff]   ;;  %v8059_v51 = vld [vmem:[#allocation12 + $0x7f8] ss:$28 sps:$4 sm:$0xff]   ;;  %v8064_v54 = vld [vmem:[#allocation12 + $0x7c0] ss:$28 sps:$4 sm:$0xff]  }
 0x47f   :  { %8114 = vtanh.f32 %v5906_v10  ;;  %v5908_v63 = vadd.f32 %v5907_v61, %v5865_v58  ;;  %6216 = vmatpush1.bf16.msra.mxu0 %v8005_v52  ;;  %v8054_v47 = vld [vmem:[#allocation12 + $0x830] ss:$28 sps:$4 sm:$0xff]   ;;  %v8062_v52 = vld [vmem:[#allocation12 + $0xcfc] ss:$28 sps:$4 sm:$0xff]   ;;  %v8069_v58 = vld [vmem:[#allocation12 + $0x788] ss:$28 sps:$4 sm:$0xff]  }
 0x480   :  { %7247 = vmatpush3.bf16.msra.mxu1 %v8009_v55  ;;  %v5909_v2 = vpop.f32.mrf.mxu0  ;;  %6217 = vmatprep.subr.bf16.mxu0 %v8012_v56  ;;  %v8067_v55 = vld [vmem:[#allocation12 + $0xcc4] ss:$28 sps:$4 sm:$0xff]   ;;  %v8072_v10 = vld [vmem:[#allocation12 + $0xc8c] ss:$28 sps:$4 sm:$0xff]  }
 0x481   :  { %8116 = vtanh.f32 %v5908_v63  ;;  %v5910_v60 = vadd.f32 %v5909_v2, %v5867_v62  ;;  %7248 = vmatprep.subr.bf16.mxu1 %v8013_v59  ;;  %v8068_v56 = vld [vmem:[#allocation12 + $0x948] ss:$28 sps:$4 sm:$0xff]   ;;  %v8073_v59 = vld [vmem:[#allocation12 + $0x910] ss:$28 sps:$4 sm:$0xff]  }
 0x482   :  { %v8070_v61 = vld [vmem:[#allocation12 + $0xc88] ss:$28 sps:$4 sm:$0xff]   ;;  %v8074_v62 = vld [vmem:[#allocation12 + $0x750] ss:$28 sps:$4 sm:$0xff]  }
 0x483   :  { %8118 = vtanh.f32 %v5910_v60  ;;  %6218 = vmatpush1.bf16.msra.mxu0 %v8010_v0  ;;  %v8077_v63 = vld [vmem:[#allocation12 + $0xc54] ss:$28 sps:$4 sm:$0xff]   ;;  %v8081_v60 = vld [vmem:[#allocation12 + $0x520] ss:$28 sps:$4 sm:$0xff]  }
 0x484   :  { %7249 = vmatpush3.bf16.msra.mxu1 %v8014_v3  ;;  %6219 = vmatprep.subr.bf16.mxu0 %v8017_v4  ;;  %v8078_v0 = vld [vmem:[#allocation12 + $0x8d8] ss:$28 sps:$4 sm:$0xff]   ;;  %v8075_v2 = vld [vmem:[#allocation12 + $0xc50] ss:$28 sps:$4 sm:$0xff]   ;;  %v8080_v4 = vld [vmem:[#allocation12 + $0x6e0] ss:$28 sps:$4 sm:$0xff]  }
 0x485   :  { %7250 = vmatprep.subr.bf16.mxu1 %v8018_v6  ;;  %v8079_v3 = vld [vmem:[#allocation12 + $0x718] ss:$28 sps:$4 sm:$0xff]   ;;  %v8082_v6 = vld [vmem:[#allocation12 + $0x6a8] ss:$28 sps:$4 sm:$0xff]  }
 0x487   :  { %6220 = vmatpush1.bf16.msra.mxu0 %v8015_v45  ;;  %v8083_v45 = vld [vmem:[#allocation12 + $0x4e8] ss:$28 sps:$4 sm:$0xff]  }
 0x488   :  { %7251 = vmatpush3.bf16.msra.mxu1 %v8019_v7  ;;  %6221 = vmatprep.subr.bf16.mxu0 %v8022_v9  ;;  %v8084_v7 = vld [vmem:[#allocation12 + $0x670] ss:$28 sps:$4 sm:$0xff]  }
 0x489   :  { %7252 = vmatprep.subr.bf16.mxu1 %v8023_v11  ;;  %v8085_v9 = vld [vmem:[#allocation12 + $0x4b0] ss:$28 sps:$4 sm:$0xff]   ;;  %v8086_v11 = vld [vmem:[#allocation12 + $0x638] ss:$28 sps:$4 sm:$0xff]  }
 0x48a   :  { %v8113_v21 = vpop.eup %8112 }
 0x48b   :  { %6434 = vst [vmem:[%s8628_s9] sm:$0xff] %v8113_v21  ;;  %6222 = vmatpush1.bf16.msra.mxu0 %v8020_v15  ;;  %v8087_v15 = vld [vmem:[#allocation12 + $0x478] ss:$28 sps:$4 sm:$0xff]   ;;  %v8092_v21 = vld [vmem:[#allocation12 + $0x590] ss:$28 sps:$4 sm:$0xff]  }
 0x48c   :  { %v8115_v1 = vpop.eup %8114  ;;  %7253 = vmatpush3.bf16.msra.mxu1 %v8024_v17  ;;  %6223 = vmatprep.subr.bf16.mxu0 %v8027_v19  ;;  %v8088_v17 = vld [vmem:[#allocation12 + $0x600] ss:$28 sps:$4 sm:$0xff]  }
 0x48d   :  { %6435 = vst [vmem:[%s8628_s9 + $0x8] sm:$0xff] %v8115_v1  ;;  %7254 = vmatprep.subr.bf16.mxu1 %v8028_v20  ;;  %v8089_v19 = vld [vmem:[#allocation12 + $0x440] ss:$28 sps:$4 sm:$0xff]   ;;  %v8090_v20 = vld [vmem:[#allocation12 + $0x5c8] ss:$28 sps:$4 sm:$0xff]  }
 0x48e   :  { %v8117_v23 = vpop.eup %8116  ;;  %v8095_v1 = vld [vmem:[#allocation12 + $0x398] ss:$28 sps:$4 sm:$0xff]  }
 0x48f   :  { %6441 = vst [vmem:[%s8628_s9 + $0x38] sm:$0xff] %v8117_v23  ;;  %6224 = vmatpush1.bf16.msra.mxu0 %v8025_v39  ;;  %v8094_v39 = vld [vmem:[#allocation12 + $0x558] ss:$28 sps:$4 sm:$0xff]   ;;  %v8099_v23 = vld [vmem:[#allocation12 + $0xbe8] ss:$28 sps:$4 sm:$0xff]  }
 0x490   :  { %v8119_v37 = vpop.eup %8118  ;;  %7255 = vmatpush3.bf16.msra.mxu1 %v8029_v22  ;;  %6225 = vmatprep.subr.bf16.mxu0 %v8032_v32  ;;  %v8096_v22 = vld [vmem:[#allocation12 + $0xde0] ss:$28 sps:$4 sm:$0xff]  }
 0x491   :  { %6442 = vst [vmem:[%s8628_s9 + $0x40] sm:$0xff] %v8119_v37  ;;  %7256 = vmatprep.subr.bf16.mxu1 %v8033_v5  ;;  %v8097_v32 = vld [vmem:[#allocation12 + $0xc20] ss:$28 sps:$4 sm:$0xff]   ;;  %v8098_v5 = vld [vmem:[#allocation12 + $0xda8] ss:$28 sps:$4 sm:$0xff]  }
 0x492   :  { %v8101_v37 = vld [vmem:[#allocation12 + $0xbb0] ss:$28 sps:$4 sm:$0xff]  }
 0x493   :  { %6226 = vmatpush1.bf16.msra.mxu0 %v8030_v24  ;;  %v8100_v24 = vld [vmem:[#allocation12 + $0xd70] ss:$28 sps:$4 sm:$0xff]  }
 0x494   :  { %7257 = vmatpush3.bf16.msra.mxu1 %v8034_v25  ;;  %6227 = vmatprep.subr.bf16.mxu0 %v8037_v8  ;;  %v8102_v25 = vld [vmem:[#allocation12 + $0xd38] ss:$28 sps:$4 sm:$0xff]  }
 0x495   :  { %7258 = vmatprep.subr.bf16.mxu1 %v8038_v38  ;;  %v8103_v8 = vld [vmem:[#allocation12 + $0xb78] ss:$28 sps:$4 sm:$0xff]   ;;  %v5946_v38 = vpop.f32.mrf.mxu1 }
 0x497   :  { %6228 = vmatpush1.bf16.msra.mxu0 %v8035_v36  ;;  %v8104_v36 = vld [vmem:[#allocation12 + $0xd00] ss:$28 sps:$4 sm:$0xff]  }
 0x498   :  { %7259 = vmatpush3.bf16.msra.mxu1 %v8039_v26  ;;  %6229 = vmatprep.subr.bf16.mxu0 %v8042_v27  ;;  %v8105_v26 = vld [vmem:[#allocation12 + $0xb40] ss:$28 sps:$4 sm:$0xff]   ;;  %v5948_v27 = vpop.f32.mrf.mxu1 }
 0x499   :  { %7288 = vmatprep.subr.bf16.mxu1 %v8043_v28  ;;  %v3411_v28 = vsub.s32 2, %v8405_v30 }
 0x49b   :  { %6289 = vmatmul.mubr.bf16.vlgmr.msra.gmra.mxu1 %v8491_v42  ;;  %6230 = vmatpush2.bf16.msra.mxu0 %v8040_v33  ;;  %v8055_v42 = vld [vmem:[#allocation12 + $0xd30] ss:$28 sps:$4 sm:$0xff]   ;;  %v5950_v33 = vpop.f32.mrf.mxu1 }
 0x49c   :  { %7289 = vmatpush3.bf16.msra.mxu1 %v8044_v12  ;;  %6370 = vmatprep.mubr.bf16.mxu1 %v8519_v41  ;;  %v8063_v41 = vld [vmem:[#allocation12 + $0x980] ss:$28 sps:$4 sm:$0xff]  }
 0x49d   :  { %6231 = vmatprep.subr.bf16.mxu0 %v8047_v13  ;;  %7290 = vmatprep.subr.bf16.mxu1 %v8048_v29  ;;  %v8108_v13 = vld [vmem:[#allocation12 + $0xc90] ss:$28 sps:$4 sm:$0xff]   ;;  %v3415_v29 = vsub.s32 3, %v8405_v30 }
 0x49f   :  { %6232 = vmatpush2.bf16.msra.mxu0 %v8045_v31  ;;  %v3412_v31 = vrot.slane %v8549_v14, %v3411_v28 }
 0x4a0   :  { %7291 = vmatpush3.bf16.msra.mxu1 %v8049_v34  ;;  %6233 = vmatprep.subr.bf16.mxu0 %v8052_v35  ;;  %v8109_v34 = vld [vmem:[#allocation12 + $0xad0] ss:$28 sps:$4 sm:$0xff]   ;;  %v5952_v35 = vpop.f32.mrf.mxu1 }
 0x4a1   :  { %7292 = vmatprep.subr.bf16.mxu1 %v8053_v40 }
 0x4a3   :  { %6234 = vmatpush2.bf16.msra.mxu0 %v8050_v46  ;;  %v8110_v46 = vld [vmem:[#allocation12 + $0xc58] ss:$28 sps:$4 sm:$0xff]  }
 0x4a4   :  { %7293 = vmatpush3.bf16.msra.mxu1 %v8054_v47  ;;  %6235 = vmatprep.subr.bf16.mxu0 %v8057_v49  ;;  %v3416_v47 = vrot.slane %v8549_v14, %v3415_v29 }
 0x4a5   :  { %7294 = vmatprep.subr.bf16.mxu1 %v8058_v50  ;;  %v5947_v50 = vadd.f32 %v5946_v38, %v3412_v31 }
 0x4a7   :  { %6236 = vmatpush2.bf16.msra.mxu0 %v8055_v42  ;;  %v8111_v42 = vld [vmem:[#allocation12 + $0xa98] ss:$28 sps:$4 sm:$0xff]  }
 0x4a8   :  { %7295 = vmatpush3.bf16.msra.mxu1 %v8059_v51  ;;  %6237 = vmatprep.subr.bf16.mxu0 %v8062_v52  ;;  %v5949_v52 = vadd.f32 %v5948_v27, %v3416_v47 }
 0x4a9   :  { %7296 = vmatprep.subr.bf16.mxu1 %v8063_v41 }
 0x4ab   :  { %6238 = vmatpush2.bf16.msra.mxu0 %v8060_v53 }
 0x4ac   :  { %7297 = vmatpush3.bf16.msra.mxu1 %v8064_v54  ;;  %6239 = vmatprep.subr.bf16.mxu0 %v8067_v55  ;;  %v5951_v54 = vadd.f32 %v5950_v33, %v3412_v31 }
 0x4ad   :  { %7298 = vmatprep.subr.bf16.mxu1 %v8068_v56 }
 0x4af   :  { %6240 = vmatpush2.bf16.msra.mxu0 %v8065_v57  ;;  %v5953_v57 = vadd.f32 %v5952_v35, %v3416_v47 }
 0x4b0   :  { %7299 = vmatpush3.bf16.msra.mxu1 %v8069_v58  ;;  %6241 = vmatprep.subr.bf16.mxu0 %v8072_v10 }
 0x4b1   :  { %7300 = vmatprep.subr.bf16.mxu1 %v8073_v59 }
 0x4b3   :  { %6242 = vmatpush2.bf16.msra.mxu0 %v8070_v61 }
 0x4b4   :  { %7301 = vmatpush3.bf16.msra.mxu1 %v8074_v62  ;;  %6243 = vmatprep.subr.bf16.mxu0 %v8077_v63 }
 0x4b5   :  { %7302 = vmatprep.subr.bf16.mxu1 %v8078_v0 }
 0x4b7   :  { %6244 = vmatpush2.bf16.msra.mxu0 %v8075_v2 }
 0x4b8   :  { %7303 = vmatpush3.bf16.msra.mxu1 %v8079_v3  ;;  %7266 = vmatprep.subr.bf16.mxu0 %v8080_v4 }
 0x4ba   :  { %6246 = vmatmul.mubr.bf16.vlgmr.msra.gmra.mxu0 %v8534_v48  ;;  %v5989_v12 = vpop.f32.mrf.mxu0  ;;  %v6032_v49 = vpop.f32.mrf.mxu1 }
 0x4bb   :  { %6371 = vmatmul.mubr.bf16.vlgmr.msra.gmra.mxu1 %v8521_v44  ;;  %7267 = vmatpush3.bf16.msra.mxu0 %v8081_v60  ;;  %v8091_v44 = vld [vmem:[#allocation12 + $0x408] ss:$28 sps:$4 sm:$0xff]   ;;  %v5990_v41 = vadd.f32 %v5989_v12, %v5947_v50 }
 0x4bc   :  { %6329 = vmatprep.mubr.bf16.mxu0 %v8498_v16  ;;  %7268 = vmatprep.subr.bf16.mxu0 %v8082_v6  ;;  %v8093_v16 = vld [vmem:[#allocation12 + $0x3d0] ss:$28 sps:$4 sm:$0xff]   ;;  %v5991_v40 = vpop.f32.mrf.mxu0  ;;  %v6034_v53 = vpop.f32.mrf.mxu1 }
 0x4bd   :  { %v5992_v55 = vadd.f32 %v5991_v40, %v5949_v52  ;;  %v6033_v58 = vadd.f32 %v6032_v49, %v5990_v41 }
 0x4be   :  { %v5993_v51 = vpop.f32.mrf.mxu0  ;;  %v6036_v59 = vpop.f32.mrf.mxu1 }
 0x4bf   :  { %7269 = vmatpush3.bf16.msra.mxu0 %v8083_v45  ;;  %v5994_v10 = vadd.f32 %v5993_v51, %v5951_v54  ;;  %v6035_v62 = vadd.f32 %v6034_v53, %v5992_v55 }
 0x4c0   :  { %7270 = vmatprep.subr.bf16.mxu0 %v8084_v7  ;;  %v5995_v56 = vpop.f32.mrf.mxu0  ;;  %v6038_v60 = vpop.f32.mrf.mxu1 }
 0x4c1   :  { %v5996_v63 = vadd.f32 %v5995_v56, %v5953_v57  ;;  %v6037_v3 = vadd.f32 %v6036_v59, %v5994_v10 }
 0x4c3   :  { %7271 = vmatpush3.bf16.msra.mxu0 %v8085_v9  ;;  %v6039_v45 = vadd.f32 %v6038_v60, %v5996_v63 }
 0x4c4   :  { %7272 = vmatprep.subr.bf16.mxu0 %v8086_v11 }
 0x4c7   :  { %7273 = vmatpush3.bf16.msra.mxu0 %v8087_v15 }
 0x4c8   :  { %7274 = vmatprep.subr.bf16.mxu0 %v8088_v17 }
 0x4cb   :  { %7275 = vmatpush3.bf16.msra.mxu0 %v8089_v19 }
 0x4cc   :  { %7276 = vmatprep.subr.bf16.mxu0 %v8090_v20 }
 0x4cf   :  { %7277 = vmatpush3.bf16.msra.mxu0 %v8091_v44 }
 0x4d0   :  { %7278 = vmatprep.subr.bf16.mxu0 %v8092_v21  ;;  %v3419_v21 = vsub.s32 4, %v8405_v30 }
 0x4d3   :  { %7279 = vmatpush3.bf16.msra.mxu0 %v8093_v16 }
 0x4d4   :  { %7280 = vmatprep.subr.bf16.mxu0 %v8094_v39 }
 0x4d7   :  { %7281 = vmatpush3.bf16.msra.mxu0 %v8095_v1  ;;  %v3423_v1 = vsub.s32 5, %v8405_v30 }
 0x4d8   :  { %7310 = vmatprep.subr.bf16.mxu0 %v8096_v22  ;;  %v3420_v22 = vrot.slane %v8549_v14, %v3419_v21 }
 0x4da   :  { %6330 = vmatmul.mubr.bf16.vlgmr.msra.gmra.mxu0 %v8500_v18  ;;  %v8106_v18 = vld [vmem:[#allocation12 + $0xcc8] ss:$28 sps:$4 sm:$0xff]  }
 0x4db   :  { %7311 = vmatpush3.bf16.msra.mxu0 %v8097_v32  ;;  %6411 = vmatprep.mubr.bf16.mxu0 %v8532_v43  ;;  %v8107_v43 = vld [vmem:[#allocation12 + $0xb08] ss:$28 sps:$4 sm:$0xff]  }
 0x4dc   :  { %7312 = vmatprep.subr.bf16.mxu0 %v8098_v5 }
 0x4df   :  { %7313 = vmatpush3.bf16.msra.mxu0 %v8099_v23  ;;  %v3424_v23 = vrot.slane %v8549_v14, %v3423_v1 }
 0x4e0   :  { %7314 = vmatprep.subr.bf16.mxu0 %v8100_v24 }
 0x4e3   :  { %7315 = vmatpush3.bf16.msra.mxu0 %v8101_v37 }
 0x4e4   :  { %7316 = vmatprep.subr.bf16.mxu0 %v8102_v25 }
 0x4e7   :  { %7317 = vmatpush3.bf16.msra.mxu0 %v8103_v8 }
 0x4e8   :  { %7318 = vmatprep.subr.bf16.mxu0 %v8104_v36 }
 0x4eb   :  { %7319 = vmatpush3.bf16.msra.mxu0 %v8105_v26 }
 0x4ec   :  { %7320 = vmatprep.subr.bf16.mxu0 %v8106_v18 }
 0x4ef   :  { %7321 = vmatpush3.bf16.msra.mxu0 %v8107_v43 }
 0x4f0   :  { %7322 = vmatprep.subr.bf16.mxu0 %v8108_v13 }
 0x4f3   :  { %7323 = vmatpush3.bf16.msra.mxu0 %v8109_v34 }
 0x4f4   :  { %7324 = vmatprep.subr.bf16.mxu0 %v8110_v46 }
 0x4f7   :  { %7325 = vmatpush3.bf16.msra.mxu0 %v8111_v42 }
 0x4fa   :  { %v6075_v61 = vpop.f32.mrf.mxu0  ;;  %6412 = vmatmul.mubr.bf16.vlgmr.msra.gmra.mxu0 %v8534_v48 }
 0x4fb   :  { %v6076_v0 = vadd.f32 %v6075_v61, %v6033_v58  ;;  %v6118_v20 = vpop.f32.mrf.mxu1 }
 0x4fc   :  { %v6077_v2 = vpop.f32.mrf.mxu0  ;;  %v6119_v37 = vadd.f32 %v6118_v20, %v3420_v22 }
 0x4fd   :  { %8120 = vtanh.f32 %v6076_v0  ;;  %v6078_v4 = vadd.f32 %v6077_v2, %v6035_v62  ;;  %v6120_v44 = vpop.f32.mrf.mxu1  ;;  %v3427_v62 = vsub.s32 6, %v8405_v30 }
 0x4fe   :  { %v6079_v6 = vpop.f32.mrf.mxu0  ;;  %v6121_v8 = vadd.f32 %v6120_v44, %v3424_v23 }
 0x4ff   :  { %8122 = vtanh.f32 %v6078_v4  ;;  %v6080_v7 = vadd.f32 %v6079_v6, %v6037_v3  ;;  %v6122_v16 = vpop.f32.mrf.mxu1  ;;  %v3428_v2 = vrot.slane %v8549_v14, %v3427_v62 }
 0x500   :  { %v6081_v9 = vpop.f32.mrf.mxu0  ;;  %v6123_v26 = vadd.f32 %v6122_v16, %v3420_v22 }
 0x501   :  { %8124 = vtanh.f32 %v6080_v7  ;;  %v6082_v11 = vadd.f32 %v6081_v9, %v6039_v45  ;;  %v6124_v32 = vpop.f32.mrf.mxu1 }
 0x502   :  { %v6125_v28 = vadd.f32 %v6124_v32, %v3424_v23 }
 0x503   :  { %8126 = vtanh.f32 %v6082_v11 }
 0x50a   :  { %v8121_v15 = vpop.eup %8120 }
 0x50b   :  { %6436 = vst [vmem:[%s8628_s9 + $0x10] sm:$0xff] %v8121_v15 }
 0x50c   :  { %v8123_v48 = vpop.eup %8122 }
 0x50d   :  { %6437 = vst [vmem:[%s8628_s9 + $0x18] sm:$0xff] %v8123_v48 }
 0x50e   :  { %v8125_v17 = vpop.eup %8124 }
 0x50f   :  { %6443 = vst [vmem:[%s8628_s9 + $0x48] sm:$0xff] %v8125_v17 }
 0x510   :  { %v8127_v19 = vpop.eup %8126 }
 0x511   :  { %6444 = vst [vmem:[%s8628_s9 + $0x50] sm:$0xff] %v8127_v19 }
 0x53a   :  { %v6161_v39 = vpop.f32.mrf.mxu0 }
 0x53b   :  { %v6204_v24 = vpop.f32.mrf.mxu1  ;;  %v6162_v38 = vadd.f32 %v6161_v39, %v6119_v37 }
 0x53c   :  { %v6163_v5 = vpop.f32.mrf.mxu0 }
 0x53d   :  { %v6206_v36 = vpop.f32.mrf.mxu1  ;;  %v6164_v27 = vadd.f32 %v6163_v5, %v6121_v8  ;;  %v6205_v43 = vadd.f32 %v6204_v24, %v6162_v38 }
 0x53e   :  { %v6165_v25 = vpop.f32.mrf.mxu0 }
 0x53f   :  { %v6166_v33 = vadd.f32 %v6165_v25, %v6123_v26  ;;  %v6208_v12 = vpop.f32.mrf.mxu1  ;;  %v6207_v29 = vadd.f32 %v6206_v36, %v6164_v27 }
 0x540   :  { %v6167_v18 = vpop.f32.mrf.mxu0 }
 0x541   :  { %v6168_v31 = vadd.f32 %v6167_v18, %v6125_v28  ;;  %v6209_v40 = vadd.f32 %v6208_v12, %v6166_v33  ;;  %v6210_v47 = vpop.f32.mrf.mxu1 }
 0x543   :  { %v6211_v50 = vadd.f32 %v6210_v47, %v6168_v31 }
 0x55b   :  { %v7260_v56 = vpop.f32.mrf.mxu1 }
 0x55d   :  { %v7261_v57 = vpop.f32.mrf.mxu1 }
 0x55e   :  { %v7262_v3 = vadd.f32 %v7261_v57, %v7260_v56 }
 0x55f   :  { %v7263_v58 = vpop.f32.mrf.mxu1 }
 0x560   :  { %v6291_v45 = vadd.f32 %v7262_v3, %v3428_v2 }
 0x561   :  { %v7264_v59 = vpop.f32.mrf.mxu1 }
 0x562   :  { %v7265_v7 = vadd.f32 %v7264_v59, %v7263_v58 }
 0x564   :  { %v6294_v17 = vadd.f32 %v7265_v7, %v3428_v2 }
 0x57a   :  { %v6247_v13 = vpop.f32.mrf.mxu0 }
 0x57b   :  { %v6248_v34 = vadd.f32 %v6247_v13, %v6205_v43  ;;  %v7304_v63 = vpop.f32.mrf.mxu1 }
 0x57c   :  { %v6249_v35 = vpop.f32.mrf.mxu0 }
 0x57d   :  { %8128 = vtanh.f32 %v6248_v34  ;;  %v6250_v46 = vadd.f32 %v6249_v35, %v6207_v29  ;;  %v7305_v4 = vpop.f32.mrf.mxu1 }
 0x57e   :  { %v6251_v49 = vpop.f32.mrf.mxu0  ;;  %v7306_v19 = vadd.f32 %v7305_v4, %v7304_v63 }
 0x57f   :  { %8130 = vtanh.f32 %v6250_v46  ;;  %v6252_v42 = vadd.f32 %v6251_v49, %v6209_v40  ;;  %v7307_v9 = vpop.f32.mrf.mxu1 }
 0x580   :  { %v6253_v51 = vpop.f32.mrf.mxu0 }
 0x581   :  { %8132 = vtanh.f32 %v6252_v42  ;;  %v6254_v52 = vadd.f32 %v6253_v51, %v6211_v50  ;;  %v7308_v20 = vpop.f32.mrf.mxu1 }
 0x582   :  { %v7309_v1 = vadd.f32 %v7308_v20, %v7307_v9 }
 0x583   :  { %8134 = vtanh.f32 %v6254_v52 }
 0x58a   :  { %v8129_v41 = vpop.eup %8128 }
 0x58b   :  { %6438 = vst [vmem:[%s8628_s9 + $0x20] sm:$0xff] %v8129_v41 }
 0x58c   :  { %v8131_v53 = vpop.eup %8130 }
 0x58d   :  { %6439 = vst [vmem:[%s8628_s9 + $0x28] sm:$0xff] %v8131_v53 }
 0x58e   :  { %v8133_v54 = vpop.eup %8132 }
 0x58f   :  { %6445 = vst [vmem:[%s8628_s9 + $0x58] sm:$0xff] %v8133_v54 }
 0x590   :  { %v8135_v55 = vpop.eup %8134 }
 0x591   :  { %6446 = vst [vmem:[%s8628_s9 + $0x60] sm:$0xff] %v8135_v55 }
 0x59a   :  { %v7282_v10 = vpop.f32.mrf.mxu0 }
 0x59c   :  { %v7283_v61 = vpop.f32.mrf.mxu0 }
 0x59d   :  { %v7284_v60 = vadd.f32 %v7283_v61, %v7282_v10 }
 0x59e   :  { %v7285_v0 = vpop.f32.mrf.mxu0 }
 0x59f   :  { %v6332_v11 = vadd.f32 %v7284_v60, %v6291_v45 }
 0x5a0   :  { %v7286_v6 = vpop.f32.mrf.mxu0 }
 0x5a1   :  { %v7287_v15 = vadd.f32 %v7286_v6, %v7285_v0  ;;  %v6373_v30 = vadd.f32 %v7306_v19, %v6332_v11 }
 0x5a3   :  { %v6335_v21 = vadd.f32 %v7287_v15, %v6294_v17 }
 0x5a5   :  { %v6376_v32 = vadd.f32 %v7309_v1, %v6335_v21 }
 0x5ba   :  { %v7326_v48 = vpop.f32.mrf.mxu0 }
 0x5bc   :  { %v7327_v44 = vpop.f32.mrf.mxu0 }
 0x5bd   :  { %v7328_v16 = vadd.f32 %v7327_v44, %v7326_v48 }
 0x5be   :  { %v7329_v39 = vpop.f32.mrf.mxu0 }
 0x5bf   :  { %v6414_v14 = vadd.f32 %v7328_v16, %v6373_v30 }
 0x5c0   :  { %v7330_v22 = vpop.f32.mrf.mxu0 }
 0x5c1   :  { %8136 = vtanh.f32 %v6414_v14  ;;  %v7331_v5 = vadd.f32 %v7330_v22, %v7329_v39 }
 0x5c3   :  { %v6417_v23 = vadd.f32 %v7331_v5, %v6376_v32 }
 0x5c5   :  { %8138 = vtanh.f32 %v6417_v23 }
 0x5ce   :  { %v8137_v24 = vpop.eup %8136 }
 0x5cf   :  { %6440 = vst [vmem:[%s8628_s9 + $0x30] sm:$0xff] %v8137_v24 }
 0x5d2   :  { %v8139_v37 = vpop.eup %8138 }
 0x5d3   :  { %6447 = vst [vmem:[%s8628_s9 + $0x68] sm:$0xff] %v8139_v37 }
 0x5d4   :  { %6452 = vsyncpa [#allocation3], 1 }
 0x5d5   :  { %6453 = vsyncpa [#allocation5], 1 }
 0x5d6   :  { %6454 = vsyncpa [#allocation8], 1 }
 0x5d7   :  { %6455 = vsyncpa [#allocation11], 1 }
 0x5d8   :  { %6456 = vsyncpa [#allocation14], 1 }

</bundles_post_ra>
